<compile_context>
chip_gen: v7x
topology: tpu7x:2x2x1
jax: 0.10.0
libtpu: 0.0.40
codegen_flags: <defaults>
</compile_context>

<pallas_src>
import jax
import jax.numpy as jnp
from jax import lax
from jax.experimental import pallas as pl
from jax.experimental.pallas import tpu as pltpu


# ----------------------------------------------------------------------------
# Fused kernel: fc1 (K-tiled, int8 weights) + cross-attention + fc2 + fc3
# ----------------------------------------------------------------------------
def _fused_head_kernel(x_ref, w1_ref, ctx_ref, wq_ref, wkv_ref,
                       w2a_ref, w2b_ref, w3_ref, bsc_ref,
                       o_ref, acc_ref, kv_ref):
    # Static dims (from block shapes) and lane-aligned offsets into the fused
    # bias/scale vector: [b1 | bq | b2 | b3 | w1_scale | bkv].
    fc_dim = w1_ref.shape[1]
    attn_dim = wq_ref.shape[1]
    kv_dim = wkv_ref.shape[1]
    b1_off = 0
    bq_off = fc_dim
    b2_off = fc_dim + attn_dim
    b3_off = 2 * fc_dim + attn_dim
    sc_off = 3 * fc_dim + attn_dim
    bkv_off = 4 * fc_dim + attn_dim
    scale = float(attn_dim) ** -0.5

    k = pl.program_id(1)

    @pl.when(k == 0)
    def _():
        acc_ref[...] = jnp.zeros_like(acc_ref)
        # Hoisted context K/V projection: independent of the fc1 reduction, so
        # compute it at step 0 (overlaps the step-1 w1 DMA) and cache in VMEM.
        kv_ref[...] = (jnp.dot(ctx_ref[...], wkv_ref[...],
                               preferred_element_type=jnp.float32)
                       + bsc_ref[:, bkv_off:bkv_off + kv_dim])

    # fc1 partial product.  w1 is int8 *storage only*; convert to bf16 so the
    # matmul stays on the bf16 MXU path on every generation (incl. v7x).
    acc_ref[...] += jnp.dot(x_ref[...], w1_ref[...].astype(jnp.bfloat16),
                            preferred_element_type=jnp.float32)

    @pl.when(k == pl.num_programs(1) - 1)
    def _():
        b1 = bsc_ref[:, b1_off:b1_off + fc_dim]
        bq = bsc_ref[:, bq_off:bq_off + attn_dim]
        b2 = bsc_ref[:, b2_off:b2_off + fc_dim]
        b3 = bsc_ref[:, b3_off:b3_off + fc_dim]
        w1_scale = bsc_ref[:, sc_off:sc_off + fc_dim]

        # fc1 epilogue: per-output-channel dequant + bias + ReLU.
        feat = jnp.maximum(acc_ref[...] * w1_scale + b1, 0.0)       # (Nt, fc_dim)
        feat_bf = feat.astype(jnp.bfloat16)

        # --- contextual_instance_transformer (single-head cross-attention) ---
        q = jnp.dot(feat_bf, wq_ref[...],
                    preferred_element_type=jnp.float32) + bq        # (Nt, attn_dim)
        kt = kv_ref[:, :attn_dim]                                   # (L, attn_dim)
        v = kv_ref[:, attn_dim:]                                    # (L, attn_out)

        # scores = q @ k^T : contract last dims (no explicit transpose).
        s = lax.dot_general(q, kt, (((1,), (1,)), ((), ())),
                            preferred_element_type=jnp.float32) * scale
        m = jnp.max(s, axis=-1, keepdims=True)
        p = jnp.exp(s - m)
        denom = jnp.sum(p, axis=-1, keepdims=True)
        attn = jnp.dot(p, v, preferred_element_type=jnp.float32)
        attn = attn * pl.reciprocal(denom, approx=True)             # (Nt, attn_out)

        # fc2 on concat(feat, attn) without materializing the concat:
        #   concat(feat, attn) @ w2 == feat @ w2[:fc_dim] + attn @ w2[fc_dim:]
        h2 = (jnp.dot(feat_bf, w2a_ref[...], preferred_element_type=jnp.float32)
              + jnp.dot(attn.astype(jnp.bfloat16), w2b_ref[...],
                        preferred_element_type=jnp.float32)
              + b2)
        h2 = jnp.maximum(h2, 0.0)

        # fc3 + ReLU.
        h3 = jnp.dot(h2.astype(jnp.bfloat16), w3_ref[...],
                     preferred_element_type=jnp.float32) + b3
        o_ref[...] = jnp.maximum(h3, 0.0).astype(o_ref.dtype)


# ----------------------------------------------------------------------------
# Wrapper
# ----------------------------------------------------------------------------
def _pick_tk(K, max_tk=8192):
    """Largest divisor of K that is a multiple of 128 and <= max_tk."""
    best = None
    t = 128
    while t <= min(K, max_tk):
        if K % t == 0:
            best = t
        t += 128
    return best if best is not None else K


def _pick_n_tile(N, max_nt=256):
    """N-tile for the parallel grid axis (single tile when N is small)."""
    if N <= max_nt:
        return N
    best = N
    t = 16
    while t <= max_nt:
        if N % t == 0:
            best = t
        t += 16
    return best


def saliency_head_forward(x_flat, w1_q, ctx, wq, wkv, w2a, w2b, w3, bias_scale):
    """Single fused pallas_call for the whole head.

    x_flat/ctx/tail-weights are bf16, w1_q is int8 (per-channel scale folded
    into bias_scale), accumulation is f32 on the MXU.
    """
    N, K = x_flat.shape
    fc_dim = w1_q.shape[1]
    L, ctx_dim = ctx.shape
    attn_dim = wq.shape[1]
    kv_dim = wkv.shape[1]
    attn_out = kv_dim - attn_dim

    # Lane-aligned slicing of kv / bias_scale requires 128-multiples.
    assert fc_dim % 128 == 0 and attn_dim % 128 == 0 and kv_dim % 128 == 0

    tk = _pick_tk(K)                     # K = 12544 -> tk = 6272 (2 K-steps)
    n_tile = _pick_n_tile(N)             # demo N = 8 -> single N tile
    assert K % tk == 0 and N % n_tile == 0

    const = lambda n, k: (0, 0)          # VMEM-resident across the whole grid
    return pl.pallas_call(
        _fused_head_kernel,
        out_shape=jax.ShapeDtypeStruct((N, fc_dim), jnp.float32),
        grid_spec=pltpu.PrefetchScalarGridSpec(
            num_scalar_prefetch=0,
            grid=(N // n_tile, K // tk),
            in_specs=[
                pl.BlockSpec((n_tile, tk), lambda n, k: (n, k)),    # x (bf16)
                pl.BlockSpec((tk, fc_dim), lambda n, k: (k, 0)),    # w1 (int8)
                pl.BlockSpec((L, ctx_dim), const),                  # ctx tokens (bf16)
                pl.BlockSpec((fc_dim, attn_dim), const),            # wq (bf16)
                pl.BlockSpec((ctx_dim, kv_dim), const),             # wkv fused k|v (bf16)
                pl.BlockSpec((fc_dim, fc_dim), const),              # w2[:fc_dim] (bf16)
                pl.BlockSpec((attn_out, fc_dim), const),            # w2[fc_dim:] (bf16)
                pl.BlockSpec((fc_dim, fc_dim), const),              # w3 (bf16)
                pl.BlockSpec((1, bias_scale.shape[1]), const),      # fused biases+scale
            ],
            out_specs=pl.BlockSpec((n_tile, fc_dim), lambda n, k: (n, 0)),
            scratch_shapes=[
                pltpu.VMEM((n_tile, fc_dim), jnp.float32),          # fc1 accumulator
                pltpu.VMEM((L, kv_dim), jnp.float32),               # hoisted K|V cache
            ],
        ),
        # N tiles are independent -> "parallel" (second TensorCore on v7x when
        # batching many ROIs); K is the fc1 reduction -> trailing "arbitrary".
        compiler_params=pltpu.CompilerParams(
            dimension_semantics=("parallel", "arbitrary")),
    )(x_flat, w1_q, ctx, wq, wkv, w2a, w2b, w3, bias_scale)


# ----------------------------------------------------------------------------
# Module
# ----------------------------------------------------------------------------
def _init_linear_params(key, fan_in, fan_out):
    # TODO(synk): deterministic stand-in for weight_init.c2_xavier_fill (bias=0).
    w = jax.random.normal(key, (fan_in, fan_out), jnp.float32) * \
        (2.0 / fan_in) ** 0.5
    b = jnp.zeros((1, fan_out), jnp.float32)
    return w, b


class SaliencyFastRCNNConvFCHeadPallas:
    def __init__(self, key, fc_dim=128, ctx_dim=128, attn_dim=128,
                 batch_size_per_image=8):
        self.fc_dim = fc_dim
        self.batch_size_per_image = batch_size_per_image
        in_dim = 256 * 7 * 7          # hard-coded (256, 7, 7) in the module
        fc2_in = 1152                 # hard-coded after k == 0
        attn_out_dim = fc2_in - fc_dim

        ks = jax.random.split(key, 6)
        w1, self.b1 = _init_linear_params(ks[0], in_dim, fc_dim)
        w2, self.b2 = _init_linear_params(ks[1], fc2_in, fc_dim)
        w3, self.b3 = _init_linear_params(ks[2], fc_dim, fc_dim)
        # Synthetic contextual_instance_transformer params (see TODO above).
        wq, self.bq = _init_linear_params(ks[3], fc_dim, attn_dim)
        wk, bk = _init_linear_params(ks[4], ctx_dim, attn_dim)
        wv, bv = _init_linear_params(ks[5], ctx_dim, attn_out_dim)

        # --- kernel-friendly precomputed layouts ------------------------------
        # w1 (dominant HBM stream): int8 storage + per-output-channel scale,
        # dequantized after the f32 accumulate inside the kernel epilogue.
        # (On v7x an fp8 store would work too; int8-as-storage with bf16
        #  compute is generation-agnostic since no int matmul is ever issued.)
        absmax = jnp.maximum(jnp.max(jnp.abs(w1), axis=0, keepdims=True), 1e-8)
        self.w1_scale = absmax / 127.0                      # (1, fc_dim) f32
        self.w1_q = jnp.round(w1 / self.w1_scale).astype(jnp.int8)

        # Resident tail weights -> bf16 (f32 MXU accumulation in-kernel).
        self.wq_bf = wq.astype(jnp.bfloat16)
        self.wkv_bf = jnp.concatenate([wk, wv], axis=1).astype(jnp.bfloat16)
        self.w2a_bf = w2[:fc_dim].astype(jnp.bfloat16)      # fc2 rows hit by feat
        self.w2b_bf = w2[fc_dim:].astype(jnp.bfloat16)      # fc2 rows hit by attn
        self.w3_bf = w3.astype(jnp.bfloat16)
        self.bkv = jnp.concatenate([bk, bv], axis=1)        # (1, 1152) f32

        # All biases + w1 dequant scale fused into a single f32 input.
        # Layout (lane-aligned): [b1 | bq | b2 | b3 | w1_scale | bkv]
        self.bias_scale = jnp.concatenate(
            [self.b1, self.bq, self.b2, self.b3, self.w1_scale, self.bkv],
            axis=1)
        self.out_size = fc_dim

    def __call__(self, x, x_batch_index, scene_context_feat):
        del x_batch_index  # unused in the reference forward (eval path)
        n = x.shape[0]
        x_flat = x.reshape(n, -1).astype(jnp.bfloat16)            # flatten(x, 1)
        c = scene_context_feat.shape[1]
        ctx = scene_context_feat[0].reshape(c, -1).T.astype(jnp.bfloat16)
        return saliency_head_forward(
            x_flat, self.w1_q, ctx, self.wq_bf, self.wkv_bf,
            self.w2a_bf, self.w2b_bf, self.w3_bf, self.bias_scale)


# ----------------------------------------------------------------------------
# Pure-JAX reference (mirrors the kernel's int8/bf16 weight storage)
# ----------------------------------------------------------------------------
def _reference_forward(head, x, scene_context_feat):
    n = x.shape[0]
    hp = lax.Precision.HIGHEST
    f32 = jnp.float32

    xf = x.reshape(n, -1).astype(jnp.bfloat16).astype(f32)
    w1_deq = head.w1_q.astype(f32) * head.w1_scale
    feat = jnp.maximum(jnp.dot(xf, w1_deq, precision=hp) + head.b1, 0.0)
    feat_bf = feat.astype(jnp.bfloat16).astype(f32)

    c = scene_context_feat.shape[1]
    ctx = scene_context_feat[0].reshape(c, -1).T.astype(jnp.bfloat16).astype(f32)
    wq = head.wq_bf.astype(f32)
    wkv = head.wkv_bf.astype(f32)
    w2a = head.w2a_bf.astype(f32)
    w2b = head.w2b_bf.astype(f32)
    w3 = head.w3_bf.astype(f32)

    q = jnp.dot(feat_bf, wq, precision=hp) + head.bq
    kv = jnp.dot(ctx, wkv, precision=hp) + head.bkv
    attn_dim = wq.shape[1]
    kt, v = kv[:, :attn_dim], kv[:, attn_dim:]
    s = jnp.dot(q, kt.T, precision=hp) / float(attn_dim) ** 0.5
    p = jax.nn.softmax(s, axis=-1)
    attn = jnp.dot(p, v, precision=hp)
    attn_bf = attn.astype(jnp.bfloat16).astype(f32)

    h2 = jnp.maximum(jnp.dot(feat_bf, w2a, precision=hp)
                     + jnp.dot(attn_bf, w2b, precision=hp) + head.b2, 0.0)
    h2_bf = h2.astype(jnp.bfloat16).astype(f32)
    h3 = jnp.maximum(jnp.dot(h2_bf, w3, precision=hp) + head.b3, 0.0)
    return h3


# ----------------------------------------------------------------------------
if __name__ == "__main__":
    key = jax.random.PRNGKey(0)
    kx, kc, kp = jax.random.split(key, 3)

    N = 8                                    # number of ROI proposals
    FC_DIM = 128
    x = jax.random.normal(kx, (N, 256, 7, 7), jnp.float32)
    x_batch_index = jnp.zeros((N,), jnp.int32)
    scene_context_feat = jax.random.normal(kc, (1, 128, 4, 4), jnp.float32)

    head = SaliencyFastRCNNConvFCHeadPallas(kp, fc_dim=FC_DIM,
                                            batch_size_per_image=N)
    out = head(x, x_batch_index, scene_context_feat)
    jax.block_until_ready(out)

    assert out.shape == (N, FC_DIM), out.shape
    assert out.dtype == jnp.float32
    assert bool(jnp.all(jnp.isfinite(out)))
    assert bool(jnp.all(out >= 0.0))         # final ReLU

    ref = _reference_forward(head, x, scene_context_feat)
    jax.block_until_ready(ref)
    assert bool(jnp.allclose(out, ref, rtol=5e-2, atol=5e-2)), \
        float(jnp.max(jnp.abs(out - ref)))

    print("KERNEL_OK")
</pallas_src>

<mosaic_0001>
module attributes {stable_mosaic.version = 11 : i64} {
  func.func @_fused_head_kernel(%arg0: i32, %arg1: i32, %arg2: memref<8x6272xbf16, #tpu.memory_space<vmem>>, %arg3: memref<6272x128xi8, #tpu.memory_space<vmem>>, %arg4: memref<16x128xbf16, #tpu.memory_space<vmem>>, %arg5: memref<128x128xbf16, #tpu.memory_space<vmem>>, %arg6: memref<128x1152xbf16, #tpu.memory_space<vmem>>, %arg7: memref<128x128xbf16, #tpu.memory_space<vmem>>, %arg8: memref<1024x128xbf16, #tpu.memory_space<vmem>>, %arg9: memref<128x128xbf16, #tpu.memory_space<vmem>>, %arg10: memref<1x1792xf32, #tpu.memory_space<vmem>>, %arg11: memref<8x128xf32, #tpu.memory_space<vmem>>, %arg12: memref<8x128xf32, #tpu.memory_space<vmem>>, %arg13: memref<16x1152xf32, #tpu.memory_space<vmem>>) attributes {dimension_semantics = [#tpu.dimension_semantics<parallel>, #tpu.dimension_semantics<arbitrary>], iteration_bounds = array<i64: 1, 2>, scalar_prefetch = 0 : i64, scratch_operands = 2 : i64, tpu.core_type = #tpu.core_type<tc>, window_params = [{transform_indices = @transform_0, window_bounds = array<i64: 8, 6272>}, {transform_indices = @transform_1, window_bounds = array<i64: 6272, 128>}, {pipeline_mode = #tpu.pipeline_mode<synchronous>, transform_indices = @transform_2, window_bounds = array<i64: 16, 128>}, {pipeline_mode = #tpu.pipeline_mode<synchronous>, transform_indices = @transform_3, window_bounds = array<i64: 128, 128>}, {pipeline_mode = #tpu.pipeline_mode<synchronous>, transform_indices = @transform_4, window_bounds = array<i64: 128, 1152>}, {pipeline_mode = #tpu.pipeline_mode<synchronous>, transform_indices = @transform_5, window_bounds = array<i64: 128, 128>}, {pipeline_mode = #tpu.pipeline_mode<synchronous>, transform_indices = @transform_6, window_bounds = array<i64: 1024, 128>}, {pipeline_mode = #tpu.pipeline_mode<synchronous>, transform_indices = @transform_7, window_bounds = array<i64: 128, 128>}, {pipeline_mode = #tpu.pipeline_mode<synchronous>, transform_indices = @transform_8, window_bounds = array<i64: 1, 1792>}, {transform_indices = @transform_9, window_bounds = array<i64: 8, 128>}]} {
    %c0_i32 = arith.constant 0 : i32
    %0 = arith.cmpi eq, %arg1, %c0_i32 : i32
    %1 = arith.extui %0 : i1 to i32
    %c0_i32_0 = arith.constant 0 : i32
    %2 = arith.cmpi ne, %1, %c0_i32_0 : i32
    scf.if %2 {
      %cst_9 = arith.constant 0.000000e+00 : f32
      %13 = vector.broadcast %cst_9 : f32 to vector<8x128xf32>
      %c0_10 = arith.constant 0 : index
      %c0_11 = arith.constant 0 : index
      %14 = vector.load %arg12[%c0_10, %c0_11] : memref<8x128xf32, #tpu.memory_space<vmem>>, vector<8x128xf32>
      tpu.vector_store %arg12[%c0_10, %c0_11], %13 {strides = array<i32>} : memref<8x128xf32, #tpu.memory_space<vmem>>, vector<8x128xf32>,
      %c0_12 = arith.constant 0 : index
      %c0_13 = arith.constant 0 : index
      %15 = vector.load %arg4[%c0_12, %c0_13] : memref<16x128xbf16, #tpu.memory_space<vmem>>, vector<16x128xbf16>
      %c0_14 = arith.constant 0 : index
      %c0_15 = arith.constant 0 : index
      %16 = vector.load %arg6[%c0_14, %c0_15] : memref<128x1152xbf16, #tpu.memory_space<vmem>>, vector<128x1152xbf16>
      %cst_16 = arith.constant dense<0.000000e+00> : vector<16x1152xf32>
      %17 = tpu.matmul %15, %16, %cst_16 {dimension_numbers = #tpu.dot_dimension_numbers<[1], [0], [0], [1], [0, 0, 1, 1], [], []>} : vector<16x128xbf16>, vector<128x1152xbf16>, vector<16x1152xf32> -> vector<16x1152xf32>
      %c0_17 = arith.constant 0 : index
      %c640 = arith.constant 640 : index
      %18 = vector.load %arg10[%c0_17, %c640] : memref<1x1792xf32, #tpu.memory_space<vmem>>, vector<1x1152xf32>
      %19 = vector.broadcast %18 : vector<1x1152xf32> to vector<16x1152xf32>
      %20 = arith.addf %17, %19 : vector<16x1152xf32>
      %c0_18 = arith.constant 0 : index
      %c0_19 = arith.constant 0 : index
      %21 = vector.load %arg13[%c0_18, %c0_19] : memref<16x1152xf32, #tpu.memory_space<vmem>>, vector<16x1152xf32>
      tpu.vector_store %arg13[%c0_18, %c0_19], %20 {strides = array<i32>} : memref<16x1152xf32, #tpu.memory_space<vmem>>, vector<16x1152xf32>,
    } else {
    }
    %c0 = arith.constant 0 : index
    %c0_1 = arith.constant 0 : index
    %3 = vector.load %arg12[%c0, %c0_1] : memref<8x128xf32, #tpu.memory_space<vmem>>, vector<8x128xf32>
    %c0_2 = arith.constant 0 : index
    %c0_3 = arith.constant 0 : index
    %4 = vector.load %arg2[%c0_2, %c0_3] : memref<8x6272xbf16, #tpu.memory_space<vmem>>, vector<8x6272xbf16>
    %c0_4 = arith.constant 0 : index
    %c0_5 = arith.constant 0 : index
    %5 = vector.load %arg3[%c0_4, %c0_5] : memref<6272x128xi8, #tpu.memory_space<vmem>>, vector<6272x128xi8>
    %6 = arith.sitofp %5 : vector<6272x128xi8> to vector<6272x128xbf16>
    %cst = arith.constant dense<0.000000e+00> : vector<8x128xf32>
    %7 = tpu.matmul %4, %6, %cst {dimension_numbers = #tpu.dot_dimension_numbers<[1], [0], [0], [1], [0, 0, 1, 1], [], []>} : vector<8x6272xbf16>, vector<6272x128xbf16>, vector<8x128xf32> -> vector<8x128xf32>
    %8 = arith.addf %3, %7 : vector<8x128xf32>
    %c0_6 = arith.constant 0 : index
    %c0_7 = arith.constant 0 : index
    %9 = vector.load %arg12[%c0_6, %c0_7] : memref<8x128xf32, #tpu.memory_space<vmem>>, vector<8x128xf32>
    tpu.vector_store %arg12[%c0_6, %c0_7], %8 {strides = array<i32>} : memref<8x128xf32, #tpu.memory_space<vmem>>, vector<8x128xf32>,
    %c1_i32 = arith.constant 1 : i32
    %10 = arith.cmpi eq, %arg1, %c1_i32 : i32
    %11 = arith.extui %10 : i1 to i32
    %c0_i32_8 = arith.constant 0 : i32
    %12 = arith.cmpi ne, %11, %c0_i32_8 : i32
    scf.if %12 {
      %c0_9 = arith.constant 0 : index
      %c0_10 = arith.constant 0 : index
      %13 = vector.load %arg10[%c0_9, %c0_10] : memref<1x1792xf32, #tpu.memory_space<vmem>>, vector<1x128xf32>
      %c0_11 = arith.constant 0 : index
      %c128 = arith.constant 128 : index
      %14 = vector.load %arg10[%c0_11, %c128] : memref<1x1792xf32, #tpu.memory_space<vmem>>, vector<1x128xf32>
      %c0_12 = arith.constant 0 : index
      %c256 = arith.constant 256 : index
      %15 = vector.load %arg10[%c0_12, %c256] : memref<1x1792xf32, #tpu.memory_space<vmem>>, vector<1x128xf32>
      %c0_13 = arith.constant 0 : index
      %c384 = arith.constant 384 : index
      %16 = vector.load %arg10[%c0_13, %c384] : memref<1x1792xf32, #tpu.memory_space<vmem>>, vector<1x128xf32>
      %c0_14 = arith.constant 0 : index
      %c512 = arith.constant 512 : index
      %17 = vector.load %arg10[%c0_14, %c512] : memref<1x1792xf32, #tpu.memory_space<vmem>>, vector<1x128xf32>
      %c0_15 = arith.constant 0 : index
      %c0_16 = arith.constant 0 : index
      %18 = vector.load %arg12[%c0_15, %c0_16] : memref<8x128xf32, #tpu.memory_space<vmem>>, vector<8x128xf32>
      %19 = vector.broadcast %17 : vector<1x128xf32> to vector<8x128xf32>
      %20 = arith.mulf %18, %19 : vector<8x128xf32>
      %21 = vector.broadcast %13 : vector<1x128xf32> to vector<8x128xf32>
      %22 = arith.addf %20, %21 : vector<8x128xf32>
      %cst_17 = arith.constant 0.000000e+00 : f32
      %23 = vector.broadcast %cst_17 : f32 to vector<8x128xf32>
      %24 = arith.maximumf %22, %23 : vector<8x128xf32>
      %25 = arith.truncf %24 : vector<8x128xf32> to vector<8x128xbf16>
      %c0_18 = arith.constant 0 : index
      %c0_19 = arith.constant 0 : index
      %26 = vector.load %arg5[%c0_18, %c0_19] : memref<128x128xbf16, #tpu.memory_space<vmem>>, vector<128x128xbf16>
      %cst_20 = arith.constant dense<0.000000e+00> : vector<8x128xf32>
      %27 = tpu.matmul %25, %26, %cst_20 {dimension_numbers = #tpu.dot_dimension_numbers<[1], [0], [0], [1], [0, 0, 1, 1], [], []>} : vector<8x128xbf16>, vector<128x128xbf16>, vector<8x128xf32> -> vector<8x128xf32>
      %28 = vector.broadcast %14 : vector<1x128xf32> to vector<8x128xf32>
      %29 = arith.addf %27, %28 : vector<8x128xf32>
      %c0_21 = arith.constant 0 : index
      %c0_22 = arith.constant 0 : index
      %30 = vector.load %arg13[%c0_21, %c0_22] : memref<16x1152xf32, #tpu.memory_space<vmem>>, vector<16x128xf32>
      %c0_23 = arith.constant 0 : index
      %c128_24 = arith.constant 128 : index
      %31 = vector.load %arg13[%c0_23, %c128_24] : memref<16x1152xf32, #tpu.memory_space<vmem>>, vector<16x1024xf32>
      %cst_25 = arith.constant dense<0.000000e+00> : vector<8x16xf32>
      %32 = tpu.matmul %29, %30, %cst_25 {dimension_numbers = #tpu.dot_dimension_numbers<[1], [1], [0], [0], [0, 0, 1, 0], [], []>} : vector<8x128xf32>, vector<16x128xf32>, vector<8x16xf32> -> vector<8x16xf32>
      %cst_26 = arith.constant 0.0883883461 : f32
      %33 = vector.broadcast %cst_26 : f32 to vector<8x16xf32>
      %34 = arith.mulf %32, %33 : vector<8x16xf32>
      %cst_27 = arith.constant dense<0xFF800000> : vector<8xf32>
      %35 = vector.multi_reduction <maximumf>, %34, %cst_27 [1] : vector<8x16xf32> to vector<8xf32>
      %36 = vector.shape_cast %35 : vector<8xf32> to vector<8x1xf32>
      %37 = vector.broadcast %36 : vector<8x1xf32> to vector<8x16xf32>
      %38 = arith.subf %34, %37 : vector<8x16xf32>
      %39 = math.exp %38 : vector<8x16xf32>
      %cst_28 = arith.constant dense<0.000000e+00> : vector<8xf32>
      %40 = vector.multi_reduction <add>, %39, %cst_28 [1] : vector<8x16xf32> to vector<8xf32>
      %41 = vector.shape_cast %40 : vector<8xf32> to vector<8x1xf32>
      %cst_29 = arith.constant dense<0.000000e+00> : vector<8x1024xf32>
      %42 = tpu.matmul %39, %31, %cst_29 {dimension_numbers = #tpu.dot_dimension_numbers<[1], [0], [0], [1], [0, 0, 1, 1], [], []>} : vector<8x16xf32>, vector<16x1024xf32>, vector<8x1024xf32> -> vector<8x1024xf32>
      %43 = tpu.reciprocal %41 {approx = true} : vector<8x1xf32> -> vector<8x1xf32>
      %44 = vector.broadcast %43 : vector<8x1xf32> to vector<8x1024xf32>
      %45 = arith.mulf %42, %44 : vector<8x1024xf32>
      %c0_30 = arith.constant 0 : index
      %c0_31 = arith.constant 0 : index
      %46 = vector.load %arg7[%c0_30, %c0_31] : memref<128x128xbf16, #tpu.memory_space<vmem>>, vector<128x128xbf16>
      %cst_32 = arith.constant dense<0.000000e+00> : vector<8x128xf32>
      %47 = tpu.matmul %25, %46, %cst_32 {dimension_numbers = #tpu.dot_dimension_numbers<[1], [0], [0], [1], [0, 0, 1, 1], [], []>} : vector<8x128xbf16>, vector<128x128xbf16>, vector<8x128xf32> -> vector<8x128xf32>
      %48 = arith.truncf %45 : vector<8x1024xf32> to vector<8x1024xbf16>
      %c0_33 = arith.constant 0 : index
      %c0_34 = arith.constant 0 : index
      %49 = vector.load %arg8[%c0_33, %c0_34] : memref<1024x128xbf16, #tpu.memory_space<vmem>>, vector<1024x128xbf16>
      %cst_35 = arith.constant dense<0.000000e+00> : vector<8x128xf32>
      %50 = tpu.matmul %48, %49, %cst_35 {dimension_numbers = #tpu.dot_dimension_numbers<[1], [0], [0], [1], [0, 0, 1, 1], [], []>} : vector<8x1024xbf16>, vector<1024x128xbf16>, vector<8x128xf32> -> vector<8x128xf32>
      %51 = arith.addf %47, %50 : vector<8x128xf32>
      %52 = vector.broadcast %15 : vector<1x128xf32> to vector<8x128xf32>
      %53 = arith.addf %51, %52 : vector<8x128xf32>
      %cst_36 = arith.constant 0.000000e+00 : f32
      %54 = vector.broadcast %cst_36 : f32 to vector<8x128xf32>
      %55 = arith.maximumf %53, %54 : vector<8x128xf32>
      %56 = arith.truncf %55 : vector<8x128xf32> to vector<8x128xbf16>
      %c0_37 = arith.constant 0 : index
      %c0_38 = arith.constant 0 : index
      %57 = vector.load %arg9[%c0_37, %c0_38] : memref<128x128xbf16, #tpu.memory_space<vmem>>, vector<128x128xbf16>
      %cst_39 = arith.constant dense<0.000000e+00> : vector<8x128xf32>
      %58 = tpu.matmul %56, %57, %cst_39 {dimension_numbers = #tpu.dot_dimension_numbers<[1], [0], [0], [1], [0, 0, 1, 1], [], []>} : vector<8x128xbf16>, vector<128x128xbf16>, vector<8x128xf32> -> vector<8x128xf32>
      %59 = vector.broadcast %16 : vector<1x128xf32> to vector<8x128xf32>
      %60 = arith.addf %58, %59 : vector<8x128xf32>
      %cst_40 = arith.constant 0.000000e+00 : f32
      %61 = vector.broadcast %cst_40 : f32 to vector<8x128xf32>
      %62 = arith.maximumf %60, %61 : vector<8x128xf32>
      %c0_41 = arith.constant 0 : index
      %c0_42 = arith.constant 0 : index
      %63 = vector.load %arg11[%c0_41, %c0_42] : memref<8x128xf32, #tpu.memory_space<vmem>>, vector<8x128xf32>
      tpu.vector_store %arg11[%c0_41, %c0_42], %62 {strides = array<i32>} : memref<8x128xf32, #tpu.memory_space<vmem>>, vector<8x128xf32>,
    } else {
    }
    return
  }
  func.func @transform_0(%arg0: i32, %arg1: i32) -> (i32, i32) {
    %c0_i32 = arith.constant 0 : i32
    return %arg0, %arg1 : i32, i32
  }
  func.func @transform_1(%arg0: i32, %arg1: i32) -> (i32, i32) {
    %c0_i32 = arith.constant 0 : i32
    %c0_i32_0 = arith.constant 0 : i32
    return %arg1, %c0_i32 : i32, i32
  }
  func.func @transform_2(%arg0: i32, %arg1: i32) -> (i32, i32) {
    %c0_i32 = arith.constant 0 : i32
    %c0_i32_0 = arith.constant 0 : i32
    %c0_i32_1 = arith.constant 0 : i32
    return %c0_i32, %c0_i32_0 : i32, i32
  }
  func.func @transform_3(%arg0: i32, %arg1: i32) -> (i32, i32) {
    %c0_i32 = arith.constant 0 : i32
    %c0_i32_0 = arith.constant 0 : i32
    %c0_i32_1 = arith.constant 0 : i32
    return %c0_i32, %c0_i32_0 : i32, i32
  }
  func.func @transform_4(%arg0: i32, %arg1: i32) -> (i32, i32) {
    %c0_i32 = arith.constant 0 : i32
    %c0_i32_0 = arith.constant 0 : i32
    %c0_i32_1 = arith.constant 0 : i32
    return %c0_i32, %c0_i32_0 : i32, i32
  }
  func.func @transform_5(%arg0: i32, %arg1: i32) -> (i32, i32) {
    %c0_i32 = arith.constant 0 : i32
    %c0_i32_0 = arith.constant 0 : i32
    %c0_i32_1 = arith.constant 0 : i32
    return %c0_i32, %c0_i32_0 : i32, i32
  }
  func.func @transform_6(%arg0: i32, %arg1: i32) -> (i32, i32) {
    %c0_i32 = arith.constant 0 : i32
    %c0_i32_0 = arith.constant 0 : i32
    %c0_i32_1 = arith.constant 0 : i32
    return %c0_i32, %c0_i32_0 : i32, i32
  }
  func.func @transform_7(%arg0: i32, %arg1: i32) -> (i32, i32) {
    %c0_i32 = arith.constant 0 : i32
    %c0_i32_0 = arith.constant 0 : i32
    %c0_i32_1 = arith.constant 0 : i32
    return %c0_i32, %c0_i32_0 : i32, i32
  }
  func.func @transform_8(%arg0: i32, %arg1: i32) -> (i32, i32) {
    %c0_i32 = arith.constant 0 : i32
    %c0_i32_0 = arith.constant 0 : i32
    %c0_i32_1 = arith.constant 0 : i32
    return %c0_i32, %c0_i32_0 : i32, i32
  }
  func.func @transform_9(%arg0: i32, %arg1: i32) -> (i32, i32) {
    %c0_i32 = arith.constant 0 : i32
    %c0_i32_0 = arith.constant 0 : i32
    return %arg0, %c0_i32 : i32, i32
  }
}

</mosaic_0001>

<bundles_post_ra>
// kernel: tpu_custom_call.1
= control target key start
LH: loop header
LB: loop body
LE: loop exit
PB: predicated region body
PF: predicated region fallthrough
CT: control target
= control target key end

     0   :  { %s7341_s0 = inlined_call_operand.hbm [shape: bf16[8,12544], index: 0, kind: input, shape index: {}]   ;;  %s7342_s1 = inlined_call_operand.hbm [shape: s8[12544,128], index: 1, kind: input, shape index: {}]   ;;  %s7343_s2 = inlined_call_operand.hbm [shape: bf16[16,128], index: 2, kind: input, shape index: {}]   ;;  %s7344_s3 = inlined_call_operand.hbm [shape: bf16[128,128], index: 3, kind: input, shape index: {}]   ;;  %s7345_s4 = inlined_call_operand.hbm [shape: bf16[128,1152], index: 4, kind: input, shape index: {}]   ;;  %s7346_s5 = inlined_call_operand.hbm [shape: bf16[128,128], index: 5, kind: input, shape index: {}]   ;;  %s7347_s6 = inlined_call_operand.hbm [shape: bf16[1024,128], index: 6, kind: input, shape index: {}]   ;;  %s7348_s7 = inlined_call_operand.hbm [shape: bf16[128,128], index: 7, kind: input, shape index: {}]   ;;  %s7349_s8 = inlined_call_operand.hbm [shape: f32[1,1792], index: 8, kind: input, shape index: {}]   ;;  %s7350_s9 = inlined_call_operand.hbm [shape: f32[8,128], index: 9, kind: output, shape index: {}]  }
   0x1   :  { %7357 = sst [smem:[#allocation29_spill]] %s7343_s2 }
   0x2   :  { %7358 = sst [smem:[#allocation30_spill]] %s7344_s3 }
   0x3   :  { %7359 = sst [smem:[#allocation31_spill]] %s7350_s9 }
   0x4   :  { %14 = vsyncpa [#allocation5], 0 }
   0x5   :  { %16 = vsyncpa [#allocation5 + $0x1], 0 }
   0x6   :  { %17 = vsyncpa [#allocation8], 0 }
   0x7   :  { %19 = vsyncpa [#allocation8 + $0x1], 0 }
   0x8   :  { %20 = vsyncpa [#allocation11], 0 }
   0x9   :  { %21 = vsyncpa [#allocation14], 0 }
   0xa   :  { %22 = vsyncpa [#allocation17], 0 }
   0xb   :  { %23 = vsyncpa [#allocation6], 0  ;;  %s6499_s30 = smov 0   ;;  %s6501_s10 = smov 0  }
   0xc   :  { %s6503_s11 = smov 0   ;;  %s6505_s12 = smov 0  }
   0xd   :  { %s6507_s13 = smov 0   ;;  %s6509_s14 = smov 0  }
   0xe LB: > { %7360 = sst [smem:[#allocation27_spill]] %s6415_s12  ;;  %s6530_s15 = sadd.s32 4294967295, %s6423_s14   ;;  %s6423_s14 = sphi %s6509_s14, %s29_s14   ;;  %s6419_s13 = sphi %s6507_s13, %s7389_s13   ;;  %s6415_s12 = sphi %s6505_s12, %s7388_s12   ;;  %s6411_s11 = sphi %s6503_s11, %s7387_s11   ;;  %s6407_s10 = sphi %s6501_s10, %s7386_s10   ;;  %s6403_s30 = sphi %s6499_s30, %s7385_s30  }
   0xf   : > { %p4628_p0 = scmp.ge.s32.totalorder %s6423_s14, 1  ;;  %p7353_p1 = scmp.eq.s32.totalorder %s6530_s15, 0 }
  0x10   : > { %p273_p2 = scmp.lt.s32.totalorder %s6423_s14, 3  ;;  %s6425_s17 = smov [#allocation9]  }
  0x11   : > { %s285_s18 = sshll.u32 %s6425_s17, 4  ;;  %s6426_s20 = smov [#allocation10]   ;;  %s6539_s18 = int_to_ptr.vmem [resolvable:$true] %s285_s18 }
  0x12   : > { %p6535_p3 = pnand %p4628_p0, %p273_p2  ;;  %s298_s21 = sshll.u32 %s6426_s20, 4  ;;  %s6549_s21 = int_to_ptr.vmem [resolvable:$true] %s298_s21 }
  0x13   : > { %s6427_s22 = smov [#allocation13]   ;;  %s7364_s2 = sld [smem:[#allocation29_spill]] }
  0x14   : > { %s7361_s16 = scalar_select %p6535_p3, 1, 0 }
  0x15   : > { %p5705_p4 = pneg %p6535_p3  ;;  %s6551_s23 = sshll.u32 %s6427_s22, 4  ;;  %s325_s23 = int_to_ptr.vmem [resolvable:$true] %s6551_s23 }
  0x16   : > { %7362 = sst [smem:[#allocation28_spill]] %s7361_s16 }
  0x17   : > { %p6545_p5 = pnand %p5705_p4, %p7353_p1 }
  0x19   : > { %s6067_s26 = scalar_lea.hbm %s7364_s2, 128  ;;  %p6561_p7 = pneg %p6545_p5 }
  0x1a   : > { %p6068_p6 = scmp.ne.s32.totalorder %s7364_s2, %s6067_s26  ;;  %p6074_p10 = scmp.lt.u32.totalorder %s6067_s26, %s7364_s2 }
  0x1c   : > { %p6070_p8 = pnand %p6561_p7, %p6068_p6 }
  0x1e   : > { %p6071_p9 = pneg %p6070_p8 }
  0x20   : > { %p6076_p11 = pnand %p6074_p10, %p6071_p9 }
  0x22   : > { %6079 = shalt.err (!%p6076_p11)
}
  0x23   : > { %s6080_s22 = scalar_lea.vmem %s6539_s18, 128  ;;  %p6088_p2 = scmp.lt.s32.totalorder %s6539_s18, %s6539_s18 }
  0x24   : > { %p6081_p12 = scmp.ne.s32.totalorder %s6539_s18, %s6080_s22  ;;  %p6089_p4 = scmp.lt.s32.totalorder %s6080_s22, %s6080_s22 }
  0x26   : > { %p6083_p13 = pnand %p6081_p12, %p6561_p7  ;;  %p6090_p6 = por %p6089_p4, %p6088_p2 }
  0x28   : > { %p6084_p0 = pneg %p6083_p13 }
  0x2a   : > { %p6091_p8 = pnand %p6090_p6, %p6084_p0 }
  0x2c   : > { %6094 = shalt.err (!%p6091_p8)
}
  0x2d   : > { %s7355_s24 = smov 64   ;;  %s7356_s25 = smov 4  }
  0x2e   : > { %5708 = dma.hbm_to_vmem [thread:$0]  (!%p6545_p5), %s7364_s2, 128, %s6539_s18, [#allocation8], %s7355_s24, %s7355_s24, %s7356_s25  }
  0x2f   : > { %s7366_s3 = sld [smem:[#allocation30_spill]] }
  0x35   : > { %s6095_s20 = scalar_lea.hbm %s7366_s3, 1024 }
  0x36   : > { %p6096_p9 = scmp.ne.s32.totalorder %s7366_s3, %s6095_s20  ;;  %p6102_p12 = scmp.lt.u32.totalorder %s6095_s20, %s7366_s3 }
  0x38   : > { %p6098_p10 = pnand %p6096_p9, %p6561_p7 }
  0x3a   : > { %p6099_p11 = pneg %p6098_p10 }
  0x3c   : > { %p6104_p13 = pnand %p6102_p12, %p6099_p11 }
  0x3e   : > { %6107 = shalt.err (!%p6104_p13)
}
  0x3f   : > { %s6108_s18 = scalar_lea.vmem %s6549_s21, 1024  ;;  %p6116_p6 = scmp.lt.s32.totalorder %s6549_s21, %s6549_s21 }
  0x40   : > { %p6109_p0 = scmp.ne.s32.totalorder %s6549_s21, %s6108_s18  ;;  %p6117_p8 = scmp.lt.s32.totalorder %s6108_s18, %s6108_s18 }
  0x42   : > { %p6111_p2 = pnand %p6109_p0, %p6561_p7  ;;  %p6118_p9 = por %p6117_p8, %p6116_p6 }
  0x44   : > { %p6112_p4 = pneg %p6111_p2 }
  0x46   : > { %p6119_p10 = pnand %p6118_p9, %p6112_p4 }
  0x48   : > { %6122 = shalt.err (!%p6119_p10)
}
  0x49   : > { %5711 = dma.hbm_to_vmem [thread:$0]  (!%p6545_p5), %s7366_s3, 1024, %s6549_s21, [#allocation11], %s7355_s24, %s7355_s24, %s7356_s25  }
  0x4a   : > { %s6123_s27 = scalar_lea.hbm %s7346_s5, 1024 }
  0x4b   : > { %p6124_p11 = scmp.ne.s32.totalorder %s7346_s5, %s6123_s27  ;;  %p6130_p0 = scmp.lt.u32.totalorder %s6123_s27, %s7346_s5 }
  0x4d   : > { %p6126_p12 = pnand %p6124_p11, %p6561_p7 }
  0x4f   : > { %p6127_p13 = pneg %p6126_p12 }
  0x51   : > { %p6132_p2 = pnand %p6130_p0, %p6127_p13 }
  0x53   : > { %6135 = shalt.err (!%p6132_p2)
}
  0x54   : > { %s6136_s18 = scalar_lea.vmem %s325_s23, 1024  ;;  %p6144_p9 = scmp.lt.s32.totalorder %s325_s23, %s325_s23 }
  0x55   : > { %p6137_p4 = scmp.ne.s32.totalorder %s325_s23, %s6136_s18  ;;  %p6145_p10 = scmp.lt.s32.totalorder %s6136_s18, %s6136_s18 }
  0x57   : > { %p6139_p6 = pnand %p6137_p4, %p6561_p7  ;;  %p6146_p1 = por %p6145_p10, %p6144_p9 }
  0x59   : > { %p6140_p8 = pneg %p6139_p6 }
  0x5b   : > { %p6147_p3 = pnand %p6146_p1, %p6140_p8 }
  0x5d   : > { %6150 = shalt.err (!%p6147_p3)
}
  0x5e   : > { %5717 = dma.hbm_to_vmem [thread:$0]  (!%p6545_p5), %s7346_s5, 1024, %s325_s23, [#allocation14], %s7355_s24, %s7355_s24, %s7356_s25  }
  0x5f   : > { %s6430_s12 = smov [#allocation16]   ;;  %s6431_s26 = smov [#allocation12]  }
  0x60   : > { %s350_s16 = sshll.u32 %s6430_s12, 4  ;;  %s311_s27 = sshll.u32 %s6431_s26, 4  ;;  %s351_s16 = int_to_ptr.vmem [resolvable:$true] %s350_s16  ;;  %s312_s27 = int_to_ptr.vmem [resolvable:$true] %s311_s27 }
  0x61   : > { %s6151_s20 = scalar_lea.hbm %s7348_s7, 1024 }
  0x62   : > { %p6152_p1 = scmp.ne.s32.totalorder %s7348_s7, %s6151_s20  ;;  %p6158_p12 = scmp.lt.u32.totalorder %s6151_s20, %s7348_s7 }
  0x64   : > { %p6154_p3 = pnand %p6152_p1, %p6561_p7 }
  0x66   : > { %p6155_p11 = pneg %p6154_p3 }
  0x68   : > { %p6160_p13 = pnand %p6158_p12, %p6155_p11 }
  0x6a   : > { %6163 = shalt.err (!%p6160_p13)
}
  0x6b   : > { %s6164_s23 = scalar_lea.vmem %s351_s16, 1024  ;;  %p6172_p6 = scmp.lt.s32.totalorder %s351_s16, %s351_s16 }
  0x6c   : > { %p6165_p0 = scmp.ne.s32.totalorder %s351_s16, %s6164_s23  ;;  %p6173_p8 = scmp.lt.s32.totalorder %s6164_s23, %s6164_s23 }
  0x6e   : > { %p6167_p2 = pnand %p6165_p0, %p6561_p7  ;;  %p6174_p9 = por %p6173_p8, %p6172_p6 }
  0x70   : > { %p6168_p4 = pneg %p6167_p2 }
  0x72   : > { %p6175_p10 = pnand %p6174_p9, %p6168_p4 }
  0x74   : > { %6178 = shalt.err (!%p6175_p10)
}
  0x75   : > { %5723 = dma.hbm_to_vmem [thread:$0]  (!%p6545_p5), %s7348_s7, 1024, %s351_s16, [#allocation17], %s7355_s24, %s7355_s24, %s7356_s25  }
  0x76   : > { %s6179_s28 = scalar_lea.hbm %s7345_s4, 9216 }
  0x77   : > { %p6180_p1 = scmp.ne.s32.totalorder %s7345_s4, %s6179_s28  ;;  %p6186_p12 = scmp.lt.u32.totalorder %s6179_s28, %s7345_s4 }
  0x79   : > { %p6182_p3 = pnand %p6180_p1, %p6561_p7 }
  0x7b   : > { %p6183_p11 = pneg %p6182_p3 }
  0x7d   : > { %p6188_p13 = pnand %p6186_p12, %p6183_p11 }
  0x7f   : > { %6191 = shalt.err (!%p6188_p13)
}
  0x80   : > { %s6192_s21 = scalar_lea.vmem %s312_s27, 9216  ;;  %p6200_p6 = scmp.lt.s32.totalorder %s312_s27, %s312_s27 }
  0x81   : > { %p6193_p0 = scmp.ne.s32.totalorder %s312_s27, %s6192_s21  ;;  %p6201_p8 = scmp.lt.s32.totalorder %s6192_s21, %s6192_s21 }
  0x83   : > { %p6195_p2 = pnand %p6193_p0, %p6561_p7  ;;  %p6202_p9 = por %p6201_p8, %p6200_p6 }
  0x85   : > { %p6196_p4 = pneg %p6195_p2 }
  0x87   : > { %p6203_p10 = pnand %p6202_p9, %p6196_p4 }
  0x89   : > { %6206 = shalt.err (!%p6203_p10)
}
  0x8a   : > { %s6432_s16 = smov 576   ;;  %s6433_s23 = smov 36  }
  0x8b   : > { %5714 = dma.hbm_to_vmem [thread:$0]  (!%p6545_p5), %s7345_s4, 9216, %s312_s27, [#allocation11], %s6432_s16, %s6432_s16, %s6433_s23  }
  0x8c   : > { %s6434_s12 = smov [#allocation15]   ;;  %s6435_s28 = smov [#allocation18]  }
  0x8d   : > { %s337_s26 = sshll.u32 %s6434_s12, 4  ;;  %s364_s17 = sshll.u32 %s6435_s28, 4  ;;  %s338_s26 = int_to_ptr.vmem [resolvable:$true] %s337_s26  ;;  %s365_s17 = int_to_ptr.vmem [resolvable:$true] %s364_s17 }
  0x8e   : > { %s6207_s18 = scalar_lea.hbm %s7347_s6, 8192 }
  0x8f   : > { %p6208_p1 = scmp.ne.s32.totalorder %s7347_s6, %s6207_s18  ;;  %p6214_p12 = scmp.lt.u32.totalorder %s6207_s18, %s7347_s6 }
  0x91   : > { %p6210_p3 = pnand %p6208_p1, %p6561_p7 }
  0x93   : > { %p6211_p11 = pneg %p6210_p3 }
  0x95   : > { %p6216_p13 = pnand %p6214_p12, %p6211_p11 }
  0x97   : > { %6219 = shalt.err (!%p6216_p13)
}
  0x98   : > { %s6220_s27 = scalar_lea.vmem %s338_s26, 8192  ;;  %p6228_p6 = scmp.lt.s32.totalorder %s338_s26, %s338_s26 }
  0x99   : > { %p6221_p0 = scmp.ne.s32.totalorder %s338_s26, %s6220_s27  ;;  %p6229_p8 = scmp.lt.s32.totalorder %s6220_s27, %s6220_s27 }
  0x9b   : > { %p6223_p2 = pnand %p6221_p0, %p6561_p7  ;;  %p6230_p9 = por %p6229_p8, %p6228_p6 }
  0x9d   : > { %p6224_p4 = pneg %p6223_p2 }
  0x9f   : > { %p6231_p10 = pnand %p6230_p9, %p6224_p4 }
  0xa1   : > { %6234 = shalt.err (!%p6231_p10)
}
  0xa2   : > { %s7367_s24 = smov 4   ;;  %s7368_s16 = smov 64  }
  0xa3   : > { %5720 = dma.hbm_to_vmem [thread:$0]  (!%p6545_p5), %s7347_s6, 8192, %s338_s26, [#allocation14], %s7368_s16, %s7368_s16, %s7367_s24  }
  0xa4   : > { %s6235_s9 = scalar_lea.hbm %s7349_s8, 224 }
  0xa5   : > { %p6236_p1 = scmp.ne.s32.totalorder %s7349_s8, %s6235_s9  ;;  %p6242_p12 = scmp.lt.u32.totalorder %s6235_s9, %s7349_s8 }
  0xa7   : > { %p6238_p3 = pnand %p6236_p1, %p6561_p7 }
  0xa9   : > { %p6239_p11 = pneg %p6238_p3 }
  0xab   : > { %p6244_p13 = pnand %p6242_p12, %p6239_p11 }
  0xad   : > { %6247 = shalt.err (!%p6244_p13)
}
  0xae   : > { %s6248_s18 = scalar_lea.vmem %s365_s17, 224  ;;  %p6256_p6 = scmp.lt.s32.totalorder %s365_s17, %s365_s17 }
  0xaf   : > { %p6249_p0 = scmp.ne.s32.totalorder %s365_s17, %s6248_s18  ;;  %p6257_p8 = scmp.lt.s32.totalorder %s6248_s18, %s6248_s18 }
  0xb1   : > { %p6251_p2 = pnand %p6249_p0, %p6561_p7  ;;  %p6258_p9 = por %p6257_p8, %p6256_p6 }
  0xb3   : > { %p6252_p4 = pneg %p6251_p2 }
  0xb5   : > { %p6259_p10 = pnand %p6258_p9, %p6252_p4 }
  0xb7   : > { %6262 = shalt.err (!%p6259_p10)
}
  0xb8   : > { %5726 = dma.hbm_to_vmem [thread:$0]  (!%p6545_p5), %s7349_s8, 224, %s365_s17, [#allocation17]  }
  0xb9   : > { %s38_s29 = sadd.s32 1, %s6419_s13  ;;  %s50_s19 = sadd.s32 1, %s6411_s11 }
  0xba   : > { %p39_p7 = scmp.ge.s32.totalorder %s38_s29, 2  ;;  %p57_p1 = scmp.ne.s32.totalorder %s6411_s11, %s6407_s10 }
  0xbb   : > { %p58_p3 = scmp.eq.s32.totalorder %s6423_s14, 0  ;;  %p63_p12 = scmp.ne.s32.totalorder %s6407_s10, %s6403_s30 }
  0xbc   : > { %s7391_s29 = smov (%p39_p7, %s38_s29), 0  ;;  %p5741_p13 = scmp.lt.s32.totalorder %s6423_s14, 2 }
  0xbd   : > { %p59_p11 = por %p58_p3, %p57_p1  ;;  %s46_s27 = ssub.s32 %s6419_s13, %s7391_s29 }
  0xbe   : > { %p48_p0 = scmp.eq.s32.totalorder %s46_s27, 0  ;;  %p7369_p2 = scmp.eq.s32.totalorder %s6530_s15, 0 }
  0xbf   : > { %s6730_s16 = sand.u32 1, %s6411_s11   ;;  %s4873_s17 = smul.u32 3136, %s6419_s13 }
  0xc0   : > { %p6725_p4 = por %p7369_p2, %p63_p12  ;;  %s5665_s25 = smul.u32 196, %s6730_s16 }
  0xc1   : > { %s6734_s3 = scalar_select %p48_p0, %s6411_s11, %s50_s19  }
  0xc2   : > { %s6740_s30 = scalar_lea.hbm %s7341_s0, %s4873_s17  ;;  %p6742_p5 = pnand %p5741_p13, %p59_p11 }
  0xc3   : > { %s5666_s12 = smul.u32 1568, %s6730_s16  ;;  %s379_s28 = scalar_lea.vmem [#allocation4], %s5665_s25 }
  0xc4   : > { %s389_s20 = sshll.u32 %s379_s28, 4  ;;  %s376_s22 = scalar_lea.sflag [#allocation5], %s6730_s16  ;;  %s6747_s20 = int_to_ptr.vmem [resolvable:$true] %s389_s20 }
  0xc5   : > { %s6263_s18 = scalar_lea.hbm %s6740_s30, 3136  ;;  %p6265_p8 = pneg %p6742_p5 }
  0xc6   : > { %p6264_p6 = scmp.ne.s32.totalorder %s6740_s30, %s6263_s18  ;;  %s6268_s19 = scalar_lea.hbm %s7341_s0, 6272 }
  0xc7   : > { %p6269_p7 = scmp.lt.u32.totalorder %s6740_s30, %s7341_s0  ;;  %p6270_p1 = scmp.lt.u32.totalorder %s6268_s19, %s6263_s18 }
  0xc8   : > { %p6266_p9 = pnand %p6265_p8, %p6264_p6  ;;  %p6272_p11 = scmp.lt.u32.totalorder %s6263_s18, %s6740_s30 }
  0xc9   : > { %p6271_p3 = por %p6270_p1, %p6269_p7 }
  0xca   : > { %p6267_p10 = pneg %p6266_p9 }
  0xcb   : > { %p6273_p12 = por %p6272_p11, %p6271_p3 }
  0xcd   : > { %p6274_p13 = pnand %p6273_p12, %p6267_p10 }
  0xcf   : > { %6277 = shalt.err (!%p6274_p13)
}
  0xd0   : > { %s6278_s25 = scalar_lea.vmem %s6747_s20, 3136  ;;  %s6436_s23 = smov [#allocation4]  }
  0xd1   : > { %p6279_p0 = scmp.ne.s32.totalorder %s6747_s20, %s6278_s25  ;;  %s6283_s2 = sshll.u32 %s6436_s23, 4  ;;  %s6284_s2 = int_to_ptr.vmem [resolvable:$false] %s6283_s2 }
  0xd2   : > { %s6285_s28 = scalar_lea.vmem %s6284_s2, 6272  ;;  %p6286_p9 = scmp.lt.s32.totalorder %s6747_s20, %s6284_s2 }
  0xd3   : > { %p6281_p2 = pnand %p6279_p0, %p6265_p8  ;;  %p6287_p7 = scmp.lt.s32.totalorder %s6285_s28, %s6278_s25 }
  0xd5   : > { %p6282_p6 = pneg %p6281_p2  ;;  %p6288_p1 = por %p6287_p7, %p6286_p9 }
  0xd7   : > { %p6289_p3 = pnand %p6288_p1, %p6282_p6 }
  0xd9   : > { %6292 = shalt.err (!%p6289_p3)
}
  0xda   : > { %5730 = dma.hbm_to_vmem [thread:$0]  (!%p6742_p5), %s6740_s30, 3136, %s6747_s20, %s376_s22  }
  0xdb   : > { %s4874_s18 = smul.u32 25088, %s6419_s13  ;;  %s400_s26 = scalar_lea.vmem [#allocation7], %s5666_s12 }
  0xdc   : > { %s407_s21 = sshll.u32 %s400_s26, 4  ;;  %s396_s19 = sand.u32 1, %s6423_s14   ;;  %s6778_s21 = int_to_ptr.vmem [resolvable:$true] %s407_s21 }
  0xdd   : > { %s6784_s25 = scalar_lea.hbm %s7342_s1, %s4874_s18  ;;  %s6786_s23 = scalar_lea.sflag [#allocation8], %s396_s19 }
  0xde   : > { %s6293_s2 = scalar_lea.hbm %s6784_s25, 25088  ;;  %s6298_s12 = scalar_lea.hbm %s7342_s1, 50176 }
  0xdf   : > { %p6294_p10 = scmp.ne.s32.totalorder %s6784_s25, %s6293_s2  ;;  %p6299_p13 = scmp.lt.u32.totalorder %s6784_s25, %s7342_s1 }
  0xe0   : > { %p6300_p0 = scmp.lt.u32.totalorder %s6298_s12, %s6293_s2  ;;  %p6302_p6 = scmp.lt.u32.totalorder %s6293_s2, %s6784_s25 }
  0xe1   : > { %p6296_p11 = pnand %p6294_p10, %p6265_p8 }
  0xe2   : > { %p6301_p2 = por %p6300_p0, %p6299_p13 }
  0xe3   : > { %p6297_p12 = pneg %p6296_p11 }
  0xe4   : > { %p6303_p9 = por %p6302_p6, %p6301_p2 }
  0xe6   : > { %p6304_p7 = pnand %p6303_p9, %p6297_p12 }
  0xe8   : > { %6307 = shalt.err (!%p6304_p7)
}
  0xe9   : > { %s6308_s28 = scalar_lea.vmem %s6778_s21, 25088  ;;  %s6437_s18 = smov [#allocation7]  }
  0xea   : > { %p6309_p1 = scmp.ne.s32.totalorder %s6778_s21, %s6308_s28  ;;  %s6313_s26 = sshll.u32 %s6437_s18, 4  ;;  %s6314_s26 = int_to_ptr.vmem [resolvable:$false] %s6313_s26 }
  0xeb   : > { %s6315_s19 = scalar_lea.vmem %s6314_s26, 50176  ;;  %p6316_p11 = scmp.lt.s32.totalorder %s6778_s21, %s6314_s26 }
  0xec   : > { %p6311_p3 = pnand %p6309_p1, %p6265_p8  ;;  %p6317_p13 = scmp.lt.s32.totalorder %s6315_s19, %s6308_s28 }
  0xee   : > { %p6312_p10 = pneg %p6311_p3  ;;  %p6318_p0 = por %p6317_p13, %p6316_p11 }
  0xf0   : > { %p6319_p2 = pnand %p6318_p0, %p6312_p10 }
  0xf2   : > { %6322 = shalt.err (!%p6319_p2)
}
  0xf3   : > { %s6438_s27 = smov 128   ;;  %s6439_s17 = smov 8  }
  0xf4   : > { %5733 = dma.hbm_to_vmem [thread:$0]  (!%p6742_p5), %s6784_s25, 25088, %s6778_s21, %s6786_s23, %s6438_s27, %s6438_s27, %s6439_s17  }
  0xf5   : > { %s7372_s2 = sld [smem:[#allocation28_spill]] }
  0xfb   : > { %p7373_p8 = scmp.ne.s32.totalorder %s7372_s2, 0 }
  0xfc   : > { %s421_s16 = sand.u32 (!%p7373_p8), 1, %s6407_s10  }
  0xfd   : > { %419 = sbr.rel (%p7373_p8) target bundleno = 2588 (0xa1c), region = 56  ;;  %s422_s12 = scalar_lea.sflag (!%p7373_p8), [#allocation5], %s421_s16 }
  0xfe   : > { %s5667_s30 = smul.u32 (!%p7373_p8), 196, %s421_s16 }
 0x100   : > { %s6815_s20 = scalar_lea.vmem (!%p7373_p8), [#allocation4], %s5667_s30 }
 0x104   : > { %6374 = dma.done.wait (%p6725_p4), %s422_s12, 3136  }
 0x105   : > { %6376 = vsyncadd (%p6725_p4), %s422_s12, 4294964160  ;;  %s430_s22 = sand.u32 1, %s6530_s15   ;;  %s5668_s9 = smul.u32 1568, %s421_s16 }
 0x106   : > { %s431_s21 = scalar_lea.sflag [#allocation8], %s430_s22 }
 0x107   : > { %s6822_s25 = scalar_lea.vmem [#allocation7], %s5668_s9 }
 0x108   : > { %6378 = dma.done.wait (%p6725_p4), %s431_s21, 25088  }
 0x109   : > { %6380 = vsyncadd (%p6725_p4), %s431_s21, 4294942208  ;;  %p7374_p5 = scmp.eq.s32.totalorder %s6530_s15, 0 }
 0x10b   : > { %6382 = dma.done.wait (%p7374_p5), [#allocation8], 128   ;;  %p7375_p12 = pmov %p7374_p5 }
 0x10c   : > { %p7376_p6 = pmov %p7374_p5 }
 0x10d   : > { %6384 = vsyncadd (%p7375_p12), [#allocation8], 4294967168 }
 0x10e   : > { %6386 = dma.done.wait (%p7376_p6), [#allocation11], 10240   ;;  %p7377_p9 = pmov %p7374_p5 }
 0x10f   : > { %p7378_p7 = pmov %p7374_p5 }
 0x110   : > { %6388 = vsyncadd (%p7377_p9), [#allocation11], 4294957056 }
 0x111   : > { %6390 = dma.done.wait (%p7378_p7), [#allocation14], 9216   ;;  %p7379_p1 = pmov %p7374_p5 }
 0x113   : > { %6392 = vsyncadd (%p7379_p1), [#allocation14], 4294958080  ;;  %p7380_p4 = pmov %p7379_p1 }
 0x114   : > { %p7381_p3 = pmov %p7379_p1 }
 0x115   : > { %6394 = dma.done.wait (%p7380_p4), [#allocation17], 1248  }
 0x116   : > { %6396 = vsyncadd (%p7381_p3), [#allocation17], 4294966048  ;;  %s7382_s24 = sld [smem:[#allocation27_spill]] }
 0x11c   : > { %p4647_p10 = scmp.ne.s32.totalorder %s7382_s24, 0 }
 0x11d   : > { %v5821_v0 = vld [vmem:[#allocation12 + $0x4] ss:$36 sps:$4 sm:$0xff] (!%p4647_p10)   ;;  %v6440_v2 = vmov (!%p4647_p10), 0   ;;  %v6441_v3 = vmov (!%p4647_p10), 0.0   ;;  %v5824_v4 = vld [vmem:[#allocation12 + $0x4c] ss:$36 sps:$4 sm:$0xff] (!%p4647_p10)  }
 0x11e   : > { %503 = sbr.rel (%p4647_p10) target bundleno = 600 (0x258), region = 96  ;;  %v5823_v1 = vld [vmem:[#allocation12] ss:$36 sps:$4 sm:$0xff] (!%p4647_p10)   ;;  %1042 = vmatprep.mubr.bf16.mxu0 (!%p4647_p10), %v6440_v2  ;;  %1085 = vmatprep.mubr.bf16.mxu1 (!%p4647_p10), %v6440_v2  ;;  %504 = vst [vmem:[#allocation2] sm:$0xff] (!%p4647_p10), %v6441_v3  ;;  %v5826_v5 = vld [vmem:[#allocation12 + $0x48] ss:$36 sps:$4 sm:$0xff] (!%p4647_p10)  }
 0x11f   : > { %1010 = vmatprep.subr.bf16.mxu0 (!%p4647_p10), %v5821_v0  ;;  %v5827_v6 = vld [vmem:[#allocation12 + $0x94] ss:$36 sps:$4 sm:$0xff] (!%p4647_p10)   ;;  %v5830_v8 = vld [vmem:[#allocation12 + $0xdc] ss:$36 sps:$4 sm:$0xff] (!%p4647_p10)   ;;  %v5844_v10 = vld [vmem:[#allocation12 + $0xc] ss:$36 sps:$4 sm:$0xff] (!%p4647_p10)  }
 0x120   : > { %1011 = vmatpush1.bf16.msra.mxu0 (!%p4647_p10), %v5823_v1  ;;  %v5829_v7 = vld [vmem:[#allocation12 + $0x90] ss:$36 sps:$4 sm:$0xff] (!%p4647_p10)   ;;  %v5832_v9 = vld [vmem:[#allocation12 + $0xd8] ss:$36 sps:$4 sm:$0xff] (!%p4647_p10)   ;;  %v5847_v11 = vld [vmem:[#allocation12 + $0x8] ss:$36 sps:$4 sm:$0xff] (!%p4647_p10)   ;;  %1053 = vmatprep.subr.bf16.mxu1 (!%p4647_p10), %v5844_v10 }
 0x121   : > { %1012 = vmatprep.subr.bf16.mxu0 (!%p4647_p10), %v5824_v4  ;;  %v5833_v12 = vld [vmem:[#allocation12 + $0x124] ss:$36 sps:$4 sm:$0xff] (!%p4647_p10)   ;;  %v5849_v13 = vld [vmem:[#allocation12 + $0x54] ss:$36 sps:$4 sm:$0xff] (!%p4647_p10)   ;;  %1054 = vmatpush1.bf16.msra.mxu1 (!%p4647_p10), %v5847_v11  ;;  %v5836_v15 = vld [vmem:[#allocation12 + $0x16c] ss:$36 sps:$4 sm:$0xff] (!%p4647_p10)  }
 0x122   : > { %v5835_v14 = vld [vmem:[#allocation12 + $0x120] ss:$36 sps:$4 sm:$0xff] (!%p4647_p10)   ;;  %1055 = vmatprep.subr.bf16.mxu1 (!%p4647_p10), %v5849_v13  ;;  %v5854_v16 = vld [vmem:[#allocation12 + $0x50] ss:$36 sps:$4 sm:$0xff] (!%p4647_p10)   ;;  %v5838_v18 = vld [vmem:[#allocation12 + $0x168] ss:$36 sps:$4 sm:$0xff] (!%p4647_p10)  }
 0x123   : > { %v5855_v17 = vld [vmem:[#allocation12 + $0x9c] ss:$36 sps:$4 sm:$0xff] (!%p4647_p10)   ;;  %v5861_v20 = vld [vmem:[#allocation12 + $0xe4] ss:$36 sps:$4 sm:$0xff] (!%p4647_p10)   ;;  %v5839_v21 = vld [vmem:[#allocation12 + $0x1b4] ss:$36 sps:$4 sm:$0xff] (!%p4647_p10)  }
 0x124   : > { %1013 = vmatpush1.bf16.msra.mxu0 (!%p4647_p10), %v5826_v5  ;;  %v5860_v19 = vld [vmem:[#allocation12 + $0x98] ss:$36 sps:$4 sm:$0xff] (!%p4647_p10)   ;;  %v5866_v22 = vld [vmem:[#allocation12 + $0xe0] ss:$36 sps:$4 sm:$0xff] (!%p4647_p10)   ;;  %v5841_v23 = vld [vmem:[#allocation12 + $0x1b0] ss:$36 sps:$4 sm:$0xff] (!%p4647_p10)  }
 0x125   : > { %1014 = vmatprep.subr.bf16.mxu0 %v5827_v6  ;;  %1056 = vmatpush1.bf16.msra.mxu1 %v5854_v16  ;;  %v5867_v24 = vld [vmem:[#allocation12 + $0x12c] ss:$36 sps:$4 sm:$0xff]   ;;  %v5842_v25 = vld [vmem:[#allocation12 + $0x1fc] ss:$36 sps:$4 sm:$0xff]   ;;  %v5873_v28 = vld [vmem:[#allocation12 + $0x174] ss:$36 sps:$4 sm:$0xff]  }
 0x126   : > { %1057 = vmatprep.subr.bf16.mxu1 %v5855_v17  ;;  %v5846_v26 = vld [vmem:[#allocation12 + $0x1f8] ss:$36 sps:$4 sm:$0xff]   ;;  %v5872_v27 = vld [vmem:[#allocation12 + $0x128] ss:$36 sps:$4 sm:$0xff]   ;;  %v5878_v31 = vld [vmem:[#allocation12 + $0x170] ss:$36 sps:$4 sm:$0xff]  }
 0x127   : > { %v5853_v29 = vld [vmem:[#allocation12 + $0x14] ss:$36 sps:$4 sm:$0xff]   ;;  %v5879_v33 = vld [vmem:[#allocation12 + $0x1bc] ss:$36 sps:$4 sm:$0xff]   ;;  %v5885_v37 = vld [vmem:[#allocation12 + $0x204] ss:$36 sps:$4 sm:$0xff]  }
 0x128   : > { %1015 = vmatpush1.bf16.msra.mxu0 %v5829_v7  ;;  %v6848_v30 = vld [vmem:[#allocation9] sm:$0xff]   ;;  %v5851_v32 = vld [vmem:[#allocation12 + $0x10] ss:$36 sps:$4 sm:$0xff]   ;;  %v5865_v38 = vld [vmem:[#allocation12 + $0xa4] ss:$36 sps:$4 sm:$0xff]   ;;  %vm6442_vm0 = vmmov 0  }
 0x129   : > { %1016 = vmatprep.subr.bf16.mxu0 %v5830_v8  ;;  %1058 = vmatpush1.bf16.msra.mxu1 %v5860_v19  ;;  %v5859_v34 = vld [vmem:[#allocation12 + $0x5c] ss:$36 sps:$4 sm:$0xff]   ;;  %v5871_v42 = vld [vmem:[#allocation12 + $0xec] ss:$36 sps:$4 sm:$0xff]   ;;  %v5899_v45 = vld [vmem:[#allocation12 + $0x64] ss:$36 sps:$4 sm:$0xff]  }
 0x12a   : > { %1059 = vmatprep.subr.bf16.mxu1 %v5861_v20  ;;  %v5884_v35 = vld [vmem:[#allocation12 + $0x1b8] ss:$36 sps:$4 sm:$0xff]   ;;  %v5863_v39 = vld [vmem:[#allocation12 + $0xa0] ss:$36 sps:$4 sm:$0xff]   ;;  %v5869_v43 = vld [vmem:[#allocation12 + $0xe8] ss:$36 sps:$4 sm:$0xff]  }
 0x12b   : > { %v5857_v36 = vld [vmem:[#allocation12 + $0x58] ss:$36 sps:$4 sm:$0xff]   ;;  %v5890_v40 = vld [vmem:[#allocation12 + $0x200] ss:$36 sps:$4 sm:$0xff]   ;;  %v5875_v47 = vld [vmem:[#allocation12 + $0x130] ss:$36 sps:$4 sm:$0xff]  }
 0x12c   : > { %1017 = vmatpush1.bf16.msra.mxu0 %v5832_v9  ;;  %v5896_v41 = vld [vmem:[#allocation12 + $0x1c] ss:$36 sps:$4 sm:$0xff]   ;;  %v5877_v46 = vld [vmem:[#allocation12 + $0x134] ss:$36 sps:$4 sm:$0xff]   ;;  %v5903_v49 = vld [vmem:[#allocation12 + $0xac] ss:$36 sps:$4 sm:$0xff]  }
 0x12d   : > { %1018 = vmatprep.subr.bf16.mxu0 %v5833_v12  ;;  %1060 = vmatpush1.bf16.msra.mxu1 %v5866_v22  ;;  %v5894_v44 = vld [vmem:[#allocation12 + $0x18] ss:$36 sps:$4 sm:$0xff]   ;;  %v5897_v48 = vld [vmem:[#allocation12 + $0x60] ss:$36 sps:$4 sm:$0xff]   ;;  %v5901_v51 = vld [vmem:[#allocation12 + $0xa8] ss:$36 sps:$4 sm:$0xff]   ;;  %v591_v12 = vlaneseq }
 0x12e   : > { %1061 = vmatprep.subr.bf16.mxu1 %v5867_v24  ;;  %v5883_v50 = vld [vmem:[#allocation12 + $0x17c] ss:$36 sps:$4 sm:$0xff]   ;;  %v5907_v53 = vld [vmem:[#allocation12 + $0xf4] ss:$36 sps:$4 sm:$0xff]   ;;  %v5889_v54 = vld [vmem:[#allocation12 + $0x1c4] ss:$36 sps:$4 sm:$0xff]  }
 0x12f   : > { %v5881_v52 = vld [vmem:[#allocation12 + $0x178] ss:$36 sps:$4 sm:$0xff]   ;;  %v5905_v55 = vld [vmem:[#allocation12 + $0xf0] ss:$36 sps:$4 sm:$0xff]   ;;  %v5887_v56 = vld [vmem:[#allocation12 + $0x1c0] ss:$36 sps:$4 sm:$0xff]  }
 0x130   : > { %1019 = vmatpush1.bf16.msra.mxu0 %v5835_v14  ;;  %v5911_v57 = vld [vmem:[#allocation12 + $0x13c] ss:$36 sps:$4 sm:$0xff]   ;;  %v5893_v58 = vld [vmem:[#allocation12 + $0x20c] ss:$36 sps:$4 sm:$0xff]   ;;  %v5915_v61 = vld [vmem:[#allocation12 + $0x184] ss:$36 sps:$4 sm:$0xff]  }
 0x131   : > { %1020 = vmatprep.subr.bf16.mxu0 %v5836_v15  ;;  %1062 = vmatpush1.bf16.msra.mxu1 %v5872_v27  ;;  %v5909_v59 = vld [vmem:[#allocation12 + $0x138] ss:$36 sps:$4 sm:$0xff]   ;;  %v5891_v60 = vld [vmem:[#allocation12 + $0x208] ss:$36 sps:$4 sm:$0xff]   ;;  %v5913_v62 = vld [vmem:[#allocation12 + $0x180] ss:$36 sps:$4 sm:$0xff]  }
 0x132   : > { %1063 = vmatprep.subr.bf16.mxu1 %v5873_v28  ;;  %v5900_v63 = vld [vmem:[#allocation12 + $0x20] ss:$36 sps:$4 sm:$0xff]   ;;  %v5919_v0 = vld [vmem:[#allocation12 + $0x1cc] ss:$36 sps:$4 sm:$0xff]   ;;  %v5923_v4 = vld [vmem:[#allocation12 + $0x214] ss:$36 sps:$4 sm:$0xff]  }
 0x133   : > { %v5917_v1 = vld [vmem:[#allocation12 + $0x1c8] ss:$36 sps:$4 sm:$0xff]   ;;  %v5921_v5 = vld [vmem:[#allocation12 + $0x210] ss:$36 sps:$4 sm:$0xff]   ;;  %v5912_v7 = vld [vmem:[#allocation12 + $0xf8] ss:$36 sps:$4 sm:$0xff]  }
 0x134   : > { %1021 = vmatpush1.bf16.msra.mxu0 %v5838_v18  ;;  %v5908_v6 = vld [vmem:[#allocation12 + $0xb0] ss:$36 sps:$4 sm:$0xff]   ;;  %v5916_v8 = vld [vmem:[#allocation12 + $0x140] ss:$36 sps:$4 sm:$0xff]   ;;  %v5920_v9 = vld [vmem:[#allocation12 + $0x188] ss:$36 sps:$4 sm:$0xff]  }
 0x135   : > { %1022 = vmatprep.subr.bf16.mxu0 %v5839_v21  ;;  %1064 = vmatpush1.bf16.msra.mxu1 %v5878_v31  ;;  %v5924_v10 = vld [vmem:[#allocation12 + $0x1d0] ss:$36 sps:$4 sm:$0xff]   ;;  %v5925_v11 = vld [vmem:[#allocation12 + $0x218] ss:$36 sps:$4 sm:$0xff]   ;;  %v592_v13 = vshrl.u32 %v591_v12, 7  ;;  %v587_v15 = vld [vmem:[#allocation18 + $0x5] sm:$0xff] }
 0x136   : > { %1065 = vmatprep.subr.bf16.mxu1 %v5879_v33 }
 0x137   : > { %v593_v14 = vsub.s32 0, %v592_v13  ;;  %v597_v16 = vsub.s32 1, %v592_v13  ;;  %v605_v27 = vsub.s32 3, %v592_v13 }
 0x138   : > { %1023 = vmatpush1.bf16.msra.mxu0 %v5841_v23 }
 0x139   : > { %1024 = vmatprep.subr.bf16.mxu0 %v5842_v25  ;;  %1066 = vmatpush1.bf16.msra.mxu1 %v5884_v35  ;;  %v594_v17 = vrot.slane %v587_v15, %v593_v14  ;;  %v598_v18 = vrot.slane %v587_v15, %v597_v16 }
 0x13a   : > { %1067 = vmatprep.subr.bf16.mxu1 %v5885_v37 }
 0x13c   : > { %1025 = vmatpush1.bf16.msra.mxu0 %v5846_v26  ;;  %v601_v26 = vsub.s32 2, %v592_v13 }
 0x13d   : > { %1096 = vmatprep.subr.bf16.mxu0 %v5853_v29  ;;  %1068 = vmatpush1.bf16.msra.mxu1 %v5890_v40  ;;  %v606_v29 = vrot.slane %v587_v15, %v605_v27 }
 0x13e   : > { %1139 = vmatprep.subr.bf16.mxu1 %v5896_v41  ;;  %v602_v28 = vrot.slane %v587_v15, %v601_v26 }
 0x13f   : > { %1043 = vmatmul.mubr.bf16.vlgmr.msra.gmra.mrb[0].mxu0 %v6848_v30 }
 0x140   : > { %1097 = vmatpush1.bf16.msra.mxu0 %v5851_v32  ;;  %1128 = vmatprep.mubr.bf16.mxu0 %v6440_v2 }
 0x141   : > { %1098 = vmatprep.subr.bf16.mxu0 %v5859_v34  ;;  %1086 = vmatmul.mubr.bf16.vlgmr.msra.gmra.mrb[0].mxu1 %v6848_v30 }
 0x142   : > { %1140 = vmatpush1.bf16.msra.mxu1 %v5894_v44  ;;  %1171 = vmatprep.mubr.bf16.mxu1 %v6440_v2  ;;  %v5904_v2 = vld [vmem:[#allocation12 + $0x68] ss:$36 sps:$4 sm:$0xff]  }
 0x143   : > { %1141 = vmatprep.subr.bf16.mxu1 %v5899_v45 }
 0x144   : > { %1099 = vmatpush1.bf16.msra.mxu0 %v5857_v36 }
 0x145   : > { %1100 = vmatprep.subr.bf16.mxu0 %v5865_v38  ;;  %v609_v38 = vsub.s32 4, %v592_v13 }
 0x146   : > { %1142 = vmatpush1.bf16.msra.mxu1 %v5897_v48 }
 0x147   : > { %1143 = vmatprep.subr.bf16.mxu1 %v5903_v49  ;;  %v610_v40 = vrot.slane %v587_v15, %v609_v38 }
 0x148   : > { %1101 = vmatpush1.bf16.msra.mxu0 %v5863_v39  ;;  %v613_v39 = vsub.s32 5, %v592_v13 }
 0x149   : > { %1102 = vmatprep.subr.bf16.mxu0 %v5871_v42 }
 0x14a   : > { %1144 = vmatpush1.bf16.msra.mxu1 %v5901_v51  ;;  %v614_v41 = vrot.slane %v587_v15, %v613_v39  ;;  %v621_v51 = vsub.s32 7, %v592_v13 }
 0x14b   : > { %1145 = vmatprep.subr.bf16.mxu1 %v5907_v53 }
 0x14c   : > { %1103 = vmatpush1.bf16.msra.mxu0 %v5869_v43  ;;  %v622_v53 = vrot.slane %v587_v15, %v621_v51 }
 0x14d   : > { %1104 = vmatprep.subr.bf16.mxu0 %v5877_v46 }
 0x14e   : > { %1146 = vmatpush1.bf16.msra.mxu1 %v5905_v55 }
 0x14f   : > { %1147 = vmatprep.subr.bf16.mxu1 %v5911_v57 }
 0x150   : > { %1105 = vmatpush1.bf16.msra.mxu0 %v5875_v47 }
 0x151   : > { %1106 = vmatprep.subr.bf16.mxu0 %v5883_v50  ;;  %v617_v50 = vsub.s32 6, %v592_v13 }
 0x152   : > { %1148 = vmatpush1.bf16.msra.mxu1 %v5909_v59 }
 0x153   : > { %1149 = vmatprep.subr.bf16.mxu1 %v5915_v61 }
 0x154   : > { %1107 = vmatpush1.bf16.msra.mxu0 %v5881_v52  ;;  %v618_v52 = vrot.slane %v587_v15, %v617_v50 }
 0x155   : > { %1108 = vmatprep.subr.bf16.mxu0 %v5889_v54 }
 0x156   : > { %1150 = vmatpush1.bf16.msra.mxu1 %v5913_v62  ;;  %v4648_v62 = vld [vmem:[#allocation18 + $0xd] ss:$0 sm:$0xff] }
 0x157   : > { %1151 = vmatprep.subr.bf16.mxu1 %v5919_v0 }
 0x158   : > { %1109 = vmatpush1.bf16.msra.mxu0 %v5887_v56 }
 0x159   : > { %1110 = vmatprep.subr.bf16.mxu0 %v5893_v58 }
 0x15a   : > { %1152 = vmatpush1.bf16.msra.mxu1 %v5917_v1 }
 0x15b   : > { %1153 = vmatprep.subr.bf16.mxu1 %v5923_v4 }
 0x15c   : > { %1111 = vmatpush1.bf16.msra.mxu0 %v5891_v60 }
 0x15d   : > { %5539 = vmatprep.subr.bf16.mxu0 %v6441_v3 }
 0x15e   : > { %1154 = vmatpush1.bf16.msra.mxu1 %v5921_v5 }
 0x15f   : > { %1129 = vmatmul.mubr.bf16.vlgmr.msra.gmra.mrb[4].mxu0 %v6848_v30 }
 0x160   : > { %5540 = vmatpush3.bf16.msra.mxu0 %v5900_v63  ;;  %5555 = vmatprep.mubr.msk.bf16.mxu0 %vm6442_vm0, %v6441_v3 }
 0x161   : > { %5541 = vmatprep.subr.bf16.mxu0 %v6441_v3  ;;  %1172 = vmatmul.mubr.bf16.vlgmr.msra.gmra.mrb[4].mxu1 %v6848_v30 }
 0x164   : > { %5542 = vmatpush3.bf16.msra.mxu0 %v5904_v2 }
 0x165   : > { %5543 = vmatprep.subr.bf16.mxu0 %v6441_v3 }
 0x168   : > { %5544 = vmatpush3.bf16.msra.mxu0 %v5908_v6 }
 0x169   : > { %5545 = vmatprep.subr.bf16.mxu0 %v6441_v3 }
 0x16c   : > { %5546 = vmatpush3.bf16.msra.mxu0 %v5912_v7 }
 0x16d   : > { %5547 = vmatprep.subr.bf16.mxu0 %v6441_v3 }
 0x170   : > { %5548 = vmatpush3.bf16.msra.mxu0 %v5916_v8 }
 0x171   : > { %5549 = vmatprep.subr.bf16.mxu0 %v6441_v3 }
 0x174   : > { %5550 = vmatpush3.bf16.msra.mxu0 %v5920_v9 }
 0x175   : > { %5551 = vmatprep.subr.bf16.mxu0 %v6441_v3 }
 0x178   : > { %5552 = vmatpush3.bf16.msra.mxu0 %v5924_v10 }
 0x179   : > { %5553 = vmatprep.subr.bf16.mxu0 %v6441_v3 }
 0x17c   : > { %5554 = vmatpush3.bf16.msra.mxu0 %v5925_v11 }
 0x17f   : > { %5556 = vmatmul.mubr.bf16.vlgmr.msra.gmra.mrb[8].mxu0 %v6848_v30 }
 0x212   : > { %v1044_v19 = vpop.f32.mrb[0].mxu0 }
 0x213   : > { %v1045_v20 = vadd.f32 %v1044_v19, %v594_v17  ;;  %v1046_v21 = vpop.f32.mrb[1].mxu0 }
 0x214   : > { %v1047_v22 = vadd.f32 %v1046_v21, %v598_v18  ;;  %v1048_v23 = vpop.f32.mrb[2].mxu0  ;;  %v1087_v30 = vpop.f32.mrb[0].mxu1 }
 0x215   : > { %1223 = vst [vmem:[#allocation3] sm:$0xff] %v1045_v20  ;;  %v1049_v24 = vadd.f32 %v1048_v23, %v594_v17  ;;  %v1050_v25 = vpop.f32.mrb[3].mxu0  ;;  %v1088_v31 = vadd.f32 %v1087_v30, %v602_v28  ;;  %v1089_v32 = vpop.f32.mrb[1].mxu1 }
 0x216   : > { %1224 = vst [vmem:[#allocation3 + $0x8] sm:$0xff] %v1047_v22  ;;  %v1051_v3 = vadd.f32 %v1050_v25, %v598_v18  ;;  %v1090_v33 = vadd.f32 %v1089_v32, %v606_v29  ;;  %v1091_v34 = vpop.f32.mrb[2].mxu1 }
 0x217   : > { %1232 = vst [vmem:[#allocation3 + $0x48] sm:$0xff] %v1049_v24  ;;  %1225 = vst [vmem:[#allocation3 + $0x10] sm:$0xff] %v1088_v31  ;;  %v1092_v35 = vadd.f32 %v1091_v34, %v602_v28  ;;  %v1093_v36 = vpop.f32.mrb[3].mxu1 }
 0x218   : > { %1233 = vst [vmem:[#allocation3 + $0x50] sm:$0xff] %v1051_v3  ;;  %1226 = vst [vmem:[#allocation3 + $0x18] sm:$0xff] %v1090_v33  ;;  %v1094_v37 = vadd.f32 %v1093_v36, %v606_v29 }
 0x219   : > { %1234 = vst [vmem:[#allocation3 + $0x58] sm:$0xff] %v1092_v35 }
 0x21a   : > { %1235 = vst [vmem:[#allocation3 + $0x60] sm:$0xff] %v1094_v37 }
 0x232   : > { %v1130_v42 = vpop.f32.mrb[4].mxu0 }
 0x233   : > { %v1131_v43 = vadd.f32 %v1130_v42, %v610_v40  ;;  %v1132_v44 = vpop.f32.mrb[5].mxu0 }
 0x234   : > { %v1133_v45 = vadd.f32 %v1132_v44, %v614_v41  ;;  %v1134_v46 = vpop.f32.mrb[6].mxu0  ;;  %v1173_v54 = vpop.f32.mrb[4].mxu1 }
 0x235   : > { %1227 = vst [vmem:[#allocation3 + $0x20] sm:$0xff] %v1131_v43  ;;  %v1135_v47 = vadd.f32 %v1134_v46, %v610_v40  ;;  %v1136_v48 = vpop.f32.mrb[7].mxu0  ;;  %v1174_v55 = vadd.f32 %v1173_v54, %v618_v52  ;;  %v1175_v56 = vpop.f32.mrb[5].mxu1 }
 0x236   : > { %1228 = vst [vmem:[#allocation3 + $0x28] sm:$0xff] %v1133_v45  ;;  %v1137_v49 = vadd.f32 %v1136_v48, %v614_v41  ;;  %v1176_v57 = vadd.f32 %v1175_v56, %v622_v53  ;;  %v1177_v58 = vpop.f32.mrb[6].mxu1 }
 0x237   : > { %1236 = vst [vmem:[#allocation3 + $0x68] sm:$0xff] %v1135_v47  ;;  %1229 = vst [vmem:[#allocation3 + $0x30] sm:$0xff] %v1174_v55  ;;  %v1178_v59 = vadd.f32 %v1177_v58, %v618_v52  ;;  %v1179_v60 = vpop.f32.mrb[7].mxu1 }
 0x238   : > { %1237 = vst [vmem:[#allocation3 + $0x70] sm:$0xff] %v1137_v49  ;;  %1230 = vst [vmem:[#allocation3 + $0x38] sm:$0xff] %v1176_v57  ;;  %v1180_v61 = vadd.f32 %v1179_v60, %v622_v53 }
 0x239   : > { %1238 = vst [vmem:[#allocation3 + $0x78] sm:$0xff] %v1178_v59 }
 0x23a   : > { %1239 = vst [vmem:[#allocation3 + $0x80] sm:$0xff] %v1180_v61 }
 0x252   : > { %v1216_v63 = vpop.f32.mrb[8].mxu0 }
 0x253   : > { %v1217_v0 = vadd.f32 %v4648_v62, %v1216_v63  ;;  %v5557_v1 = vpop.f32.mrb[9].mxu0 }
 0x254   : > { %v1219_v2 = vpop.f32.mrb[10].mxu0 }
 0x255   : > { %1231 = vst [vmem:[#allocation3 + $0x40] sm:$0xff] %v1217_v0  ;;  %v1220_v4 = vadd.f32 %v4648_v62, %v1219_v2  ;;  %v5558_v5 = vpop.f32.mrb[11].mxu0 }
 0x257   : > { %1240 = vst [vmem:[#allocation3 + $0x88] sm:$0xff] %v1220_v4 }
 0x258 PF: > { %v1271_v6 = vld [vmem:[%s6822_s25 + $0x20] sm:$0xff]  ;;  %v1272_v16 = vld [vmem:[%s6822_s25 + $0x28] sm:$0xff]  ;;  %v1273_v30 = vld [vmem:[%s6822_s25 + $0x30] sm:$0xff]  ;;  %vm6444_vm1 = vmmov 0   ;;  %s7383_s23 = sld [smem:[#allocation27_spill]] }
 0x259   : > { %v1279_v7 = vld [vmem:[%s6822_s25 + $0x60] sm:$0xff]  ;;  %v1471_v9 = vunpack.c.l.s8.bf16 %v1271_v6  ;;  %v1472_v10 = vunpack.c.h.s8.bf16 %v1271_v6  ;;  %v1280_v17 = vld [vmem:[%s6822_s25 + $0x68] sm:$0xff]  ;;  %v1473_v20 = vunpack.c.l.s8.bf16 %v1272_v16  ;;  %v1474_v27 = vunpack.c.h.s8.bf16 %v1272_v16  ;;  %v1281_v31 = vld [vmem:[%s6822_s25 + $0x70] sm:$0xff] }
 0x25a   : > { %v1267_v8 = vld [vmem:[%s6822_s25] sm:$0xff]  ;;  %v1487_v11 = vunpack.c.l.s8.bf16 %v1279_v7  ;;  %v1488_v12 = vunpack.c.h.s8.bf16 %v1279_v7  ;;  %v1489_v21 = vunpack.c.l.s8.bf16 %v1280_v17  ;;  %v1268_v22 = vld [vmem:[%s6822_s25 + $0x8] sm:$0xff]  ;;  %v1490_v28 = vunpack.c.h.s8.bf16 %v1280_v17  ;;  %v1269_v37 = vld [vmem:[%s6822_s25 + $0x10] sm:$0xff] }
 0x25b   : > { %v1275_v13 = vld [vmem:[%s6822_s25 + $0x40] sm:$0xff]  ;;  %v1463_v14 = vunpack.c.l.s8.bf16 %v1267_v8  ;;  %4884 = vmatprep.subr.bf16.mxu0 %v1471_v9  ;;  %v1464_v18 = vunpack.c.h.s8.bf16 %v1267_v8  ;;  %v1276_v23 = vld [vmem:[%s6822_s25 + $0x48] sm:$0xff]  ;;  %v1465_v3 = vunpack.c.l.s8.bf16 %v1268_v22  ;;  %v1466_v33 = vunpack.c.h.s8.bf16 %v1268_v22  ;;  %v1277_v38 = vld [vmem:[%s6822_s25 + $0x50] sm:$0xff] }
 0x25c   : > { %v1479_v15 = vunpack.c.l.s8.bf16 %v1275_v13  ;;  %4906 = vmatprep.subr.bf16.mxu1 %v1487_v11  ;;  %v1480_v19 = vunpack.c.h.s8.bf16 %v1275_v13  ;;  %v6875_v24 = vld [vmem:[%s6815_s20] sm:$0xff]  ;;  %v6878_v25 = vld [vmem:[%s6815_s20 + $0x8] sm:$0xff]  ;;  %v1481_v26 = vunpack.c.l.s8.bf16 %v1276_v23  ;;  %v1482_v34 = vunpack.c.h.s8.bf16 %v1276_v23  ;;  %v6901_v1 = vld [vmem:[%s6815_s20 + $0x10] sm:$0xff] }
 0x25d   : > { %4885 = vmatpush3.bf16.msra.mxu0 %v1463_v14  ;;  %v4723_v29 = vcombine.high %v6875_v24, %v6875_v24  ;;  %v4725_v32 = vcombine.high %v6878_v25, %v6878_v25  ;;  %v1475_v35 = vunpack.c.l.s8.bf16 %v1273_v30  ;;  %v1491_v36 = vunpack.c.l.s8.bf16 %v1281_v31  ;;  %v1274_v43 = vld [vmem:[%s6822_s25 + $0x38] sm:$0xff]  ;;  %v1287_v55 = vld [vmem:[%s6822_s25 + $0xa0] sm:$0xff]  ;;  %v1288_v8 = vld [vmem:[%s6822_s25 + $0xa8] sm:$0xff] }
 0x25e   : > { %4907 = vmatpush3.bf16.msra.mxu1 %v1479_v15  ;;  %4886 = vmatprep.subr.bf16.mxu0 %v1472_v10  ;;  %v1467_v39 = vunpack.c.l.s8.bf16 %v1269_v37  ;;  %v1483_v40 = vunpack.c.l.s8.bf16 %v1277_v38  ;;  %v1476_v41 = vunpack.c.h.s8.bf16 %v1273_v30  ;;  %v1492_v42 = vunpack.c.h.s8.bf16 %v1281_v31  ;;  %v1282_v44 = vld [vmem:[%s6822_s25 + $0x78] sm:$0xff]  ;;  %v1295_v56 = vld [vmem:[%s6822_s25 + $0xe0] sm:$0xff]  ;;  %v1296_v9 = vld [vmem:[%s6822_s25 + $0xe8] sm:$0xff]  ;;  %p4771_p11 = scmp.ne.s32.totalorder %s7383_s23, 1 }
 0x25f   : > { %4908 = vmatprep.subr.bf16.mxu1 %v1488_v12  ;;  %2059 = vmatprep.mubr.bf16.mxu0 %v4723_v29  ;;  %v1468_v45 = vunpack.c.h.s8.bf16 %v1269_v37  ;;  %v1484_v46 = vunpack.c.h.s8.bf16 %v1277_v38  ;;  %v1477_v47 = vunpack.c.l.s8.bf16 %v1274_v43  ;;  %v1493_v48 = vunpack.c.l.s8.bf16 %v1282_v44  ;;  %v1270_v49 = vld [vmem:[%s6822_s25 + $0x18] sm:$0xff]  ;;  %v1283_v60 = vld [vmem:[%s6822_s25 + $0x80] sm:$0xff]  ;;  %v1284_v15 = vld [vmem:[%s6822_s25 + $0x88] sm:$0xff] }
 0x260   : > { %2099 = vmatprep.mubr.bf16.mxu1 %v4725_v32  ;;  %v1278_v50 = vld [vmem:[%s6822_s25 + $0x58] sm:$0xff]  ;;  %v1469_v51 = vunpack.c.l.s8.bf16 %v1270_v49  ;;  %v1478_v53 = vunpack.c.h.s8.bf16 %v1274_v43  ;;  %v1494_v54 = vunpack.c.h.s8.bf16 %v1282_v44  ;;  %v1470_v57 = vunpack.c.h.s8.bf16 %v1270_v49  ;;  %v1291_v62 = vld [vmem:[%s6822_s25 + $0xc0] sm:$0xff]  ;;  %v1292_v17 = vld [vmem:[%s6822_s25 + $0xc8] sm:$0xff] }
 0x261   : > { %4887 = vmatpush3.bf16.msra.mxu0 %v1464_v18  ;;  %v1485_v52 = vunpack.c.l.s8.bf16 %v1278_v50  ;;  %v1486_v58 = vunpack.c.h.s8.bf16 %v1278_v50  ;;  %v1503_v59 = vunpack.c.l.s8.bf16 %v1287_v55  ;;  %v1519_v61 = vunpack.c.l.s8.bf16 %v1295_v56  ;;  %v6904_v2 = vld [vmem:[%s6815_s20 + $0x18] sm:$0xff]  ;;  %v1299_v50 = vld [vmem:[%s6822_s25 + $0x100] sm:$0xff] }
 0x262   : > { %4909 = vmatpush3.bf16.msra.mxu1 %v1480_v19  ;;  %4888 = vmatprep.subr.bf16.mxu0 %v1473_v20  ;;  %v4722_v63 = vcombine.low %v6875_v24, %v6875_v24  ;;  %v4724_v0 = vcombine.low %v6878_v25, %v6878_v25  ;;  %v1495_v4 = vunpack.c.l.s8.bf16 %v1283_v60  ;;  %v1511_v5 = vunpack.c.l.s8.bf16 %v1291_v62  ;;  %v1289_v22 = vld [vmem:[%s6822_s25 + $0xb0] sm:$0xff]  ;;  %v1286_v38 = vld [vmem:[%s6822_s25 + $0x98] sm:$0xff] }
 0x263   : > { %4910 = vmatprep.subr.bf16.mxu1 %v1489_v21  ;;  %v1504_v6 = vunpack.c.h.s8.bf16 %v1287_v55  ;;  %v1520_v7 = vunpack.c.h.s8.bf16 %v1295_v56  ;;  %v4727_v10 = vcombine.high %v6901_v1, %v6901_v1  ;;  %v4729_v11 = vcombine.high %v6904_v2, %v6904_v2  ;;  %v1297_v23 = vld [vmem:[%s6822_s25 + $0xf0] sm:$0xff]  ;;  %v6931_v55 = vld [vmem:[%s6815_s20 + $0x20] sm:$0xff]  ;;  %v6934_v56 = vld [vmem:[%s6815_s20 + $0x28] sm:$0xff] }
 0x264   : > { %v1496_v12 = vunpack.c.h.s8.bf16 %v1283_v60  ;;  %v1512_v13 = vunpack.c.h.s8.bf16 %v1291_v62  ;;  %v1505_v14 = vunpack.c.l.s8.bf16 %v1288_v8  ;;  %v1521_v16 = vunpack.c.l.s8.bf16 %v1296_v9  ;;  %v1312_v62 = vld [vmem:[%s6822_s25 + $0x168] sm:$0xff] }
 0x265   : > { %4889 = vmatpush3.bf16.msra.mxu0 %v1465_v3  ;;  %v1497_v18 = vunpack.c.l.s8.bf16 %v1284_v15  ;;  %v1513_v19 = vunpack.c.l.s8.bf16 %v1292_v17  ;;  %v1506_v20 = vunpack.c.h.s8.bf16 %v1288_v8  ;;  %v1522_v21 = vunpack.c.h.s8.bf16 %v1296_v9 }
 0x266   : > { %4911 = vmatpush3.bf16.msra.mxu1 %v1481_v26  ;;  %4890 = vmatprep.subr.bf16.mxu0 %v1474_v27  ;;  %v1498_v24 = vunpack.c.h.s8.bf16 %v1284_v15  ;;  %v1514_v25 = vunpack.c.h.s8.bf16 %v1292_v17  ;;  %v1507_v3 = vunpack.c.l.s8.bf16 %v1289_v22  ;;  %v1285_v26 = vld [vmem:[%s6822_s25 + $0x90] sm:$0xff]  ;;  %v1523_v27 = vunpack.c.l.s8.bf16 %v1297_v23 }
 0x267   : > { %4912 = vmatprep.subr.bf16.mxu1 %v1490_v28  ;;  %v1293_v28 = vld [vmem:[%s6822_s25 + $0xd0] sm:$0xff]  ;;  %v1499_v29 = vunpack.c.l.s8.bf16 %v1285_v26  ;;  %v1508_v31 = vunpack.c.h.s8.bf16 %v1289_v22  ;;  %v1524_v32 = vunpack.c.h.s8.bf16 %v1297_v23  ;;  %vm6446_vm2 = vmmov (!%p4771_p11), 0  }
 0x268   : > { %v1515_v30 = vunpack.c.l.s8.bf16 %v1293_v28  ;;  %v1301_v17 = vld [vmem:[%s6822_s25 + $0x110] sm:$0xff]  ;;  %vm3254_vm3 = vcmask (!%p4771_p11), 130048  }
 0x269   : > { %4891 = vmatpush3.bf16.msra.mxu0 %v1466_v33  ;;  %v1290_v33 = vld [vmem:[%s6822_s25 + $0xb8] sm:$0xff] }
 0x26a   : > { %4913 = vmatpush3.bf16.msra.mxu1 %v1482_v34  ;;  %4892 = vmatprep.subr.bf16.mxu0 %v1475_v35  ;;  %v1298_v34 = vld [vmem:[%s6822_s25 + $0xf8] sm:$0xff]  ;;  %v1500_v35 = vunpack.c.h.s8.bf16 %v1285_v26  ;;  %v1509_v37 = vunpack.c.l.s8.bf16 %v1290_v33  ;;  %v1510_v43 = vunpack.c.h.s8.bf16 %v1290_v33 }
 0x26b   : > { %4914 = vmatprep.subr.bf16.mxu1 %v1491_v36  ;;  %v1516_v36 = vunpack.c.h.s8.bf16 %v1293_v28  ;;  %v1526_v44 = vunpack.c.h.s8.bf16 %v1298_v34  ;;  %v1302_v28 = vld [vmem:[%s6822_s25 + $0x118] sm:$0xff] }
 0x26d   : > { %4893 = vmatpush3.bf16.msra.mxu0 %v1467_v39  ;;  %v1525_v39 = vunpack.c.l.s8.bf16 %v1298_v34 }
 0x26e   : > { %4915 = vmatpush3.bf16.msra.mxu1 %v1483_v40  ;;  %4894 = vmatprep.subr.bf16.mxu0 %v1476_v41  ;;  %v1294_v40 = vld [vmem:[%s6822_s25 + $0xd8] sm:$0xff]  ;;  %v1501_v41 = vunpack.c.l.s8.bf16 %v1286_v38 }
 0x26f   : > { %4916 = vmatprep.subr.bf16.mxu1 %v1492_v42  ;;  %v1517_v42 = vunpack.c.l.s8.bf16 %v1294_v40 }
 0x271   : > { %4895 = vmatpush3.bf16.msra.mxu0 %v1468_v45  ;;  %v1303_v45 = vld [vmem:[%s6822_s25 + $0x120] sm:$0xff] }
 0x272   : > { %4917 = vmatpush3.bf16.msra.mxu1 %v1484_v46  ;;  %4896 = vmatprep.subr.bf16.mxu0 %v1477_v47  ;;  %v1311_v46 = vld [vmem:[%s6822_s25 + $0x160] sm:$0xff]  ;;  %v1502_v47 = vunpack.c.h.s8.bf16 %v1286_v38  ;;  %v1535_v49 = vunpack.c.l.s8.bf16 %v1303_v45 }
 0x273   : > { %4918 = vmatprep.subr.bf16.mxu1 %v1493_v48  ;;  %v1518_v48 = vunpack.c.h.s8.bf16 %v1294_v40  ;;  %v1552_v60 = vunpack.c.h.s8.bf16 %v1311_v46  ;;  %v1315_v40 = vld [vmem:[%s6822_s25 + $0x180] sm:$0xff] }
 0x275   : > { %4897 = vmatpush3.bf16.msra.mxu0 %v1469_v51  ;;  %v1551_v51 = vunpack.c.l.s8.bf16 %v1311_v46  ;;  %v6964_v46 = vld [vmem:[%s6815_s20 + $0x38] sm:$0xff] }
 0x276   : > { %4919 = vmatpush3.bf16.msra.mxu1 %v1485_v52  ;;  %4898 = vmatprep.subr.bf16.mxu0 %v1478_v53  ;;  %v1307_v52 = vld [vmem:[%s6822_s25 + $0x140] sm:$0xff]  ;;  %v4726_v53 = vcombine.low %v6901_v1, %v6901_v1  ;;  %v1528_v1 = vunpack.c.h.s8.bf16 %v1299_v50 }
 0x277   : > { %4920 = vmatprep.subr.bf16.mxu1 %v1494_v54  ;;  %v4728_v54 = vcombine.low %v6904_v2, %v6904_v2  ;;  %v1544_v2 = vunpack.c.h.s8.bf16 %v1307_v52 }
 0x279   : > { %4899 = vmatpush3.bf16.msra.mxu0 %v1470_v57  ;;  %v1527_v57 = vunpack.c.l.s8.bf16 %v1299_v50 }
 0x27a   : > { %4921 = vmatpush3.bf16.msra.mxu1 %v1486_v58  ;;  %4928 = vmatprep.subr.bf16.mxu0 %v1503_v59  ;;  %v1543_v58 = vunpack.c.l.s8.bf16 %v1307_v52  ;;  %v1536_v59 = vunpack.c.h.s8.bf16 %v1303_v45  ;;  %v6961_v45 = vld [vmem:[%s6815_s20 + $0x30] sm:$0xff] }
 0x27b   : > { %4950 = vmatprep.subr.bf16.mxu1 %v1519_v61  ;;  %v1304_v61 = vld [vmem:[%s6822_s25 + $0x128] sm:$0xff] }
 0x27c   : > { %2060 = vmatmul.mubr.bf16.vlgmr.msra.gmra.mrb[0].mxu0 %v4722_v63  ;;  %v4731_v63 = vcombine.high %v6931_v55, %v6931_v55  ;;  %v1328_v52 = vld [vmem:[%s6822_s25 + $0x1e8] sm:$0xff] }
 0x27d   : > { %2100 = vmatmul.mubr.bf16.vlgmr.msra.gmra.mrb[0].mxu1 %v4724_v0  ;;  %4929 = vmatpush3.bf16.msra.mxu0 %v1495_v4  ;;  %v4733_v0 = vcombine.high %v6934_v56, %v6934_v56  ;;  %v1537_v4 = vunpack.c.l.s8.bf16 %v1304_v61 }
 0x27e   : > { %4951 = vmatpush3.bf16.msra.mxu1 %v1511_v5  ;;  %4930 = vmatprep.subr.bf16.mxu0 %v1504_v6  ;;  %v1300_v5 = vld [vmem:[%s6822_s25 + $0x108] sm:$0xff]  ;;  %v1553_v6 = vunpack.c.l.s8.bf16 %v1312_v62 }
 0x27f   : > { %4952 = vmatprep.subr.bf16.mxu1 %v1520_v7  ;;  %2139 = vmatprep.mubr.bf16.mxu0 %v4727_v10  ;;  %v1308_v7 = vld [vmem:[%s6822_s25 + $0x148] sm:$0xff]  ;;  %v1529_v8 = vunpack.c.l.s8.bf16 %v1300_v5  ;;  %v1538_v10 = vunpack.c.h.s8.bf16 %v1304_v61 }
 0x280   : > { %2179 = vmatprep.mubr.bf16.mxu1 %v4729_v11  ;;  %v1545_v9 = vunpack.c.l.s8.bf16 %v1308_v7  ;;  %v1554_v11 = vunpack.c.h.s8.bf16 %v1312_v62  ;;  %v1546_v15 = vunpack.c.h.s8.bf16 %v1308_v7  ;;  %v1317_v7 = vld [vmem:[%s6822_s25 + $0x190] sm:$0xff] }
 0x281   : > { %4931 = vmatpush3.bf16.msra.mxu0 %v1496_v12  ;;  %v1305_v12 = vld [vmem:[%s6822_s25 + $0x130] sm:$0xff] }
 0x282   : > { %4953 = vmatpush3.bf16.msra.mxu1 %v1512_v13  ;;  %4932 = vmatprep.subr.bf16.mxu0 %v1505_v14  ;;  %v1313_v13 = vld [vmem:[%s6822_s25 + $0x170] sm:$0xff]  ;;  %v1530_v14 = vunpack.c.h.s8.bf16 %v1300_v5  ;;  %v1540_v22 = vunpack.c.h.s8.bf16 %v1305_v12 }
 0x283   : > { %4954 = vmatprep.subr.bf16.mxu1 %v1521_v16  ;;  %v1539_v16 = vunpack.c.l.s8.bf16 %v1305_v12  ;;  %v1556_v23 = vunpack.c.h.s8.bf16 %v1313_v13 }
 0x285   : > { %4933 = vmatpush3.bf16.msra.mxu0 %v1497_v18  ;;  %v1555_v18 = vunpack.c.l.s8.bf16 %v1313_v13 }
 0x286   : > { %4955 = vmatpush3.bf16.msra.mxu1 %v1513_v19  ;;  %4934 = vmatprep.subr.bf16.mxu0 %v1506_v20  ;;  %v1309_v19 = vld [vmem:[%s6822_s25 + $0x150] sm:$0xff]  ;;  %v1531_v20 = vunpack.c.l.s8.bf16 %v1301_v17 }
 0x287   : > { %4956 = vmatprep.subr.bf16.mxu1 %v1522_v21  ;;  %v1547_v21 = vunpack.c.l.s8.bf16 %v1309_v19  ;;  %v1548_v26 = vunpack.c.h.s8.bf16 %v1309_v19  ;;  %v1318_v19 = vld [vmem:[%s6822_s25 + $0x198] sm:$0xff] }
 0x289   : > { %4935 = vmatpush3.bf16.msra.mxu0 %v1498_v24  ;;  %v1306_v24 = vld [vmem:[%s6822_s25 + $0x138] sm:$0xff] }
 0x28a   : > { %4957 = vmatpush3.bf16.msra.mxu1 %v1514_v25  ;;  %4936 = vmatprep.subr.bf16.mxu0 %v1507_v3  ;;  %v1314_v25 = vld [vmem:[%s6822_s25 + $0x178] sm:$0xff]  ;;  %v1532_v3 = vunpack.c.h.s8.bf16 %v1301_v17  ;;  %v1542_v33 = vunpack.c.h.s8.bf16 %v1306_v24 }
 0x28b   : > { %4958 = vmatprep.subr.bf16.mxu1 %v1523_v27  ;;  %v1541_v27 = vunpack.c.l.s8.bf16 %v1306_v24  ;;  %v1558_v34 = vunpack.c.h.s8.bf16 %v1314_v25 }
 0x28d   : > { %4937 = vmatpush3.bf16.msra.mxu0 %v1499_v29  ;;  %v1557_v29 = vunpack.c.l.s8.bf16 %v1314_v25 }
 0x28e   : > { %4959 = vmatpush3.bf16.msra.mxu1 %v1515_v30  ;;  %4938 = vmatprep.subr.bf16.mxu0 %v1508_v31  ;;  %v1310_v30 = vld [vmem:[%s6822_s25 + $0x158] sm:$0xff]  ;;  %v1533_v31 = vunpack.c.l.s8.bf16 %v1302_v28 }
 0x28f   : > { %4960 = vmatprep.subr.bf16.mxu1 %v1524_v32  ;;  %v1549_v32 = vunpack.c.l.s8.bf16 %v1310_v30  ;;  %v1550_v38 = vunpack.c.h.s8.bf16 %v1310_v30  ;;  %v1331_v30 = vld [vmem:[%s6822_s25 + $0x200] sm:$0xff] }
 0x291   : > { %4939 = vmatpush3.bf16.msra.mxu0 %v1500_v35  ;;  %v1319_v35 = vld [vmem:[%s6822_s25 + $0x1a0] sm:$0xff] }
 0x292   : > { %4961 = vmatpush3.bf16.msra.mxu1 %v1516_v36  ;;  %4940 = vmatprep.subr.bf16.mxu0 %v1509_v37  ;;  %v1327_v36 = vld [vmem:[%s6822_s25 + $0x1e0] sm:$0xff]  ;;  %v1534_v37 = vunpack.c.h.s8.bf16 %v1302_v28 }
 0x293   : > { %4962 = vmatprep.subr.bf16.mxu1 %v1525_v39  ;;  %v1567_v39 = vunpack.c.l.s8.bf16 %v1319_v35  ;;  %v1584_v50 = vunpack.c.h.s8.bf16 %v1327_v36 }
 0x295   : > { %4941 = vmatpush3.bf16.msra.mxu0 %v1501_v41  ;;  %v1583_v41 = vunpack.c.l.s8.bf16 %v1327_v36  ;;  %v6994_v36 = vld [vmem:[%s6815_s20 + $0x48] sm:$0xff] }
 0x296   : > { %4963 = vmatpush3.bf16.msra.mxu1 %v1517_v42  ;;  %4942 = vmatprep.subr.bf16.mxu0 %v1510_v43  ;;  %v1323_v42 = vld [vmem:[%s6822_s25 + $0x1c0] sm:$0xff]  ;;  %v4730_v43 = vcombine.low %v6931_v55, %v6931_v55  ;;  %v1560_v55 = vunpack.c.h.s8.bf16 %v1315_v40 }
 0x297   : > { %4964 = vmatprep.subr.bf16.mxu1 %v1526_v44  ;;  %v4732_v44 = vcombine.low %v6934_v56, %v6934_v56  ;;  %v1576_v56 = vunpack.c.h.s8.bf16 %v1323_v42 }
 0x299   : > { %4943 = vmatpush3.bf16.msra.mxu0 %v1502_v47  ;;  %v1559_v47 = vunpack.c.l.s8.bf16 %v1315_v40 }
 0x29a   : > { %4965 = vmatpush3.bf16.msra.mxu1 %v1518_v48  ;;  %4972 = vmatprep.subr.bf16.mxu0 %v1535_v49  ;;  %v1575_v48 = vunpack.c.l.s8.bf16 %v1323_v42  ;;  %v1568_v49 = vunpack.c.h.s8.bf16 %v1319_v35  ;;  %v6991_v35 = vld [vmem:[%s6815_s20 + $0x40] sm:$0xff]  ;;  %v1344_v42 = vld [vmem:[%s6822_s25 + $0x268] sm:$0xff] }
 0x29b   : > { %4994 = vmatprep.subr.bf16.mxu1 %v1551_v51  ;;  %v1320_v51 = vld [vmem:[%s6822_s25 + $0x1a8] sm:$0xff] }
 0x29c   : > { %2140 = vmatmul.mubr.bf16.vlgmr.msra.gmra.mrb[4].mxu0 %v4726_v53  ;;  %v4735_v53 = vcombine.high %v6961_v45, %v6961_v45 }
 0x29d   : > { %2180 = vmatmul.mubr.bf16.vlgmr.msra.gmra.mrb[4].mxu1 %v4728_v54  ;;  %4973 = vmatpush3.bf16.msra.mxu0 %v1527_v57  ;;  %v4737_v54 = vcombine.high %v6964_v46, %v6964_v46  ;;  %v1569_v57 = vunpack.c.l.s8.bf16 %v1320_v51 }
 0x29e   : > { %4995 = vmatpush3.bf16.msra.mxu1 %v1543_v58  ;;  %4974 = vmatprep.subr.bf16.mxu0 %v1536_v59  ;;  %v1316_v58 = vld [vmem:[%s6822_s25 + $0x188] sm:$0xff]  ;;  %v1585_v59 = vunpack.c.l.s8.bf16 %v1328_v52 }
 0x29f   : > { %4996 = vmatprep.subr.bf16.mxu1 %v1552_v60  ;;  %2219 = vmatprep.mubr.bf16.mxu0 %v4731_v63  ;;  %v1324_v60 = vld [vmem:[%s6822_s25 + $0x1c8] sm:$0xff]  ;;  %v1561_v61 = vunpack.c.l.s8.bf16 %v1316_v58  ;;  %v1570_v63 = vunpack.c.h.s8.bf16 %v1320_v51 }
 0x2a0   : > { %2259 = vmatprep.mubr.bf16.mxu1 %v4733_v0  ;;  %v1577_v62 = vunpack.c.l.s8.bf16 %v1324_v60  ;;  %v1586_v0 = vunpack.c.h.s8.bf16 %v1328_v52  ;;  %v1578_v5 = vunpack.c.h.s8.bf16 %v1324_v60  ;;  %v1333_v60 = vld [vmem:[%s6822_s25 + $0x210] sm:$0xff] }
 0x2a1   : > { %4975 = vmatpush3.bf16.msra.mxu0 %v1528_v1  ;;  %v1321_v1 = vld [vmem:[%s6822_s25 + $0x1b0] sm:$0xff] }
 0x2a2   : > { %4997 = vmatpush3.bf16.msra.mxu1 %v1544_v2  ;;  %4976 = vmatprep.subr.bf16.mxu0 %v1537_v4  ;;  %v1329_v2 = vld [vmem:[%s6822_s25 + $0x1f0] sm:$0xff]  ;;  %v1562_v4 = vunpack.c.h.s8.bf16 %v1316_v58  ;;  %v1572_v12 = vunpack.c.h.s8.bf16 %v1321_v1 }
 0x2a3   : > { %4998 = vmatprep.subr.bf16.mxu1 %v1553_v6  ;;  %v1571_v6 = vunpack.c.l.s8.bf16 %v1321_v1  ;;  %v1588_v13 = vunpack.c.h.s8.bf16 %v1329_v2 }
 0x2a5   : > { %4977 = vmatpush3.bf16.msra.mxu0 %v1529_v8  ;;  %v1587_v8 = vunpack.c.l.s8.bf16 %v1329_v2 }
 0x2a6   : > { %4999 = vmatpush3.bf16.msra.mxu1 %v1545_v9  ;;  %4978 = vmatprep.subr.bf16.mxu0 %v1538_v10  ;;  %v1325_v9 = vld [vmem:[%s6822_s25 + $0x1d0] sm:$0xff]  ;;  %v1563_v10 = vunpack.c.l.s8.bf16 %v1317_v7 }
 0x2a7   : > { %5000 = vmatprep.subr.bf16.mxu1 %v1554_v11  ;;  %v1579_v11 = vunpack.c.l.s8.bf16 %v1325_v9  ;;  %v1580_v17 = vunpack.c.h.s8.bf16 %v1325_v9  ;;  %v1334_v9 = vld [vmem:[%s6822_s25 + $0x218] sm:$0xff] }
 0x2a9   : > { %4979 = vmatpush3.bf16.msra.mxu0 %v1530_v14  ;;  %v1322_v14 = vld [vmem:[%s6822_s25 + $0x1b8] sm:$0xff] }
 0x2aa   : > { %5001 = vmatpush3.bf16.msra.mxu1 %v1546_v15  ;;  %4980 = vmatprep.subr.bf16.mxu0 %v1539_v16  ;;  %v1330_v15 = vld [vmem:[%s6822_s25 + $0x1f8] sm:$0xff]  ;;  %v1564_v16 = vunpack.c.h.s8.bf16 %v1317_v7  ;;  %v1574_v24 = vunpack.c.h.s8.bf16 %v1322_v14 }
 0x2ab   : > { %5002 = vmatprep.subr.bf16.mxu1 %v1555_v18  ;;  %v1573_v18 = vunpack.c.l.s8.bf16 %v1322_v14  ;;  %v1590_v25 = vunpack.c.h.s8.bf16 %v1330_v15 }
 0x2ad   : > { %4981 = vmatpush3.bf16.msra.mxu0 %v1531_v20  ;;  %v1589_v20 = vunpack.c.l.s8.bf16 %v1330_v15 }
 0x2ae   : > { %5003 = vmatpush3.bf16.msra.mxu1 %v1547_v21  ;;  %4982 = vmatprep.subr.bf16.mxu0 %v1540_v22  ;;  %v1326_v21 = vld [vmem:[%s6822_s25 + $0x1d8] sm:$0xff]  ;;  %v1565_v22 = vunpack.c.l.s8.bf16 %v1318_v19 }
 0x2af   : > { %5004 = vmatprep.subr.bf16.mxu1 %v1556_v23  ;;  %v1581_v23 = vunpack.c.l.s8.bf16 %v1326_v21  ;;  %v1582_v28 = vunpack.c.h.s8.bf16 %v1326_v21  ;;  %v1347_v21 = vld [vmem:[%s6822_s25 + $0x280] sm:$0xff] }
 0x2b1   : > { %4983 = vmatpush3.bf16.msra.mxu0 %v1532_v3  ;;  %v1335_v3 = vld [vmem:[%s6822_s25 + $0x220] sm:$0xff] }
 0x2b2   : > { %5005 = vmatpush3.bf16.msra.mxu1 %v1548_v26  ;;  %4984 = vmatprep.subr.bf16.mxu0 %v1541_v27  ;;  %v1343_v26 = vld [vmem:[%s6822_s25 + $0x260] sm:$0xff]  ;;  %v1566_v27 = vunpack.c.h.s8.bf16 %v1318_v19 }
 0x2b3   : > { %5006 = vmatprep.subr.bf16.mxu1 %v1557_v29  ;;  %v1599_v29 = vunpack.c.l.s8.bf16 %v1335_v3  ;;  %v1616_v40 = vunpack.c.h.s8.bf16 %v1343_v26 }
 0x2b5   : > { %4985 = vmatpush3.bf16.msra.mxu0 %v1533_v31  ;;  %v1615_v31 = vunpack.c.l.s8.bf16 %v1343_v26  ;;  %v7024_v26 = vld [vmem:[%s6815_s20 + $0x58] sm:$0xff] }
 0x2b6   : > { %5007 = vmatpush3.bf16.msra.mxu1 %v1549_v32  ;;  %4986 = vmatprep.subr.bf16.mxu0 %v1542_v33  ;;  %v1339_v32 = vld [vmem:[%s6822_s25 + $0x240] sm:$0xff]  ;;  %v4734_v33 = vcombine.low %v6961_v45, %v6961_v45  ;;  %v1592_v45 = vunpack.c.h.s8.bf16 %v1331_v30 }
 0x2b7   : > { %5008 = vmatprep.subr.bf16.mxu1 %v1558_v34  ;;  %v4736_v34 = vcombine.low %v6964_v46, %v6964_v46  ;;  %v1608_v46 = vunpack.c.h.s8.bf16 %v1339_v32 }
 0x2b9   : > { %4987 = vmatpush3.bf16.msra.mxu0 %v1534_v37  ;;  %v1591_v37 = vunpack.c.l.s8.bf16 %v1331_v30 }
 0x2ba   : > { %5009 = vmatpush3.bf16.msra.mxu1 %v1550_v38  ;;  %5016 = vmatprep.subr.bf16.mxu0 %v1567_v39  ;;  %v1607_v38 = vunpack.c.l.s8.bf16 %v1339_v32  ;;  %v1600_v39 = vunpack.c.h.s8.bf16 %v1335_v3  ;;  %v7021_v3 = vld [vmem:[%s6815_s20 + $0x50] sm:$0xff] }
 0x2bb   : > { %5038 = vmatprep.subr.bf16.mxu1 %v1583_v41  ;;  %v1336_v41 = vld [vmem:[%s6822_s25 + $0x228] sm:$0xff] }
 0x2bc   : > { %2220 = vmatmul.mubr.bf16.vlgmr.msra.gmra.mrb[8].mxu0 %v4730_v43  ;;  %v4739_v43 = vcombine.high %v6991_v35, %v6991_v35  ;;  %v1360_v32 = vld [vmem:[%s6822_s25 + $0x2e8] sm:$0xff] }
 0x2bd   : > { %2260 = vmatmul.mubr.bf16.vlgmr.msra.gmra.mrb[8].mxu1 %v4732_v44  ;;  %5017 = vmatpush3.bf16.msra.mxu0 %v1559_v47  ;;  %v4741_v44 = vcombine.high %v6994_v36, %v6994_v36  ;;  %v1601_v47 = vunpack.c.l.s8.bf16 %v1336_v41 }
 0x2be   : > { %5039 = vmatpush3.bf16.msra.mxu1 %v1575_v48  ;;  %5018 = vmatprep.subr.bf16.mxu0 %v1568_v49  ;;  %v1332_v48 = vld [vmem:[%s6822_s25 + $0x208] sm:$0xff]  ;;  %v1617_v49 = vunpack.c.l.s8.bf16 %v1344_v42 }
 0x2bf   : > { %5040 = vmatprep.subr.bf16.mxu1 %v1584_v50  ;;  %2299 = vmatprep.mubr.bf16.mxu0 %v4735_v53  ;;  %v1340_v50 = vld [vmem:[%s6822_s25 + $0x248] sm:$0xff]  ;;  %v1593_v51 = vunpack.c.l.s8.bf16 %v1332_v48  ;;  %v1602_v53 = vunpack.c.h.s8.bf16 %v1336_v41 }
 0x2c0   : > { %2339 = vmatprep.mubr.bf16.mxu1 %v4737_v54  ;;  %v1609_v52 = vunpack.c.l.s8.bf16 %v1340_v50  ;;  %v1618_v54 = vunpack.c.h.s8.bf16 %v1344_v42  ;;  %v1610_v58 = vunpack.c.h.s8.bf16 %v1340_v50  ;;  %v1349_v50 = vld [vmem:[%s6822_s25 + $0x290] sm:$0xff] }
 0x2c1   : > { %5019 = vmatpush3.bf16.msra.mxu0 %v1560_v55  ;;  %v1337_v55 = vld [vmem:[%s6822_s25 + $0x230] sm:$0xff] }
 0x2c2   : > { %5041 = vmatpush3.bf16.msra.mxu1 %v1576_v56  ;;  %5020 = vmatprep.subr.bf16.mxu0 %v1569_v57  ;;  %v1345_v56 = vld [vmem:[%s6822_s25 + $0x270] sm:$0xff]  ;;  %v1594_v57 = vunpack.c.h.s8.bf16 %v1332_v48  ;;  %v1604_v1 = vunpack.c.h.s8.bf16 %v1337_v55 }
 0x2c3   : > { %5042 = vmatprep.subr.bf16.mxu1 %v1585_v59  ;;  %v1603_v59 = vunpack.c.l.s8.bf16 %v1337_v55  ;;  %v1620_v2 = vunpack.c.h.s8.bf16 %v1345_v56 }
 0x2c5   : > { %5021 = vmatpush3.bf16.msra.mxu0 %v1561_v61  ;;  %v1619_v61 = vunpack.c.l.s8.bf16 %v1345_v56 }
 0x2c6   : > { %5043 = vmatpush3.bf16.msra.mxu1 %v1577_v62  ;;  %5022 = vmatprep.subr.bf16.mxu0 %v1570_v63  ;;  %v1341_v62 = vld [vmem:[%s6822_s25 + $0x250] sm:$0xff]  ;;  %v1595_v63 = vunpack.c.l.s8.bf16 %v1333_v60 }
 0x2c7   : > { %5044 = vmatprep.subr.bf16.mxu1 %v1586_v0  ;;  %v1611_v0 = vunpack.c.l.s8.bf16 %v1341_v62  ;;  %v1612_v7 = vunpack.c.h.s8.bf16 %v1341_v62  ;;  %v1350_v62 = vld [vmem:[%s6822_s25 + $0x298] sm:$0xff] }
 0x2c9   : > { %5023 = vmatpush3.bf16.msra.mxu0 %v1562_v4  ;;  %v1338_v4 = vld [vmem:[%s6822_s25 + $0x238] sm:$0xff] }
 0x2ca   : > { %5045 = vmatpush3.bf16.msra.mxu1 %v1578_v5  ;;  %5024 = vmatprep.subr.bf16.mxu0 %v1571_v6  ;;  %v1346_v5 = vld [vmem:[%s6822_s25 + $0x278] sm:$0xff]  ;;  %v1596_v6 = vunpack.c.h.s8.bf16 %v1333_v60  ;;  %v1606_v14 = vunpack.c.h.s8.bf16 %v1338_v4 }
 0x2cb   : > { %5046 = vmatprep.subr.bf16.mxu1 %v1587_v8  ;;  %v1605_v8 = vunpack.c.l.s8.bf16 %v1338_v4  ;;  %v1622_v15 = vunpack.c.h.s8.bf16 %v1346_v5 }
 0x2cd   : > { %5025 = vmatpush3.bf16.msra.mxu0 %v1563_v10  ;;  %v1621_v10 = vunpack.c.l.s8.bf16 %v1346_v5 }
 0x2ce   : > { %5047 = vmatpush3.bf16.msra.mxu1 %v1579_v11  ;;  %5026 = vmatprep.subr.bf16.mxu0 %v1572_v12  ;;  %v1342_v11 = vld [vmem:[%s6822_s25 + $0x258] sm:$0xff]  ;;  %v1597_v12 = vunpack.c.l.s8.bf16 %v1334_v9 }
 0x2cf   : > { %5048 = vmatprep.subr.bf16.mxu1 %v1588_v13  ;;  %v1613_v13 = vunpack.c.l.s8.bf16 %v1342_v11  ;;  %v1614_v19 = vunpack.c.h.s8.bf16 %v1342_v11  ;;  %v1363_v11 = vld [vmem:[%s6822_s25 + $0x300] sm:$0xff] }
 0x2d1   : > { %5027 = vmatpush3.bf16.msra.mxu0 %v1564_v16  ;;  %v1351_v16 = vld [vmem:[%s6822_s25 + $0x2a0] sm:$0xff] }
 0x2d2   : > { %5049 = vmatpush3.bf16.msra.mxu1 %v1580_v17  ;;  %5028 = vmatprep.subr.bf16.mxu0 %v1573_v18  ;;  %v1359_v17 = vld [vmem:[%s6822_s25 + $0x2e0] sm:$0xff]  ;;  %v1598_v18 = vunpack.c.h.s8.bf16 %v1334_v9 }
 0x2d3   : > { %5050 = vmatprep.subr.bf16.mxu1 %v1589_v20  ;;  %v1631_v20 = vunpack.c.l.s8.bf16 %v1351_v16  ;;  %v1648_v30 = vunpack.c.h.s8.bf16 %v1359_v17 }
 0x2d5   : > { %5029 = vmatpush3.bf16.msra.mxu0 %v1565_v22  ;;  %v1647_v22 = vunpack.c.l.s8.bf16 %v1359_v17  ;;  %v7054_v17 = vld [vmem:[%s6815_s20 + $0x68] sm:$0xff] }
 0x2d6   : > { %5051 = vmatpush3.bf16.msra.mxu1 %v1581_v23  ;;  %5030 = vmatprep.subr.bf16.mxu0 %v1574_v24  ;;  %v1355_v23 = vld [vmem:[%s6822_s25 + $0x2c0] sm:$0xff]  ;;  %v4738_v24 = vcombine.low %v6991_v35, %v6991_v35  ;;  %v1624_v35 = vunpack.c.h.s8.bf16 %v1347_v21 }
 0x2d7   : > { %5052 = vmatprep.subr.bf16.mxu1 %v1590_v25  ;;  %v4740_v25 = vcombine.low %v6994_v36, %v6994_v36  ;;  %v1640_v36 = vunpack.c.h.s8.bf16 %v1355_v23 }
 0x2d9   : > { %5031 = vmatpush3.bf16.msra.mxu0 %v1566_v27  ;;  %v1623_v27 = vunpack.c.l.s8.bf16 %v1347_v21 }
 0x2da   : > { %5053 = vmatpush3.bf16.msra.mxu1 %v1582_v28  ;;  %5060 = vmatprep.subr.bf16.mxu0 %v1599_v29  ;;  %v1639_v28 = vunpack.c.l.s8.bf16 %v1355_v23  ;;  %v1632_v29 = vunpack.c.h.s8.bf16 %v1351_v16  ;;  %v7051_v16 = vld [vmem:[%s6815_s20 + $0x60] sm:$0xff]  ;;  %v1376_v23 = vld [vmem:[%s6822_s25 + $0x368] sm:$0xff] }
 0x2db   : > { %5082 = vmatprep.subr.bf16.mxu1 %v1615_v31  ;;  %v1352_v31 = vld [vmem:[%s6822_s25 + $0x2a8] sm:$0xff] }
 0x2dc   : > { %2300 = vmatmul.mubr.bf16.vlgmr.msra.gmra.mrb[12].mxu0 %v4734_v33  ;;  %v4743_v33 = vcombine.high %v7021_v3, %v7021_v3 }
 0x2dd   : > { %2340 = vmatmul.mubr.bf16.vlgmr.msra.gmra.mrb[12].mxu1 %v4736_v34  ;;  %5061 = vmatpush3.bf16.msra.mxu0 %v1591_v37  ;;  %v4745_v34 = vcombine.high %v7024_v26, %v7024_v26  ;;  %v1633_v37 = vunpack.c.l.s8.bf16 %v1352_v31 }
 0x2de   : > { %5083 = vmatpush3.bf16.msra.mxu1 %v1607_v38  ;;  %5062 = vmatprep.subr.bf16.mxu0 %v1600_v39  ;;  %v1348_v38 = vld [vmem:[%s6822_s25 + $0x288] sm:$0xff]  ;;  %v1649_v39 = vunpack.c.l.s8.bf16 %v1360_v32 }
 0x2df   : > { %5084 = vmatprep.subr.bf16.mxu1 %v1616_v40  ;;  %2379 = vmatprep.mubr.bf16.mxu0 %v4739_v43  ;;  %v1356_v40 = vld [vmem:[%s6822_s25 + $0x2c8] sm:$0xff]  ;;  %v1625_v41 = vunpack.c.l.s8.bf16 %v1348_v38  ;;  %v1634_v43 = vunpack.c.h.s8.bf16 %v1352_v31 }
 0x2e0   : > { %2419 = vmatprep.mubr.bf16.mxu1 %v4741_v44  ;;  %v1641_v42 = vunpack.c.l.s8.bf16 %v1356_v40  ;;  %v1650_v44 = vunpack.c.h.s8.bf16 %v1360_v32  ;;  %v1642_v48 = vunpack.c.h.s8.bf16 %v1356_v40  ;;  %v1365_v40 = vld [vmem:[%s6822_s25 + $0x310] sm:$0xff] }
 0x2e1   : > { %5063 = vmatpush3.bf16.msra.mxu0 %v1592_v45  ;;  %v1353_v45 = vld [vmem:[%s6822_s25 + $0x2b0] sm:$0xff] }
 0x2e2   : > { %5085 = vmatpush3.bf16.msra.mxu1 %v1608_v46  ;;  %5064 = vmatprep.subr.bf16.mxu0 %v1601_v47  ;;  %v1361_v46 = vld [vmem:[%s6822_s25 + $0x2f0] sm:$0xff]  ;;  %v1626_v47 = vunpack.c.h.s8.bf16 %v1348_v38  ;;  %v1636_v55 = vunpack.c.h.s8.bf16 %v1353_v45 }
 0x2e3   : > { %5086 = vmatprep.subr.bf16.mxu1 %v1617_v49  ;;  %v1635_v49 = vunpack.c.l.s8.bf16 %v1353_v45  ;;  %v1652_v56 = vunpack.c.h.s8.bf16 %v1361_v46 }
 0x2e5   : > { %5065 = vmatpush3.bf16.msra.mxu0 %v1593_v51  ;;  %v1651_v51 = vunpack.c.l.s8.bf16 %v1361_v46 }
 0x2e6   : > { %5087 = vmatpush3.bf16.msra.mxu1 %v1609_v52  ;;  %5066 = vmatprep.subr.bf16.mxu0 %v1602_v53  ;;  %v1357_v52 = vld [vmem:[%s6822_s25 + $0x2d0] sm:$0xff]  ;;  %v1627_v53 = vunpack.c.l.s8.bf16 %v1349_v50 }
 0x2e7   : > { %5088 = vmatprep.subr.bf16.mxu1 %v1618_v54  ;;  %v1643_v54 = vunpack.c.l.s8.bf16 %v1357_v52  ;;  %v1644_v60 = vunpack.c.h.s8.bf16 %v1357_v52  ;;  %v1366_v52 = vld [vmem:[%s6822_s25 + $0x318] sm:$0xff] }
 0x2e9   : > { %5067 = vmatpush3.bf16.msra.mxu0 %v1594_v57  ;;  %v1354_v57 = vld [vmem:[%s6822_s25 + $0x2b8] sm:$0xff] }
 0x2ea   : > { %5089 = vmatpush3.bf16.msra.mxu1 %v1610_v58  ;;  %5068 = vmatprep.subr.bf16.mxu0 %v1603_v59  ;;  %v1362_v58 = vld [vmem:[%s6822_s25 + $0x2f8] sm:$0xff]  ;;  %v1628_v59 = vunpack.c.h.s8.bf16 %v1349_v50  ;;  %v1638_v4 = vunpack.c.h.s8.bf16 %v1354_v57 }
 0x2eb   : > { %5090 = vmatprep.subr.bf16.mxu1 %v1619_v61  ;;  %v1637_v61 = vunpack.c.l.s8.bf16 %v1354_v57  ;;  %v1654_v5 = vunpack.c.h.s8.bf16 %v1362_v58 }
 0x2ed   : > { %5069 = vmatpush3.bf16.msra.mxu0 %v1595_v63  ;;  %v1653_v63 = vunpack.c.l.s8.bf16 %v1362_v58 }
 0x2ee   : > { %5091 = vmatpush3.bf16.msra.mxu1 %v1611_v0  ;;  %5070 = vmatprep.subr.bf16.mxu0 %v1604_v1  ;;  %v1358_v0 = vld [vmem:[%s6822_s25 + $0x2d8] sm:$0xff]  ;;  %v1629_v1 = vunpack.c.l.s8.bf16 %v1350_v62 }
 0x2ef   : > { %5092 = vmatprep.subr.bf16.mxu1 %v1620_v2  ;;  %v1645_v2 = vunpack.c.l.s8.bf16 %v1358_v0  ;;  %v1646_v9 = vunpack.c.h.s8.bf16 %v1358_v0  ;;  %v1379_v0 = vld [vmem:[%s6822_s25 + $0x380] sm:$0xff] }
 0x2f1   : > { %5071 = vmatpush3.bf16.msra.mxu0 %v1596_v6  ;;  %v1367_v6 = vld [vmem:[%s6822_s25 + $0x320] sm:$0xff] }
 0x2f2   : > { %5093 = vmatpush3.bf16.msra.mxu1 %v1612_v7  ;;  %5072 = vmatprep.subr.bf16.mxu0 %v1605_v8  ;;  %v1375_v7 = vld [vmem:[%s6822_s25 + $0x360] sm:$0xff]  ;;  %v1630_v8 = vunpack.c.h.s8.bf16 %v1350_v62 }
 0x2f3   : > { %5094 = vmatprep.subr.bf16.mxu1 %v1621_v10  ;;  %v1663_v10 = vunpack.c.l.s8.bf16 %v1367_v6  ;;  %v1680_v21 = vunpack.c.h.s8.bf16 %v1375_v7 }
 0x2f5   : > { %5073 = vmatpush3.bf16.msra.mxu0 %v1597_v12  ;;  %v1679_v12 = vunpack.c.l.s8.bf16 %v1375_v7  ;;  %v7084_v7 = vld [vmem:[%s6815_s20 + $0x78] sm:$0xff] }
 0x2f6   : > { %5095 = vmatpush3.bf16.msra.mxu1 %v1613_v13  ;;  %5074 = vmatprep.subr.bf16.mxu0 %v1606_v14  ;;  %v1371_v13 = vld [vmem:[%s6822_s25 + $0x340] sm:$0xff]  ;;  %v4742_v14 = vcombine.low %v7021_v3, %v7021_v3  ;;  %v1656_v3 = vunpack.c.h.s8.bf16 %v1363_v11 }
 0x2f7   : > { %5096 = vmatprep.subr.bf16.mxu1 %v1622_v15  ;;  %v4744_v15 = vcombine.low %v7024_v26, %v7024_v26  ;;  %v1672_v26 = vunpack.c.h.s8.bf16 %v1371_v13 }
 0x2f9   : > { %5075 = vmatpush3.bf16.msra.mxu0 %v1598_v18  ;;  %v1655_v18 = vunpack.c.l.s8.bf16 %v1363_v11 }
 0x2fa   : > { %5097 = vmatpush3.bf16.msra.mxu1 %v1614_v19  ;;  %5104 = vmatprep.subr.bf16.mxu0 %v1631_v20  ;;  %v1671_v19 = vunpack.c.l.s8.bf16 %v1371_v13  ;;  %v1664_v20 = vunpack.c.h.s8.bf16 %v1367_v6  ;;  %v7081_v6 = vld [vmem:[%s6815_s20 + $0x70] sm:$0xff] }
 0x2fb   : > { %5126 = vmatprep.subr.bf16.mxu1 %v1647_v22  ;;  %v1368_v22 = vld [vmem:[%s6822_s25 + $0x328] sm:$0xff] }
 0x2fc   : > { %2380 = vmatmul.mubr.bf16.vlgmr.msra.gmra.mrb[16].mxu0 %v4738_v24  ;;  %v4747_v24 = vcombine.high %v7051_v16, %v7051_v16  ;;  %v1392_v13 = vld [vmem:[%s6822_s25 + $0x3e8] sm:$0xff] }
 0x2fd   : > { %2420 = vmatmul.mubr.bf16.vlgmr.msra.gmra.mrb[16].mxu1 %v4740_v25  ;;  %5105 = vmatpush3.bf16.msra.mxu0 %v1623_v27  ;;  %v4749_v25 = vcombine.high %v7054_v17, %v7054_v17  ;;  %v1665_v27 = vunpack.c.l.s8.bf16 %v1368_v22 }
 0x2fe   : > { %5127 = vmatpush3.bf16.msra.mxu1 %v1639_v28  ;;  %5106 = vmatprep.subr.bf16.mxu0 %v1632_v29  ;;  %v1364_v28 = vld [vmem:[%s6822_s25 + $0x308] sm:$0xff]  ;;  %v1681_v29 = vunpack.c.l.s8.bf16 %v1376_v23 }
 0x2ff   : > { %5128 = vmatprep.subr.bf16.mxu1 %v1648_v30  ;;  %2459 = vmatprep.mubr.bf16.mxu0 %v4743_v33  ;;  %v1372_v30 = vld [vmem:[%s6822_s25 + $0x348] sm:$0xff]  ;;  %v1657_v31 = vunpack.c.l.s8.bf16 %v1364_v28  ;;  %v1666_v33 = vunpack.c.h.s8.bf16 %v1368_v22 }
 0x300   : > { %2499 = vmatprep.mubr.bf16.mxu1 %v4745_v34  ;;  %v1673_v32 = vunpack.c.l.s8.bf16 %v1372_v30  ;;  %v1682_v34 = vunpack.c.h.s8.bf16 %v1376_v23  ;;  %v1674_v38 = vunpack.c.h.s8.bf16 %v1372_v30  ;;  %v1381_v30 = vld [vmem:[%s6822_s25 + $0x390] sm:$0xff] }
 0x301   : > { %5107 = vmatpush3.bf16.msra.mxu0 %v1624_v35  ;;  %v1369_v35 = vld [vmem:[%s6822_s25 + $0x330] sm:$0xff] }
 0x302   : > { %5129 = vmatpush3.bf16.msra.mxu1 %v1640_v36  ;;  %5108 = vmatprep.subr.bf16.mxu0 %v1633_v37  ;;  %v1377_v36 = vld [vmem:[%s6822_s25 + $0x370] sm:$0xff]  ;;  %v1658_v37 = vunpack.c.h.s8.bf16 %v1364_v28  ;;  %v1668_v45 = vunpack.c.h.s8.bf16 %v1369_v35 }
 0x303   : > { %5130 = vmatprep.subr.bf16.mxu1 %v1649_v39  ;;  %v1667_v39 = vunpack.c.l.s8.bf16 %v1369_v35  ;;  %v1684_v46 = vunpack.c.h.s8.bf16 %v1377_v36 }
 0x305   : > { %5109 = vmatpush3.bf16.msra.mxu0 %v1625_v41  ;;  %v1683_v41 = vunpack.c.l.s8.bf16 %v1377_v36 }
 0x306   : > { %5131 = vmatpush3.bf16.msra.mxu1 %v1641_v42  ;;  %5110 = vmatprep.subr.bf16.mxu0 %v1634_v43  ;;  %v1373_v42 = vld [vmem:[%s6822_s25 + $0x350] sm:$0xff]  ;;  %v1659_v43 = vunpack.c.l.s8.bf16 %v1365_v40 }
 0x307   : > { %5132 = vmatprep.subr.bf16.mxu1 %v1650_v44  ;;  %v1675_v44 = vunpack.c.l.s8.bf16 %v1373_v42  ;;  %v1676_v50 = vunpack.c.h.s8.bf16 %v1373_v42  ;;  %v1382_v42 = vld [vmem:[%s6822_s25 + $0x398] sm:$0xff] }
 0x309   : > { %5111 = vmatpush3.bf16.msra.mxu0 %v1626_v47  ;;  %v1370_v47 = vld [vmem:[%s6822_s25 + $0x338] sm:$0xff] }
 0x30a   : > { %5133 = vmatpush3.bf16.msra.mxu1 %v1642_v48  ;;  %5112 = vmatprep.subr.bf16.mxu0 %v1635_v49  ;;  %v1378_v48 = vld [vmem:[%s6822_s25 + $0x378] sm:$0xff]  ;;  %v1660_v49 = vunpack.c.h.s8.bf16 %v1365_v40  ;;  %v1670_v57 = vunpack.c.h.s8.bf16 %v1370_v47 }
 0x30b   : > { %5134 = vmatprep.subr.bf16.mxu1 %v1651_v51  ;;  %v1669_v51 = vunpack.c.l.s8.bf16 %v1370_v47  ;;  %v1686_v58 = vunpack.c.h.s8.bf16 %v1378_v48 }
 0x30d   : > { %5113 = vmatpush3.bf16.msra.mxu0 %v1627_v53  ;;  %v1685_v53 = vunpack.c.l.s8.bf16 %v1378_v48 }
 0x30e   : > { %5135 = vmatpush3.bf16.msra.mxu1 %v1643_v54  ;;  %5114 = vmatprep.subr.bf16.mxu0 %v1636_v55  ;;  %v1374_v54 = vld [vmem:[%s6822_s25 + $0x358] sm:$0xff]  ;;  %v1661_v55 = vunpack.c.l.s8.bf16 %v1366_v52 }
 0x30f   : > { %5136 = vmatprep.subr.bf16.mxu1 %v1652_v56  ;;  %v1677_v56 = vunpack.c.l.s8.bf16 %v1374_v54  ;;  %v1678_v62 = vunpack.c.h.s8.bf16 %v1374_v54 }
 0x311   : > { %5115 = vmatpush3.bf16.msra.mxu0 %v1628_v59  ;;  %v1383_v59 = vld [vmem:[%s6822_s25 + $0x3a0] sm:$0xff] }
 0x312   : > { %5137 = vmatpush3.bf16.msra.mxu1 %v1644_v60  ;;  %5116 = vmatprep.subr.bf16.mxu0 %v1637_v61  ;;  %v1391_v60 = vld [vmem:[%s6822_s25 + $0x3e0] sm:$0xff]  ;;  %v1662_v61 = vunpack.c.h.s8.bf16 %v1366_v52  ;;  %v1693_v52 = vunpack.c.l.s8.bf16 %v1382_v42 }
 0x313   : > { %5138 = vmatprep.subr.bf16.mxu1 %v1653_v63  ;;  %v1695_v63 = vunpack.c.l.s8.bf16 %v1383_v59  ;;  %v1712_v11 = vunpack.c.h.s8.bf16 %v1391_v60 }
 0x315   : > { %5117 = vmatpush3.bf16.msra.mxu0 %v1629_v1  ;;  %v1711_v1 = vunpack.c.l.s8.bf16 %v1391_v60  ;;  %v1399_v60 = vld [vmem:[%s6822_s25 + $0x420] sm:$0xff] }
 0x316   : > { %5139 = vmatpush3.bf16.msra.mxu1 %v1645_v2  ;;  %5118 = vmatprep.subr.bf16.mxu0 %v1638_v4  ;;  %v1387_v2 = vld [vmem:[%s6822_s25 + $0x3c0] sm:$0xff]  ;;  %v4746_v4 = vcombine.low %v7051_v16, %v7051_v16  ;;  %v1688_v16 = vunpack.c.h.s8.bf16 %v1379_v0 }
 0x317   : > { %5140 = vmatprep.subr.bf16.mxu1 %v1654_v5  ;;  %v4748_v5 = vcombine.low %v7054_v17, %v7054_v17  ;;  %v1704_v17 = vunpack.c.h.s8.bf16 %v1387_v2 }
 0x319   : > { %5119 = vmatpush3.bf16.msra.mxu0 %v1630_v8  ;;  %v1687_v8 = vunpack.c.l.s8.bf16 %v1379_v0  ;;  %v1727_v0 = vunpack.c.l.s8.bf16 %v1399_v60 }
 0x31a   : > { %5141 = vmatpush3.bf16.msra.mxu1 %v1646_v9  ;;  %5148 = vmatprep.subr.bf16.mxu0 %v1663_v10  ;;  %v1703_v9 = vunpack.c.l.s8.bf16 %v1387_v2  ;;  %v1696_v10 = vunpack.c.h.s8.bf16 %v1383_v59 }
 0x31b   : > { %5170 = vmatprep.subr.bf16.mxu1 %v1679_v12  ;;  %v1384_v12 = vld [vmem:[%s6822_s25 + $0x3a8] sm:$0xff] }
 0x31c   : > { %2460 = vmatmul.mubr.bf16.vlgmr.msra.gmra.mrb[20].mxu0 %v4742_v14  ;;  %v4751_v14 = vcombine.high %v7081_v6, %v7081_v6 }
 0x31d   : > { %2500 = vmatmul.mubr.bf16.vlgmr.msra.gmra.mrb[20].mxu1 %v4744_v15  ;;  %5149 = vmatpush3.bf16.msra.mxu0 %v1655_v18  ;;  %v4753_v15 = vcombine.high %v7084_v7, %v7084_v7  ;;  %v1697_v18 = vunpack.c.l.s8.bf16 %v1384_v12 }
 0x31e   : > { %5171 = vmatpush3.bf16.msra.mxu1 %v1671_v19  ;;  %5150 = vmatprep.subr.bf16.mxu0 %v1664_v20  ;;  %v1380_v19 = vld [vmem:[%s6822_s25 + $0x388] sm:$0xff]  ;;  %v1713_v20 = vunpack.c.l.s8.bf16 %v1392_v13 }
 0x31f   : > { %5172 = vmatprep.subr.bf16.mxu1 %v1680_v21  ;;  %2539 = vmatprep.mubr.bf16.mxu0 %v4747_v24  ;;  %v1388_v21 = vld [vmem:[%s6822_s25 + $0x3c8] sm:$0xff]  ;;  %v1689_v22 = vunpack.c.l.s8.bf16 %v1380_v19  ;;  %v1698_v24 = vunpack.c.h.s8.bf16 %v1384_v12 }
 0x320   : > { %2579 = vmatprep.mubr.bf16.mxu1 %v4749_v25  ;;  %v1705_v23 = vunpack.c.l.s8.bf16 %v1388_v21  ;;  %v1714_v25 = vunpack.c.h.s8.bf16 %v1392_v13  ;;  %v1706_v28 = vunpack.c.h.s8.bf16 %v1388_v21  ;;  %v1728_v13 = vunpack.c.h.s8.bf16 %v1399_v60 }
 0x321   : > { %5151 = vmatpush3.bf16.msra.mxu0 %v1656_v3  ;;  %v1385_v3 = vld [vmem:[%s6822_s25 + $0x3b0] sm:$0xff] }
 0x322   : > { %5173 = vmatpush3.bf16.msra.mxu1 %v1672_v26  ;;  %5152 = vmatprep.subr.bf16.mxu0 %v1665_v27  ;;  %v1393_v26 = vld [vmem:[%s6822_s25 + $0x3f0] sm:$0xff]  ;;  %v1690_v27 = vunpack.c.h.s8.bf16 %v1380_v19  ;;  %v1700_v35 = vunpack.c.h.s8.bf16 %v1385_v3 }
 0x323   : > { %5174 = vmatprep.subr.bf16.mxu1 %v1681_v29  ;;  %v1699_v29 = vunpack.c.l.s8.bf16 %v1385_v3  ;;  %v1716_v36 = vunpack.c.h.s8.bf16 %v1393_v26 }
 0x325   : > { %5153 = vmatpush3.bf16.msra.mxu0 %v1657_v31  ;;  %v1715_v31 = vunpack.c.l.s8.bf16 %v1393_v26  ;;  %v1401_v26 = vld [vmem:[%s6822_s25 + $0x430] sm:$0xff] }
 0x326   : > { %5175 = vmatpush3.bf16.msra.mxu1 %v1673_v32  ;;  %5154 = vmatprep.subr.bf16.mxu0 %v1666_v33  ;;  %v1389_v32 = vld [vmem:[%s6822_s25 + $0x3d0] sm:$0xff]  ;;  %v1691_v33 = vunpack.c.l.s8.bf16 %v1381_v30 }
 0x327   : > { %5176 = vmatprep.subr.bf16.mxu1 %v1682_v34  ;;  %v1707_v34 = vunpack.c.l.s8.bf16 %v1389_v32  ;;  %v1708_v40 = vunpack.c.h.s8.bf16 %v1389_v32 }
 0x329   : > { %5155 = vmatpush3.bf16.msra.mxu0 %v1658_v37  ;;  %v1386_v37 = vld [vmem:[%s6822_s25 + $0x3b8] sm:$0xff] }
 0x32a   : > { %5177 = vmatpush3.bf16.msra.mxu1 %v1674_v38  ;;  %5156 = vmatprep.subr.bf16.mxu0 %v1667_v39  ;;  %v1394_v38 = vld [vmem:[%s6822_s25 + $0x3f8] sm:$0xff]  ;;  %v1692_v39 = vunpack.c.h.s8.bf16 %v1381_v30  ;;  %v1731_v30 = vunpack.c.l.s8.bf16 %v1401_v26 }
 0x32b   : > { %5178 = vmatprep.subr.bf16.mxu1 %v1683_v41  ;;  %v1701_v41 = vunpack.c.l.s8.bf16 %v1386_v37 }
 0x32d   : > { %5157 = vmatpush3.bf16.msra.mxu0 %v1659_v43  ;;  %v1717_v43 = vunpack.c.l.s8.bf16 %v1394_v38 }
 0x32e   : > { %5179 = vmatpush3.bf16.msra.mxu1 %v1675_v44  ;;  %5158 = vmatprep.subr.bf16.mxu0 %v1668_v45  ;;  %v1390_v44 = vld [vmem:[%s6822_s25 + $0x3d8] sm:$0xff] }
 0x32f   : > { %5180 = vmatprep.subr.bf16.mxu1 %v1684_v46 }
 0x331   : > { %5159 = vmatpush3.bf16.msra.mxu0 %v1660_v49 }
 0x332   : > { %5181 = vmatpush3.bf16.msra.mxu1 %v1676_v50  ;;  %5160 = vmatprep.subr.bf16.mxu0 %v1669_v51 }
 0x333   : > { %5182 = vmatprep.subr.bf16.mxu1 %v1685_v53  ;;  %v1709_v53 = vunpack.c.l.s8.bf16 %v1390_v44 }
 0x335   : > { %5161 = vmatpush3.bf16.msra.mxu0 %v1661_v55 }
 0x336   : > { %5183 = vmatpush3.bf16.msra.mxu1 %v1677_v56  ;;  %5162 = vmatprep.subr.bf16.mxu0 %v1670_v57  ;;  %v1702_v56 = vunpack.c.h.s8.bf16 %v1386_v37  ;;  %v1718_v57 = vunpack.c.h.s8.bf16 %v1394_v38  ;;  %v1402_v38 = vld [vmem:[%s6822_s25 + $0x438] sm:$0xff] }
 0x337   : > { %5184 = vmatprep.subr.bf16.mxu1 %v1686_v58 }
 0x339   : > { %5163 = vmatpush3.bf16.msra.mxu0 %v1662_v61  ;;  %v1407_v61 = vld [vmem:[%s6822_s25 + $0x460] sm:$0xff] }
 0x33a   : > { %5185 = vmatpush3.bf16.msra.mxu1 %v1678_v62  ;;  %5192 = vmatprep.subr.bf16.mxu0 %v1695_v63  ;;  %v1694_v62 = vunpack.c.h.s8.bf16 %v1382_v42  ;;  %v1710_v63 = vunpack.c.h.s8.bf16 %v1390_v44  ;;  %v1743_v2 = vunpack.c.l.s8.bf16 %v1407_v61  ;;  %v1733_v42 = vunpack.c.l.s8.bf16 %v1402_v38 }
 0x33b   : > { %5214 = vmatprep.subr.bf16.mxu1 %v1711_v1  ;;  %v1395_v1 = vld [vmem:[%s6822_s25 + $0x400] sm:$0xff] }
 0x33c   : > { %2540 = vmatmul.mubr.bf16.vlgmr.msra.gmra.mrb[24].mxu0 %v4746_v4  ;;  %v1403_v4 = vld [vmem:[%s6822_s25 + $0x440] sm:$0xff] }
 0x33d   : > { %2580 = vmatmul.mubr.bf16.vlgmr.msra.gmra.mrb[24].mxu1 %v4748_v5  ;;  %5193 = vmatpush3.bf16.msra.mxu0 %v1687_v8  ;;  %v4750_v5 = vcombine.low %v7081_v6, %v7081_v6  ;;  %v4752_v8 = vcombine.low %v7084_v7, %v7084_v7  ;;  %v1735_v12 = vunpack.c.l.s8.bf16 %v1403_v4 }
 0x33e   : > { %5215 = vmatpush3.bf16.msra.mxu1 %v1703_v9  ;;  %5194 = vmatprep.subr.bf16.mxu0 %v1696_v10  ;;  %v7113_v9 = vld [vmem:[%s6815_s20 + $0x80] sm:$0xff]  ;;  %v7116_v10 = vld [vmem:[%s6815_s20 + $0x88] sm:$0xff] }
 0x33f   : > { %5216 = vmatprep.subr.bf16.mxu1 %v1712_v11  ;;  %2619 = vmatprep.mubr.bf16.mxu0 %v4751_v14  ;;  %v1719_v11 = vunpack.c.l.s8.bf16 %v1395_v1  ;;  %v1744_v14 = vunpack.c.h.s8.bf16 %v1407_v61  ;;  %v4755_v6 = vcombine.high %v7113_v9, %v7113_v9  ;;  %v4757_v7 = vcombine.high %v7116_v10, %v7116_v10 }
 0x340   : > { %2659 = vmatprep.mubr.bf16.mxu1 %v4753_v15  ;;  %v1400_v15 = vld [vmem:[%s6822_s25 + $0x428] sm:$0xff] }
 0x341   : > { %5195 = vmatpush3.bf16.msra.mxu0 %v1688_v16  ;;  %v1408_v16 = vld [vmem:[%s6822_s25 + $0x468] sm:$0xff]  ;;  %v1729_v19 = vunpack.c.l.s8.bf16 %v1400_v15 }
 0x342   : > { %5217 = vmatpush3.bf16.msra.mxu1 %v1704_v17  ;;  %5196 = vmatprep.subr.bf16.mxu0 %v1697_v18  ;;  %v1720_v17 = vunpack.c.h.s8.bf16 %v1395_v1  ;;  %v1736_v18 = vunpack.c.h.s8.bf16 %v1403_v4  ;;  %v1745_v21 = vunpack.c.l.s8.bf16 %v1408_v16  ;;  %v1746_v3 = vunpack.c.h.s8.bf16 %v1408_v16 }
 0x343   : > { %5218 = vmatprep.subr.bf16.mxu1 %v1713_v20  ;;  %v1396_v20 = vld [vmem:[%s6822_s25 + $0x408] sm:$0xff] }
 0x345   : > { %5197 = vmatpush3.bf16.msra.mxu0 %v1689_v22  ;;  %v1404_v22 = vld [vmem:[%s6822_s25 + $0x448] sm:$0xff] }
 0x346   : > { %5219 = vmatpush3.bf16.msra.mxu1 %v1705_v23  ;;  %5198 = vmatprep.subr.bf16.mxu0 %v1698_v24  ;;  %v1721_v23 = vunpack.c.l.s8.bf16 %v1396_v20  ;;  %v1737_v24 = vunpack.c.l.s8.bf16 %v1404_v22 }
 0x347   : > { %5220 = vmatprep.subr.bf16.mxu1 %v1714_v25  ;;  %v1730_v25 = vunpack.c.h.s8.bf16 %v1400_v15 }
 0x349   : > { %5199 = vmatpush3.bf16.msra.mxu0 %v1690_v27  ;;  %v1409_v27 = vld [vmem:[%s6822_s25 + $0x470] sm:$0xff] }
 0x34a   : > { %5221 = vmatpush3.bf16.msra.mxu1 %v1706_v28  ;;  %5200 = vmatprep.subr.bf16.mxu0 %v1699_v29  ;;  %v1722_v28 = vunpack.c.h.s8.bf16 %v1396_v20  ;;  %v1738_v29 = vunpack.c.h.s8.bf16 %v1404_v22  ;;  %v1747_v32 = vunpack.c.l.s8.bf16 %v1409_v27  ;;  %v1748_v37 = vunpack.c.h.s8.bf16 %v1409_v27  ;;  %v1412_v22 = vld [vmem:[%s6822_s25 + $0x488] sm:$0xff] }
 0x34b   : > { %5222 = vmatprep.subr.bf16.mxu1 %v1715_v31  ;;  %v1397_v31 = vld [vmem:[%s6822_s25 + $0x410] sm:$0xff] }
 0x34d   : > { %5201 = vmatpush3.bf16.msra.mxu0 %v1691_v33  ;;  %v1405_v33 = vld [vmem:[%s6822_s25 + $0x450] sm:$0xff] }
 0x34e   : > { %5223 = vmatpush3.bf16.msra.mxu1 %v1707_v34  ;;  %5202 = vmatprep.subr.bf16.mxu0 %v1700_v35  ;;  %v1723_v34 = vunpack.c.l.s8.bf16 %v1397_v31  ;;  %v1739_v35 = vunpack.c.l.s8.bf16 %v1405_v33 }
 0x34f   : > { %5224 = vmatprep.subr.bf16.mxu1 %v1716_v36  ;;  %v4900_v45 = vpop.f32.mrb[0].mxu0  ;;  %v1732_v36 = vunpack.c.h.s8.bf16 %v1401_v26 }
 0x350   : > { %v4922_v46 = vpop.f32.mrb[0].mxu1  ;;  %v4901_v47 = vpop.f32.mrb[1].mxu0 }
 0x351   : > { %v4923_v48 = vpop.f32.mrb[1].mxu1  ;;  %v4902_v49 = vadd.f32 %v4901_v47, %v4900_v45  ;;  %v4903_v51 = vpop.f32.mrb[2].mxu0  ;;  %5203 = vmatpush3.bf16.msra.mxu0 %v1692_v39  ;;  %v1410_v39 = vld [vmem:[%s6822_s25 + $0x478] sm:$0xff] }
 0x352   : > { %v4924_v50 = vadd.f32 %v4923_v48, %v4922_v46  ;;  %5225 = vmatpush3.bf16.msra.mxu1 %v1708_v40  ;;  %v4925_v54 = vpop.f32.mrb[2].mxu1  ;;  %v4904_v55 = vpop.f32.mrb[3].mxu0  ;;  %5204 = vmatprep.subr.bf16.mxu0 %v1701_v41  ;;  %v1724_v40 = vunpack.c.h.s8.bf16 %v1397_v31  ;;  %v1740_v41 = vunpack.c.h.s8.bf16 %v1405_v33  ;;  %v1749_v44 = vunpack.c.l.s8.bf16 %v1410_v39  ;;  %v1406_v45 = vld [vmem:[%s6822_s25 + $0x458] sm:$0xff]  ;;  %v1413_v33 = vld [vmem:[%s6822_s25 + $0x490] sm:$0xff] }
 0x353   : > { %5226 = vmatprep.subr.bf16.mxu1 %v1717_v43  ;;  %v4926_v58 = vpop.f32.mrb[3].mxu1  ;;  %v1398_v43 = vld [vmem:[%s6822_s25 + $0x418] sm:$0xff]  ;;  %v1741_v54 = vunpack.c.l.s8.bf16 %v1406_v45 }
 0x354   : > { %v7102_v59 = vadd.f32 %v4924_v50, %v4902_v49  ;;  %v1750_v58 = vunpack.c.h.s8.bf16 %v1410_v39  ;;  %v1726_v1 = vunpack.c.h.s8.bf16 %v1398_v43 }
 0x355   : > { %5205 = vmatpush3.bf16.msra.mxu0 %v1693_v52 }
 0x356   : > { %5227 = vmatpush3.bf16.msra.mxu1 %v1709_v53  ;;  %5206 = vmatprep.subr.bf16.mxu0 %v1702_v56  ;;  %v1725_v53 = vunpack.c.l.s8.bf16 %v1398_v43 }
 0x357   : > { %5228 = vmatprep.subr.bf16.mxu1 %v1718_v57  ;;  %v1734_v57 = vunpack.c.h.s8.bf16 %v1402_v38 }
 0x359   : > { %5207 = vmatpush3.bf16.msra.mxu0 %v1694_v62  ;;  %v1415_v62 = vld [vmem:[%s6822_s25 + $0x4a0] sm:$0xff] }
 0x35a   : > { %5229 = vmatpush3.bf16.msra.mxu1 %v1710_v63  ;;  %5236 = vmatprep.subr.bf16.mxu0 %v1727_v0  ;;  %v1423_v63 = vld [vmem:[%s6822_s25 + $0x4e0] sm:$0xff]  ;;  %v1759_v4 = vunpack.c.l.s8.bf16 %v1415_v62 }
 0x35b   : > { %5258 = vmatprep.subr.bf16.mxu1 %v1743_v2  ;;  %v1742_v2 = vunpack.c.h.s8.bf16 %v1406_v45  ;;  %v1414_v45 = vld [vmem:[%s6822_s25 + $0x498] sm:$0xff] }
 0x35c   : > { %2620 = vmatmul.mubr.bf16.vlgmr.msra.gmra.mrb[28].mxu0 %v4750_v5  ;;  %v1411_v5 = vld [vmem:[%s6822_s25 + $0x480] sm:$0xff] }
 0x35d   : > { %2660 = vmatmul.mubr.bf16.vlgmr.msra.gmra.mrb[28].mxu1 %v4752_v8  ;;  %5237 = vmatpush3.bf16.msra.mxu0 %v1719_v11  ;;  %v1775_v8 = vunpack.c.l.s8.bf16 %v1423_v63  ;;  %v1419_v11 = vld [vmem:[%s6822_s25 + $0x4c0] sm:$0xff]  ;;  %v1751_v15 = vunpack.c.l.s8.bf16 %v1411_v5 }
 0x35e   : > { %5259 = vmatpush3.bf16.msra.mxu1 %v1735_v12  ;;  %5238 = vmatprep.subr.bf16.mxu0 %v1728_v13  ;;  %v4756_v12 = vcombine.low %v7116_v10, %v7116_v10  ;;  %v7146_v13 = vld [vmem:[%s6815_s20 + $0x90] sm:$0xff]  ;;  %v1767_v16 = vunpack.c.l.s8.bf16 %v1419_v11  ;;  %v1768_v20 = vunpack.c.h.s8.bf16 %v1419_v11 }
 0x35f   : > { %5260 = vmatprep.subr.bf16.mxu1 %v1744_v14  ;;  %2699 = vmatprep.mubr.bf16.mxu0 %v4755_v6  ;;  %v7149_v14 = vld [vmem:[%s6815_s20 + $0x98] sm:$0xff]  ;;  %v1760_v6 = vunpack.c.h.s8.bf16 %v1415_v62 }
 0x360   : > { %2739 = vmatprep.mubr.bf16.mxu1 %v4757_v7  ;;  %v1776_v7 = vunpack.c.h.s8.bf16 %v1423_v63  ;;  %v4761_v10 = vcombine.high %v7149_v14, %v7149_v14 }
 0x361   : > { %5239 = vmatpush3.bf16.msra.mxu0 %v1720_v17  ;;  %v1416_v17 = vld [vmem:[%s6822_s25 + $0x4a8] sm:$0xff] }
 0x362   : > { %5261 = vmatpush3.bf16.msra.mxu1 %v1736_v18  ;;  %5240 = vmatprep.subr.bf16.mxu0 %v1729_v19  ;;  %v1424_v18 = vld [vmem:[%s6822_s25 + $0x4e8] sm:$0xff]  ;;  %v1752_v19 = vunpack.c.h.s8.bf16 %v1411_v5  ;;  %v1762_v26 = vunpack.c.h.s8.bf16 %v1416_v17  ;;  %v1758_v5 = vunpack.c.h.s8.bf16 %v1414_v45 }
 0x363   : > { %5262 = vmatprep.subr.bf16.mxu1 %v1745_v21  ;;  %v1761_v21 = vunpack.c.l.s8.bf16 %v1416_v17  ;;  %v1778_v27 = vunpack.c.h.s8.bf16 %v1424_v18 }
 0x365   : > { %5241 = vmatpush3.bf16.msra.mxu0 %v1721_v23  ;;  %v1777_v23 = vunpack.c.l.s8.bf16 %v1424_v18 }
 0x366   : > { %5263 = vmatpush3.bf16.msra.mxu1 %v1737_v24  ;;  %5242 = vmatprep.subr.bf16.mxu0 %v1730_v25  ;;  %v1420_v24 = vld [vmem:[%s6822_s25 + $0x4c8] sm:$0xff]  ;;  %v1753_v25 = vunpack.c.l.s8.bf16 %v1412_v22 }
 0x367   : > { %5264 = vmatprep.subr.bf16.mxu1 %v1746_v3  ;;  %v1769_v3 = vunpack.c.l.s8.bf16 %v1420_v24  ;;  %v1770_v31 = vunpack.c.h.s8.bf16 %v1420_v24  ;;  %v1428_v24 = vld [vmem:[%s6822_s25 + $0x508] sm:$0xff] }
 0x369   : > { %5243 = vmatpush3.bf16.msra.mxu0 %v1722_v28  ;;  %v1417_v28 = vld [vmem:[%s6822_s25 + $0x4b0] sm:$0xff] }
 0x36a   : > { %5265 = vmatpush3.bf16.msra.mxu1 %v1738_v29  ;;  %5244 = vmatprep.subr.bf16.mxu0 %v1731_v30  ;;  %v1425_v29 = vld [vmem:[%s6822_s25 + $0x4f0] sm:$0xff]  ;;  %v1754_v30 = vunpack.c.h.s8.bf16 %v1412_v22  ;;  %v1764_v38 = vunpack.c.h.s8.bf16 %v1417_v28 }
 0x36b   : > { %5266 = vmatprep.subr.bf16.mxu1 %v1747_v32  ;;  %v1763_v32 = vunpack.c.l.s8.bf16 %v1417_v28  ;;  %v1780_v39 = vunpack.c.h.s8.bf16 %v1425_v29 }
 0x36d   : > { %5245 = vmatpush3.bf16.msra.mxu0 %v1723_v34  ;;  %v1779_v34 = vunpack.c.l.s8.bf16 %v1425_v29 }
 0x36e   : > { %5267 = vmatpush3.bf16.msra.mxu1 %v1739_v35  ;;  %5246 = vmatprep.subr.bf16.mxu0 %v1732_v36  ;;  %v1421_v35 = vld [vmem:[%s6822_s25 + $0x4d0] sm:$0xff]  ;;  %v1755_v36 = vunpack.c.l.s8.bf16 %v1413_v33 }
 0x36f   : > { %5268 = vmatprep.subr.bf16.mxu1 %v1748_v37  ;;  %v4944_v46 = vpop.f32.mrb[4].mxu0  ;;  %v1771_v37 = vunpack.c.l.s8.bf16 %v1421_v35  ;;  %v1772_v43 = vunpack.c.h.s8.bf16 %v1421_v35  ;;  %v1429_v35 = vld [vmem:[%s6822_s25 + $0x510] sm:$0xff] }
 0x370   : > { %v4966_v47 = vpop.f32.mrb[4].mxu1  ;;  %v4945_v48 = vpop.f32.mrb[5].mxu0 }
 0x371   : > { %v4967_v49 = vpop.f32.mrb[5].mxu1  ;;  %v4946_v50 = vadd.f32 %v4945_v48, %v4944_v46  ;;  %v4947_v51 = vpop.f32.mrb[6].mxu0  ;;  %5247 = vmatpush3.bf16.msra.mxu0 %v1724_v40  ;;  %v1418_v40 = vld [vmem:[%s6822_s25 + $0x4b8] sm:$0xff] }
 0x372   : > { %v4968_v52 = vadd.f32 %v4967_v49, %v4966_v47  ;;  %5269 = vmatpush3.bf16.msra.mxu1 %v1740_v41  ;;  %v4969_v55 = vpop.f32.mrb[6].mxu1  ;;  %v4948_v56 = vpop.f32.mrb[7].mxu0  ;;  %5248 = vmatprep.subr.bf16.mxu0 %v1733_v42  ;;  %v1426_v41 = vld [vmem:[%s6822_s25 + $0x4f8] sm:$0xff]  ;;  %v1756_v42 = vunpack.c.h.s8.bf16 %v1413_v33 }
 0x373   : > { %5270 = vmatprep.subr.bf16.mxu1 %v1749_v44  ;;  %v4970_v60 = vpop.f32.mrb[7].mxu1  ;;  %v2142_v61 = vadd.f32 %v4946_v50, %v7102_v59  ;;  %v4754_v59 = vcombine.low %v7113_v9, %v7113_v9  ;;  %v4759_v9 = vcombine.high %v7146_v13, %v7146_v13  ;;  %v1765_v44 = vunpack.c.l.s8.bf16 %v1418_v40  ;;  %v1422_v47 = vld [vmem:[%s6822_s25 + $0x4d8] sm:$0xff] }
 0x374   : > { %v1781_v46 = vunpack.c.l.s8.bf16 %v1426_v41  ;;  %v1757_v55 = vunpack.c.l.s8.bf16 %v1414_v45  ;;  %v1773_v56 = vunpack.c.l.s8.bf16 %v1422_v47  ;;  %v1766_v60 = vunpack.c.h.s8.bf16 %v1418_v40 }
 0x375   : > { %v7137_v0 = vadd.f32 %v4968_v52, %v2142_v61  ;;  %5249 = vmatpush3.bf16.msra.mxu0 %v1725_v53  ;;  %v1782_v61 = vunpack.c.h.s8.bf16 %v1426_v41 }
 0x376   : > { %5271 = vmatpush3.bf16.msra.mxu1 %v1741_v54  ;;  %5250 = vmatprep.subr.bf16.mxu0 %v1734_v57 }
 0x377   : > { %5272 = vmatprep.subr.bf16.mxu1 %v1750_v58 }
 0x379   : > { %5251 = vmatpush3.bf16.msra.mxu0 %v1726_v1  ;;  %v1431_v1 = vld [vmem:[%s6822_s25 + $0x520] sm:$0xff] }
 0x37a   : > { %5273 = vmatpush3.bf16.msra.mxu1 %v1742_v2  ;;  %5280 = vmatprep.subr.bf16.mxu0 %v1759_v4  ;;  %v1439_v2 = vld [vmem:[%s6822_s25 + $0x560] sm:$0xff]  ;;  %v1791_v11 = vunpack.c.l.s8.bf16 %v1431_v1 }
 0x37b   : > { %5302 = vmatprep.subr.bf16.mxu1 %v1775_v8  ;;  %v1774_v8 = vunpack.c.h.s8.bf16 %v1422_v47  ;;  %v1430_v47 = vld [vmem:[%s6822_s25 + $0x518] sm:$0xff] }
 0x37c   : > { %2700 = vmatmul.mubr.bf16.vlgmr.msra.gmra.mrb[32].mxu0 %v4754_v59  ;;  %v1427_v59 = vld [vmem:[%s6822_s25 + $0x500] sm:$0xff] }
 0x37d   : > { %2740 = vmatmul.mubr.bf16.vlgmr.msra.gmra.mrb[32].mxu1 %v4756_v12  ;;  %5281 = vmatpush3.bf16.msra.mxu0 %v1751_v15  ;;  %v1807_v12 = vunpack.c.l.s8.bf16 %v1439_v2  ;;  %v1435_v15 = vld [vmem:[%s6822_s25 + $0x540] sm:$0xff]  ;;  %v1783_v17 = vunpack.c.l.s8.bf16 %v1427_v59 }
 0x37e   : > { %5303 = vmatpush3.bf16.msra.mxu1 %v1767_v16  ;;  %5282 = vmatprep.subr.bf16.mxu0 %v1760_v6  ;;  %v4760_v16 = vcombine.low %v7149_v14, %v7149_v14  ;;  %v7179_v6 = vld [vmem:[%s6815_s20 + $0xa0] sm:$0xff]  ;;  %v1799_v18 = vunpack.c.l.s8.bf16 %v1435_v15  ;;  %v1800_v22 = vunpack.c.h.s8.bf16 %v1435_v15 }
 0x37f   : > { %5304 = vmatprep.subr.bf16.mxu1 %v1776_v7  ;;  %2779 = vmatprep.mubr.bf16.mxu0 %v4759_v9  ;;  %v7182_v7 = vld [vmem:[%s6815_s20 + $0xa8] sm:$0xff]  ;;  %v1792_v9 = vunpack.c.h.s8.bf16 %v1431_v1 }
 0x380   : > { %2819 = vmatprep.mubr.bf16.mxu1 %v4761_v10  ;;  %v1808_v10 = vunpack.c.h.s8.bf16 %v1439_v2  ;;  %v4765_v14 = vcombine.high %v7182_v7, %v7182_v7 }
 0x381   : > { %5283 = vmatpush3.bf16.msra.mxu0 %v1752_v19  ;;  %v1432_v19 = vld [vmem:[%s6822_s25 + $0x528] sm:$0xff] }
 0x382   : > { %5305 = vmatpush3.bf16.msra.mxu1 %v1768_v20  ;;  %5284 = vmatprep.subr.bf16.mxu0 %v1761_v21  ;;  %v1440_v20 = vld [vmem:[%s6822_s25 + $0x568] sm:$0xff]  ;;  %v1784_v21 = vunpack.c.h.s8.bf16 %v1427_v59  ;;  %v1794_v28 = vunpack.c.h.s8.bf16 %v1432_v19  ;;  %v1790_v59 = vunpack.c.h.s8.bf16 %v1430_v47 }
 0x383   : > { %5306 = vmatprep.subr.bf16.mxu1 %v1777_v23  ;;  %v1793_v23 = vunpack.c.l.s8.bf16 %v1432_v19  ;;  %v1810_v29 = vunpack.c.h.s8.bf16 %v1440_v20 }
 0x385   : > { %5285 = vmatpush3.bf16.msra.mxu0 %v1753_v25  ;;  %v1809_v25 = vunpack.c.l.s8.bf16 %v1440_v20 }
 0x386   : > { %5307 = vmatpush3.bf16.msra.mxu1 %v1769_v3  ;;  %5286 = vmatprep.subr.bf16.mxu0 %v1762_v26  ;;  %v1436_v3 = vld [vmem:[%s6822_s25 + $0x548] sm:$0xff]  ;;  %v1785_v26 = vunpack.c.l.s8.bf16 %v1428_v24 }
 0x387   : > { %5308 = vmatprep.subr.bf16.mxu1 %v1778_v27  ;;  %v1801_v27 = vunpack.c.l.s8.bf16 %v1436_v3  ;;  %v1802_v33 = vunpack.c.h.s8.bf16 %v1436_v3  ;;  %v1444_v3 = vld [vmem:[%s6822_s25 + $0x588] sm:$0xff] }
 0x389   : > { %5287 = vmatpush3.bf16.msra.mxu0 %v1754_v30  ;;  %v1433_v30 = vld [vmem:[%s6822_s25 + $0x530] sm:$0xff] }
 0x38a   : > { %5309 = vmatpush3.bf16.msra.mxu1 %v1770_v31  ;;  %5288 = vmatprep.subr.bf16.mxu0 %v1763_v32  ;;  %v1441_v31 = vld [vmem:[%s6822_s25 + $0x570] sm:$0xff]  ;;  %v1786_v32 = vunpack.c.h.s8.bf16 %v1428_v24  ;;  %v1796_v40 = vunpack.c.h.s8.bf16 %v1433_v30 }
 0x38b   : > { %5310 = vmatprep.subr.bf16.mxu1 %v1779_v34  ;;  %v1795_v34 = vunpack.c.l.s8.bf16 %v1433_v30  ;;  %v1812_v41 = vunpack.c.h.s8.bf16 %v1441_v31 }
 0x38d   : > { %5289 = vmatpush3.bf16.msra.mxu0 %v1755_v36  ;;  %v1811_v36 = vunpack.c.l.s8.bf16 %v1441_v31 }
 0x38e   : > { %5311 = vmatpush3.bf16.msra.mxu1 %v1771_v37  ;;  %5290 = vmatprep.subr.bf16.mxu0 %v1764_v38  ;;  %v1437_v37 = vld [vmem:[%s6822_s25 + $0x550] sm:$0xff]  ;;  %v1787_v38 = vunpack.c.l.s8.bf16 %v1429_v35 }
 0x38f   : > { %5312 = vmatprep.subr.bf16.mxu1 %v1780_v39  ;;  %v4988_v48 = vpop.f32.mrb[8].mxu0  ;;  %v1803_v39 = vunpack.c.l.s8.bf16 %v1437_v37  ;;  %v1804_v45 = vunpack.c.h.s8.bf16 %v1437_v37  ;;  %v1445_v37 = vld [vmem:[%s6822_s25 + $0x590] sm:$0xff] }
 0x390   : > { %v5010_v49 = vpop.f32.mrb[8].mxu1  ;;  %v4989_v50 = vpop.f32.mrb[9].mxu0 }
 0x391   : > { %v5011_v51 = vpop.f32.mrb[9].mxu1  ;;  %v4990_v52 = vadd.f32 %v4989_v50, %v4988_v48  ;;  %v4991_v53 = vpop.f32.mrb[10].mxu0  ;;  %5291 = vmatpush3.bf16.msra.mxu0 %v1756_v42  ;;  %v1434_v42 = vld [vmem:[%s6822_s25 + $0x538] sm:$0xff] }
 0x392   : > { %v5012_v54 = vadd.f32 %v5011_v51, %v5010_v49  ;;  %5313 = vmatpush3.bf16.msra.mxu1 %v1772_v43  ;;  %v5013_v57 = vpop.f32.mrb[10].mxu1  ;;  %v4992_v58 = vpop.f32.mrb[11].mxu0  ;;  %5292 = vmatprep.subr.bf16.mxu0 %v1765_v44  ;;  %v1442_v43 = vld [vmem:[%s6822_s25 + $0x578] sm:$0xff]  ;;  %v1788_v44 = vunpack.c.h.s8.bf16 %v1429_v35 }
 0x393   : > { %5314 = vmatprep.subr.bf16.mxu1 %v1781_v46  ;;  %v5014_v62 = vpop.f32.mrb[11].mxu1  ;;  %v2222_v63 = vadd.f32 %v4990_v52, %v7137_v0  ;;  %v4758_v0 = vcombine.low %v7146_v13, %v7146_v13  ;;  %v4763_v13 = vcombine.high %v7179_v6, %v7179_v6  ;;  %v1797_v46 = vunpack.c.l.s8.bf16 %v1434_v42  ;;  %v1438_v49 = vld [vmem:[%s6822_s25 + $0x558] sm:$0xff] }
 0x394   : > { %v1813_v48 = vunpack.c.l.s8.bf16 %v1442_v43  ;;  %v1789_v57 = vunpack.c.l.s8.bf16 %v1430_v47  ;;  %v1805_v58 = vunpack.c.l.s8.bf16 %v1438_v49  ;;  %v1798_v62 = vunpack.c.h.s8.bf16 %v1434_v42 }
 0x395   : > { %v7170_v4 = vadd.f32 %v5012_v54, %v2222_v63  ;;  %5293 = vmatpush3.bf16.msra.mxu0 %v1757_v55  ;;  %v1814_v63 = vunpack.c.h.s8.bf16 %v1442_v43 }
 0x396   : > { %5315 = vmatpush3.bf16.msra.mxu1 %v1773_v56  ;;  %5294 = vmatprep.subr.bf16.mxu0 %v1766_v60 }
 0x397   : > { %5316 = vmatprep.subr.bf16.mxu1 %v1782_v61 }
 0x399   : > { %5295 = vmatpush3.bf16.msra.mxu0 %v1758_v5  ;;  %v1447_v5 = vld [vmem:[%s6822_s25 + $0x5a0] sm:$0xff] }
 0x39a   : > { %5317 = vmatpush3.bf16.msra.mxu1 %v1774_v8  ;;  %5324 = vmatprep.subr.bf16.mxu0 %v1791_v11  ;;  %v1455_v8 = vld [vmem:[%s6822_s25 + $0x5e0] sm:$0xff]  ;;  %v1823_v15 = vunpack.c.l.s8.bf16 %v1447_v5 }
 0x39b   : > { %5346 = vmatprep.subr.bf16.mxu1 %v1807_v12  ;;  %v1806_v12 = vunpack.c.h.s8.bf16 %v1438_v49  ;;  %v1446_v49 = vld [vmem:[%s6822_s25 + $0x598] sm:$0xff] }
 0x39c   : > { %2780 = vmatmul.mubr.bf16.vlgmr.msra.gmra.mrb[36].mxu0 %v4758_v0  ;;  %v1443_v0 = vld [vmem:[%s6822_s25 + $0x580] sm:$0xff] }
 0x39d   : > { %2820 = vmatmul.mubr.bf16.vlgmr.msra.gmra.mrb[36].mxu1 %v4760_v16  ;;  %5325 = vmatpush3.bf16.msra.mxu0 %v1783_v17  ;;  %v1839_v16 = vunpack.c.l.s8.bf16 %v1455_v8  ;;  %v1451_v17 = vld [vmem:[%s6822_s25 + $0x5c0] sm:$0xff]  ;;  %v1815_v19 = vunpack.c.l.s8.bf16 %v1443_v0 }
 0x39e   : > { %5347 = vmatpush3.bf16.msra.mxu1 %v1799_v18  ;;  %5326 = vmatprep.subr.bf16.mxu0 %v1792_v9  ;;  %v4764_v18 = vcombine.low %v7182_v7, %v7182_v7  ;;  %v7212_v9 = vld [vmem:[%s6815_s20 + $0xb0] sm:$0xff]  ;;  %v1831_v20 = vunpack.c.l.s8.bf16 %v1451_v17  ;;  %v1832_v24 = vunpack.c.h.s8.bf16 %v1451_v17 }
 0x39f   : > { %5348 = vmatprep.subr.bf16.mxu1 %v1808_v10  ;;  %2859 = vmatprep.mubr.bf16.mxu0 %v4763_v13  ;;  %v7215_v10 = vld [vmem:[%s6815_s20 + $0xb8] sm:$0xff]  ;;  %v1824_v13 = vunpack.c.h.s8.bf16 %v1447_v5 }
 0x3a0   : > { %2899 = vmatprep.mubr.bf16.mxu1 %v4765_v14  ;;  %v1840_v14 = vunpack.c.h.s8.bf16 %v1455_v8  ;;  %v4769_v7 = vcombine.high %v7215_v10, %v7215_v10  ;;  %v4768_v17 = vcombine.low %v7215_v10, %v7215_v10 }
 0x3a1   : > { %5327 = vmatpush3.bf16.msra.mxu0 %v1784_v21  ;;  %v1448_v21 = vld [vmem:[%s6822_s25 + $0x5a8] sm:$0xff] }
 0x3a2   : > { %5349 = vmatpush3.bf16.msra.mxu1 %v1800_v22  ;;  %5328 = vmatprep.subr.bf16.mxu0 %v1793_v23  ;;  %v1456_v22 = vld [vmem:[%s6822_s25 + $0x5e8] sm:$0xff]  ;;  %v1816_v23 = vunpack.c.h.s8.bf16 %v1443_v0  ;;  %v1826_v30 = vunpack.c.h.s8.bf16 %v1448_v21  ;;  %v1459_v0 = vld [vmem:[%s6822_s25 + $0x600] sm:$0xff] }
 0x3a3   : > { %5350 = vmatprep.subr.bf16.mxu1 %v1809_v25  ;;  %v1825_v25 = vunpack.c.l.s8.bf16 %v1448_v21  ;;  %v1842_v31 = vunpack.c.h.s8.bf16 %v1456_v22  ;;  %v1462_v21 = vld [vmem:[%s6822_s25 + $0x618] sm:$0xff] }
 0x3a5   : > { %5329 = vmatpush3.bf16.msra.mxu0 %v1785_v26  ;;  %v1841_v26 = vunpack.c.l.s8.bf16 %v1456_v22 }
 0x3a6   : > { %5351 = vmatpush3.bf16.msra.mxu1 %v1801_v27  ;;  %5330 = vmatprep.subr.bf16.mxu0 %v1794_v28  ;;  %v1452_v27 = vld [vmem:[%s6822_s25 + $0x5c8] sm:$0xff]  ;;  %v1817_v28 = vunpack.c.l.s8.bf16 %v1444_v3 }
 0x3a7   : > { %5352 = vmatprep.subr.bf16.mxu1 %v1810_v29  ;;  %v1833_v29 = vunpack.c.l.s8.bf16 %v1452_v27  ;;  %v1834_v35 = vunpack.c.h.s8.bf16 %v1452_v27 }
 0x3a9   : > { %5331 = vmatpush3.bf16.msra.mxu0 %v1786_v32  ;;  %v1449_v32 = vld [vmem:[%s6822_s25 + $0x5b0] sm:$0xff] }
 0x3aa   : > { %5353 = vmatpush3.bf16.msra.mxu1 %v1802_v33  ;;  %5332 = vmatprep.subr.bf16.mxu0 %v1795_v34  ;;  %v1457_v33 = vld [vmem:[%s6822_s25 + $0x5f0] sm:$0xff]  ;;  %v1818_v34 = vunpack.c.h.s8.bf16 %v1444_v3  ;;  %v1828_v42 = vunpack.c.h.s8.bf16 %v1449_v32 }
 0x3ab   : > { %5354 = vmatprep.subr.bf16.mxu1 %v1811_v36  ;;  %v1827_v36 = vunpack.c.l.s8.bf16 %v1449_v32  ;;  %v1844_v43 = vunpack.c.h.s8.bf16 %v1457_v33  ;;  %v1854_v32 = vunpack.c.h.s8.bf16 %v1462_v21 }
 0x3ad   : > { %5333 = vmatpush3.bf16.msra.mxu0 %v1787_v38  ;;  %v1843_v38 = vunpack.c.l.s8.bf16 %v1457_v33  ;;  %v5974_v33 = vld [vmem:[%s6815_s20 + $0xc0] ss:$0 sps:$4 sm:$0xff]  }
 0x3ae   : > { %5355 = vmatpush3.bf16.msra.mxu1 %v1803_v39  ;;  %5334 = vmatprep.subr.bf16.mxu0 %v1796_v40  ;;  %v1453_v39 = vld [vmem:[%s6822_s25 + $0x5d0] sm:$0xff]  ;;  %v1819_v40 = vunpack.c.l.s8.bf16 %v1445_v37 }
 0x3af   : > { %5356 = vmatprep.subr.bf16.mxu1 %v1812_v41  ;;  %v5032_v50 = vpop.f32.mrb[12].mxu0  ;;  %v1835_v41 = vunpack.c.l.s8.bf16 %v1453_v39  ;;  %v1836_v47 = vunpack.c.h.s8.bf16 %v1453_v39 }
 0x3b0   : > { %v5054_v51 = vpop.f32.mrb[12].mxu1  ;;  %v5033_v52 = vpop.f32.mrb[13].mxu0 }
 0x3b1   : > { %v5055_v53 = vpop.f32.mrb[13].mxu1  ;;  %v5034_v54 = vadd.f32 %v5033_v52, %v5032_v50  ;;  %v5035_v55 = vpop.f32.mrb[14].mxu0  ;;  %5335 = vmatpush3.bf16.msra.mxu0 %v1788_v44  ;;  %v1450_v44 = vld [vmem:[%s6822_s25 + $0x5b8] sm:$0xff] }
 0x3b2   : > { %v5056_v56 = vadd.f32 %v5055_v53, %v5054_v51  ;;  %5357 = vmatpush3.bf16.msra.mxu1 %v1804_v45  ;;  %v5057_v60 = vpop.f32.mrb[14].mxu1  ;;  %v5036_v61 = vpop.f32.mrb[15].mxu0  ;;  %5336 = vmatprep.subr.bf16.mxu0 %v1797_v46  ;;  %v1458_v45 = vld [vmem:[%s6822_s25 + $0x5f8] sm:$0xff]  ;;  %v1820_v46 = vunpack.c.h.s8.bf16 %v1445_v37 }
 0x3b3   : > { %5358 = vmatprep.subr.bf16.mxu1 %v1813_v48  ;;  %v5058_v1 = vpop.f32.mrb[15].mxu1  ;;  %v2302_v2 = vadd.f32 %v5034_v54, %v7170_v4  ;;  %v4762_v4 = vcombine.low %v7179_v6, %v7179_v6  ;;  %v4767_v6 = vcombine.high %v7212_v9, %v7212_v9  ;;  %v1829_v48 = vunpack.c.l.s8.bf16 %v1450_v44  ;;  %v1454_v51 = vld [vmem:[%s6822_s25 + $0x5d8] sm:$0xff] }
 0x3b4   : > { %v1845_v50 = vunpack.c.l.s8.bf16 %v1458_v45  ;;  %v1821_v60 = vunpack.c.l.s8.bf16 %v1446_v49  ;;  %v1837_v61 = vunpack.c.l.s8.bf16 %v1454_v51  ;;  %v1830_v1 = vunpack.c.h.s8.bf16 %v1450_v44 }
 0x3b5   : > { %v7203_v11 = vadd.f32 %v5056_v56, %v2302_v2  ;;  %5337 = vmatpush3.bf16.msra.mxu0 %v1789_v57  ;;  %v1846_v2 = vunpack.c.h.s8.bf16 %v1458_v45 }
 0x3b6   : > { %5359 = vmatpush3.bf16.msra.mxu1 %v1805_v58  ;;  %5338 = vmatprep.subr.bf16.mxu0 %v1798_v62 }
 0x3b7   : > { %5360 = vmatprep.subr.bf16.mxu1 %v1814_v63 }
 0x3b9   : > { %5339 = vmatpush3.bf16.msra.mxu0 %v1790_v59 }
 0x3ba   : > { %5361 = vmatpush3.bf16.msra.mxu1 %v1806_v12  ;;  %5368 = vmatprep.subr.bf16.mxu0 %v1823_v15  ;;  %v1822_v12 = vunpack.c.h.s8.bf16 %v1446_v49  ;;  %v1838_v15 = vunpack.c.h.s8.bf16 %v1454_v51 }
 0x3bb   : > { %5390 = vmatprep.subr.bf16.mxu1 %v1839_v16  ;;  %v4766_v16 = vcombine.low %v7212_v9, %v7212_v9 }
 0x3bc   : > { %2860 = vmatmul.mubr.bf16.vlgmr.msra.gmra.mrb[40].mxu0 %v4762_v4  ;;  %v1847_v4 = vunpack.c.l.s8.bf16 %v1459_v0 }
 0x3bd   : > { %2900 = vmatmul.mubr.bf16.vlgmr.msra.gmra.mrb[40].mxu1 %v4764_v18  ;;  %5369 = vmatpush3.bf16.msra.mxu0 %v1815_v19  ;;  %v6443_v18 = vmov 0.0   ;;  %v1460_v19 = vld [vmem:[%s6822_s25 + $0x608] sm:$0xff] }
 0x3be   : > { %5391 = vmatpush3.bf16.msra.mxu1 %v1831_v20  ;;  %5370 = vmatprep.subr.bf16.mxu0 %v1824_v13  ;;  %v1849_v9 = vunpack.c.l.s8.bf16 %v1460_v19  ;;  %v1850_v10 = vunpack.c.h.s8.bf16 %v1460_v19  ;;  %v1461_v20 = vld [vmem:[%s6822_s25 + $0x610] sm:$0xff] }
 0x3bf   : > { %5392 = vmatprep.subr.bf16.mxu1 %v1840_v14  ;;  %2939 = vmatprep.mubr.bf16.mxu0 %v4767_v6  ;;  %v1851_v13 = vunpack.c.l.s8.bf16 %v1461_v20  ;;  %v1852_v14 = vunpack.c.h.s8.bf16 %v1461_v20 }
 0x3c0   : > { %2979 = vmatprep.mubr.bf16.mxu1 %v4769_v7 }
 0x3c1   : > { %5371 = vmatpush3.bf16.msra.mxu0 %v1816_v23 }
 0x3c2   : > { %5393 = vmatpush3.bf16.msra.mxu1 %v1832_v24  ;;  %5372 = vmatprep.subr.bf16.mxu0 %v1825_v25 }
 0x3c3   : > { %5394 = vmatprep.subr.bf16.mxu1 %v1841_v26  ;;  %v1853_v26 = vunpack.c.l.s8.bf16 %v1462_v21 }
 0x3c5   : > { %5373 = vmatpush3.bf16.msra.mxu0 %v1817_v28 }
 0x3c6   : > { %5395 = vmatpush3.bf16.msra.mxu1 %v1833_v29  ;;  %5374 = vmatprep.subr.bf16.mxu0 %v1826_v30 }
 0x3c7   : > { %5396 = vmatprep.subr.bf16.mxu1 %v1842_v31 }
 0x3c9   : > { %5375 = vmatpush3.bf16.msra.mxu0 %v1818_v34 }
 0x3ca   : > { %5397 = vmatpush3.bf16.msra.mxu1 %v1834_v35  ;;  %5376 = vmatprep.subr.bf16.mxu0 %v1827_v36 }
 0x3cb   : > { %5398 = vmatprep.subr.bf16.mxu1 %v1843_v38 }
 0x3cd   : > { %5377 = vmatpush3.bf16.msra.mxu0 %v1819_v40 }
 0x3ce   : > { %5399 = vmatpush3.bf16.msra.mxu1 %v1835_v41  ;;  %5378 = vmatprep.subr.bf16.mxu0 %v1828_v42 }
 0x3cf   : > { %5400 = vmatprep.subr.bf16.mxu1 %v1844_v43  ;;  %v5076_v52 = vpop.f32.mrb[16].mxu0 }
 0x3d0   : > { %v5098_v53 = vpop.f32.mrb[16].mxu1  ;;  %v5077_v54 = vpop.f32.mrb[17].mxu0 }
 0x3d1   : > { %v5099_v55 = vpop.f32.mrb[17].mxu1  ;;  %v5078_v56 = vadd.f32 %v5077_v54, %v5076_v52  ;;  %v5079_v57 = vpop.f32.mrb[18].mxu0  ;;  %5379 = vmatpush3.bf16.msra.mxu0 %v1820_v46 }
 0x3d2   : > { %v5100_v58 = vadd.f32 %v5099_v55, %v5098_v53  ;;  %5401 = vmatpush3.bf16.msra.mxu1 %v1836_v47  ;;  %v5101_v62 = vpop.f32.mrb[18].mxu1  ;;  %v5080_v63 = vpop.f32.mrb[19].mxu0  ;;  %5380 = vmatprep.subr.bf16.mxu0 %v1829_v48 }
 0x3d3   : > { %5402 = vmatprep.subr.bf16.mxu1 %v1845_v50  ;;  %v5102_v5 = vpop.f32.mrb[19].mxu1  ;;  %v2382_v8 = vadd.f32 %v5078_v56, %v7203_v11  ;;  %v1848_v11 = vunpack.c.h.s8.bf16 %v1459_v0 }
 0x3d5   : > { %v2422_v59 = vadd.f32 %v5100_v58, %v2382_v8  ;;  %5381 = vmatpush3.bf16.msra.mxu0 %v1821_v60 }
 0x3d6   : > { %5403 = vmatpush3.bf16.msra.mxu1 %v1837_v61  ;;  %5382 = vmatprep.subr.bf16.mxu0 %v1830_v1 }
 0x3d7   : > { %5404 = vmatprep.subr.bf16.mxu1 %v1846_v2 }
 0x3d9   : > { %5383 = vmatpush3.bf16.msra.mxu0 %v1822_v12 }
 0x3da   : > { %5405 = vmatpush3.bf16.msra.mxu1 %v1838_v15  ;;  %5559 = vmatprep.subr.bf16.mxu0 %v6443_v18 }
 0x3dc   : > { %2940 = vmatmul.mubr.bf16.vlgmr.msra.gmra.mrb[44].mxu0 %v4766_v16 }
 0x3dd   : > { %2980 = vmatmul.mubr.bf16.vlgmr.msra.gmra.mrb[44].mxu1 %v4768_v17  ;;  %5560 = vmatpush3.bf16.msra.mxu0 %v1847_v4 }
 0x3de   : > { %5575 = vmatprep.mubr.msk.bf16.mxu0 %vm6444_vm1, %v6443_v18  ;;  %5561 = vmatprep.subr.bf16.mxu0 %v6443_v18 }
 0x3e1   : > { %5562 = vmatpush3.bf16.msra.mxu0 %v1848_v11 }
 0x3e2   : > { %5563 = vmatprep.subr.bf16.mxu0 %v6443_v18 }
 0x3e5   : > { %5564 = vmatpush3.bf16.msra.mxu0 %v1849_v9 }
 0x3e6   : > { %5565 = vmatprep.subr.bf16.mxu0 %v6443_v18 }
 0x3e9   : > { %5566 = vmatpush3.bf16.msra.mxu0 %v1850_v10 }
 0x3ea   : > { %5567 = vmatprep.subr.bf16.mxu0 %v6443_v18 }
 0x3ed   : > { %5568 = vmatpush3.bf16.msra.mxu0 %v1851_v13 }
 0x3ee   : > { %5569 = vmatprep.subr.bf16.mxu0 %v6443_v18 }
 0x3ef   : > { %v5120_v22 = vpop.f32.mrb[20].mxu0 }
 0x3f0   : > { %v5142_v6 = vpop.f32.mrb[20].mxu1  ;;  %v5121_v7 = vpop.f32.mrb[21].mxu0 }
 0x3f1   : > { %v5143_v23 = vpop.f32.mrb[21].mxu1  ;;  %v5122_v24 = vadd.f32 %v5121_v7, %v5120_v22  ;;  %v5123_v25 = vpop.f32.mrb[22].mxu0  ;;  %5570 = vmatpush3.bf16.msra.mxu0 %v1852_v14 }
 0x3f2   : > { %v5144_v3 = vadd.f32 %v5143_v23, %v5142_v6  ;;  %v5145_v27 = vpop.f32.mrb[22].mxu1  ;;  %v5124_v28 = vpop.f32.mrb[23].mxu0  ;;  %5571 = vmatprep.subr.bf16.mxu0 %v6443_v18 }
 0x3f3   : > { %v5146_v29 = vpop.f32.mrb[23].mxu1  ;;  %v2462_v30 = vadd.f32 %v5122_v24, %v2422_v59 }
 0x3f5   : > { %v2502_v31 = vadd.f32 %v5144_v3, %v2462_v30  ;;  %5572 = vmatpush3.bf16.msra.mxu0 %v1853_v26 }
 0x3f6   : > { %5573 = vmatprep.subr.bf16.mxu0 %v6443_v18 }
 0x3f9   : > { %5574 = vmatpush3.bf16.msra.mxu0 %v1854_v32 }
 0x3fc   : > { %5576 = vmatmul.mubr.bf16.vlgmr.msra.gmra.mrb[48].mxu0 %v5974_v33 }
 0x40f   : > { %v5164_v34 = vpop.f32.mrb[24].mxu0 }
 0x410   : > { %v5186_v35 = vpop.f32.mrb[24].mxu1  ;;  %v5165_v36 = vpop.f32.mrb[25].mxu0 }
 0x411   : > { %v5187_v37 = vpop.f32.mrb[25].mxu1  ;;  %v5166_v38 = vadd.f32 %v5165_v36, %v5164_v34  ;;  %v5167_v39 = vpop.f32.mrb[26].mxu0 }
 0x412   : > { %v5188_v40 = vadd.f32 %v5187_v37, %v5186_v35  ;;  %v5189_v41 = vpop.f32.mrb[26].mxu1  ;;  %v5168_v42 = vpop.f32.mrb[27].mxu0 }
 0x413   : > { %v5190_v43 = vpop.f32.mrb[27].mxu1  ;;  %v2542_v44 = vadd.f32 %v5166_v38, %v2502_v31  ;;  %v1241_v42 = vld [vmem:[#allocation2] sm:$0xff] }
 0x415   : > { %v2582_v45 = vadd.f32 %v5188_v40, %v2542_v44 }
 0x42f   : > { %v5208_v46 = vpop.f32.mrb[28].mxu0 }
 0x430   : > { %v5230_v47 = vpop.f32.mrb[28].mxu1  ;;  %v5209_v48 = vpop.f32.mrb[29].mxu0 }
 0x431   : > { %v5231_v49 = vpop.f32.mrb[29].mxu1  ;;  %v5210_v50 = vadd.f32 %v5209_v48, %v5208_v46  ;;  %v5211_v51 = vpop.f32.mrb[30].mxu0 }
 0x432   : > { %v5232_v52 = vadd.f32 %v5231_v49, %v5230_v47  ;;  %v5233_v53 = vpop.f32.mrb[30].mxu1  ;;  %v5212_v54 = vpop.f32.mrb[31].mxu0  ;;  %v5975_v49 = vld [vmem:[#allocation10] sm:$0xff] (!%p4771_p11)   ;;  %v5976_v51 = vld [vmem:[#allocation10 + $0x8] sm:$0xff] (!%p4771_p11)  }
 0x433   : > { %v5234_v55 = vpop.f32.mrb[31].mxu1  ;;  %v2622_v56 = vadd.f32 %v5210_v50, %v2582_v45  ;;  %v6445_v50 = vmov (!%p4771_p11), 0.0   ;;  %v5977_v53 = vld [vmem:[#allocation10 + $0x10] sm:$0xff] (!%p4771_p11)   ;;  %v4773_v54 = vld [vmem:[#allocation18] ss:$0 sm:$0xff] (!%p4771_p11) }
 0x434   : > { %5579 = vmatprep.subr.bf16.mxu0 (!%p4771_p11), %v6445_v50  ;;  %5595 = vmatprep.mubr.msk.bf16.mxu0 (!%p4771_p11), %vm6446_vm2, %v6445_v50  ;;  %v4772_v55 = vld [vmem:[#allocation18 + $0x4] ss:$0 sm:$0xff] (!%p4771_p11) }
 0x435   : > { %v2662_v57 = vadd.f32 %v5232_v52, %v2622_v56  ;;  %5580 = vmatpush3.bf16.msra.mxu0 (!%p4771_p11), %v5975_v49  ;;  %v6447_v52 = vmov (!%p4771_p11), 0.0|0.0   ;;  %5603 = vmatprep.mubr.msk.f32.mxu1 (!%p4771_p11), %vm6446_vm2, %v6445_v50  ;;  %v5990_v49 = vld [vmem:[#allocation15 + $0xc8] sm:$0xff] (!%p4771_p11)  }
 0x436   : > { %5581 = vmatprep.subr.bf16.mxu0 (!%p4771_p11), %v6445_v50  ;;  %5646 = vmatprep.subr.bf16.mxu1 (!%p4771_p11), %v6447_v52  ;;  %v5989_v52 = vld [vmem:[#allocation15 + $0x50] sm:$0xff] (!%p4771_p11)  }
 0x439   : > { %5582 = vmatpush3.bf16.msra.mxu0 (!%p4771_p11), %v5976_v51  ;;  %v5987_v51 = vld [vmem:[#allocation15 + $0x8] sm:$0xff] (!%p4771_p11)  }
 0x43a   : > { %5583 = vmatprep.subr.bf16.mxu0 (!%p4771_p11), %v6445_v50 }
 0x43d   : > { %5584 = vmatpush3.bf16.msra.mxu0 (!%p4771_p11), %v5977_v53  ;;  %v5992_v53 = vld [vmem:[#allocation15 + $0x88] sm:$0xff] (!%p4771_p11)  }
 0x43e   : > { %5585 = vmatprep.subr.bf16.mxu0 (!%p4771_p11), %v6445_v50 }
 0x44f   : > { %v5252_v58 = vpop.f32.mrb[32].mxu0 }
 0x450   : > { %v5274_v60 = vpop.f32.mrb[32].mxu1  ;;  %v5253_v61 = vpop.f32.mrb[33].mxu0 }
 0x451   : > { %v5275_v62 = vpop.f32.mrb[33].mxu1  ;;  %v5254_v63 = vadd.f32 %v5253_v61, %v5252_v58  ;;  %v5255_v1 = vpop.f32.mrb[34].mxu0  ;;  %v3166_v61 = vld [vmem:[#allocation3 + $0x48] sm:$0xff] (!%p4771_p11) }
 0x452   : > { %v5276_v2 = vadd.f32 %v5275_v62, %v5274_v60  ;;  %v5277_v5 = vpop.f32.mrb[34].mxu1  ;;  %v5256_v8 = vpop.f32.mrb[35].mxu0  ;;  %v3165_v60 = vld [vmem:[#allocation3] sm:$0xff] (!%p4771_p11) }
 0x453   : > { %v5278_v59 = vpop.f32.mrb[35].mxu1  ;;  %v2702_v12 = vadd.f32 %v5254_v63, %v2662_v57  ;;  %v5978_v57 = vld [vmem:[#allocation10 + $0x18] sm:$0xff] (!%p4771_p11)   ;;  %v5647_v62 = vpack.c.bf16 (!%p4771_p11), %v3166_v61, %v3165_v60  ;;  %v5979_v1 = vld [vmem:[#allocation10 + $0x20] sm:$0xff] (!%p4771_p11)   ;;  %v5980_v5 = vld [vmem:[#allocation10 + $0x28] sm:$0xff] (!%p4771_p11)  }
 0x454   : > { %5586 = vmatpush3.bf16.msra.mxu0 (!%p4771_p11), %v5978_v57  ;;  %v5981_v8 = vld [vmem:[#allocation10 + $0x30] sm:$0xff] (!%p4771_p11)   ;;  %v5982_v59 = vld [vmem:[#allocation10 + $0x38] sm:$0xff] (!%p4771_p11)   ;;  %v5997_v61 = vld [vmem:[#allocation15 + $0x60] sm:$0xff] (!%p4771_p11)  }
 0x455   : > { %v2742_v15 = vadd.f32 %v5276_v2, %v2702_v12  ;;  %5648 = vmatpush3.bf16.xpose.msra.mxu1 (!%p4771_p11), %v5647_v62  ;;  %5587 = vmatprep.subr.bf16.mxu0 (!%p4771_p11), %v6445_v50  ;;  %v5996_v57 = vld [vmem:[#allocation15 + $0x90] sm:$0xff] (!%p4771_p11)   ;;  %v5995_v60 = vld [vmem:[#allocation15 + $0x18] sm:$0xff] (!%p4771_p11)  }
 0x456   : > { %v6000_v62 = vld [vmem:[#allocation15 + $0x98] sm:$0xff] (!%p4771_p11)  }
 0x458   : > { %5588 = vmatpush3.bf16.msra.mxu0 (!%p4771_p11), %v5979_v1  ;;  %v5999_v1 = vld [vmem:[#allocation15 + $0x20] sm:$0xff] (!%p4771_p11)  }
 0x459   : > { %5589 = vmatprep.subr.bf16.mxu0 (!%p4771_p11), %v6445_v50 }
 0x45c   : > { %5590 = vmatpush3.bf16.msra.mxu0 (!%p4771_p11), %v5980_v5  ;;  %v6004_v5 = vld [vmem:[#allocation15 + $0xa0] sm:$0xff] (!%p4771_p11)  }
 0x45d   : > { %5591 = vmatprep.subr.bf16.mxu0 (!%p4771_p11), %v6445_v50 }
 0x460   : > { %5592 = vmatpush3.bf16.msra.mxu0 (!%p4771_p11), %v5981_v8  ;;  %v6006_v8 = vld [vmem:[#allocation15 + $0xe8] sm:$0xff] (!%p4771_p11)  }
 0x461   : > { %5593 = vmatprep.subr.bf16.mxu0 (!%p4771_p11), %v6445_v50 }
 0x464   : > { %5594 = vmatpush3.bf16.msra.mxu0 (!%p4771_p11), %v5982_v59  ;;  %v6003_v59 = vld [vmem:[#allocation15 + $0x28] sm:$0xff] (!%p4771_p11)  }
 0x46f   : > { %v5296_v0 = vpop.f32.mrb[36].mxu0 }
 0x470   : > { %v5318_v16 = vpop.f32.mrb[36].mxu1  ;;  %v5297_v17 = vpop.f32.mrb[37].mxu0 }
 0x471   : > { %v5319_v4 = vpop.f32.mrb[37].mxu1  ;;  %v5298_v18 = vadd.f32 %v5297_v17, %v5296_v0  ;;  %v5299_v11 = vpop.f32.mrb[38].mxu0 }
 0x472   : > { %v5320_v19 = vadd.f32 %v5319_v4, %v5318_v16  ;;  %v5321_v9 = vpop.f32.mrb[38].mxu1  ;;  %v5300_v10 = vpop.f32.mrb[39].mxu0 }
 0x473   : > { %v5322_v20 = vpop.f32.mrb[39].mxu1  ;;  %v2782_v13 = vadd.f32 %v5298_v18, %v2742_v15  ;;  %v4774_v15 = vld [vmem:[#allocation18 + $0x1] ss:$0 sm:$0xff] (!%p4771_p11) }
 0x474   : > { %v3168_v20 = vld [vmem:[#allocation3 + $0x10] sm:$0xff] (!%p4771_p11) }
 0x475   : > { %v2822_v14 = vadd.f32 %v5320_v19, %v2782_v13  ;;  %v3176_v13 = vld [vmem:[#allocation3 + $0x58] sm:$0xff] (!%p4771_p11) }
 0x48f   : > { %v5340_v21 = vpop.f32.mrb[40].mxu0 }
 0x490   : > { %v5362_v22 = vpop.f32.mrb[40].mxu1  ;;  %v5341_v6 = vpop.f32.mrb[41].mxu0 }
 0x491   : > { %v5363_v7 = vpop.f32.mrb[41].mxu1  ;;  %v5342_v23 = vadd.f32 %v5341_v6, %v5340_v21  ;;  %v5343_v24 = vpop.f32.mrb[42].mxu0  ;;  %v5649_v21 = vpack.c.bf16 (!%p4771_p11), %v3176_v13, %v3168_v20  ;;  %v6018_v20 = vld [vmem:[#allocation15 + $0x1c0] sm:$0xff] (!%p4771_p11)  }
 0x492   : > { %v5364_v25 = vadd.f32 %v5363_v7, %v5362_v22  ;;  %v5365_v3 = vpop.f32.mrb[42].mxu1  ;;  %v5344_v26 = vpop.f32.mrb[43].mxu0  ;;  %v3175_v22 = vld [vmem:[#allocation3 + $0x50] sm:$0xff] (!%p4771_p11)  ;;  %v3170_v7 = vld [vmem:[#allocation3 + $0x20] sm:$0xff] (!%p4771_p11) }
 0x493   : > { %v5366_v27 = vpop.f32.mrb[43].mxu1  ;;  %v2862_v28 = vadd.f32 %v5342_v23, %v2822_v14  ;;  %v3167_v14 = vld [vmem:[#allocation3 + $0x8] sm:$0xff] (!%p4771_p11)  ;;  %5650 = vmatprep.subr.bf16.mxu1 (!%p4771_p11), %v5649_v21 }
 0x494   : > { %v5651_v6 = vpack.c.bf16 (!%p4771_p11), %v3175_v22, %v3167_v14  ;;  %v3178_v23 = vld [vmem:[#allocation3 + $0x68] sm:$0xff] (!%p4771_p11)  ;;  %v3169_v27 = vld [vmem:[#allocation3 + $0x18] sm:$0xff] (!%p4771_p11) }
 0x495   : > { %v2902_v29 = vadd.f32 %v5364_v25, %v2862_v28  ;;  %v5653_v24 = vpack.c.bf16 (!%p4771_p11), %v3178_v23, %v3170_v7  ;;  %v3177_v28 = vld [vmem:[#allocation3 + $0x60] sm:$0xff] (!%p4771_p11) }
 0x4af   : > { %v5384_v30 = vpop.f32.mrb[44].mxu0 }
 0x4b0   : > { %v5406_v31 = vpop.f32.mrb[44].mxu1  ;;  %v5385_v32 = vpop.f32.mrb[45].mxu0 }
 0x4b1   : > { %v5407_v33 = vpop.f32.mrb[45].mxu1  ;;  %v5386_v34 = vadd.f32 %v5385_v32, %v5384_v30  ;;  %v5387_v35 = vpop.f32.mrb[46].mxu0  ;;  %v3180_v30 = vld [vmem:[#allocation3 + $0x78] sm:$0xff] (!%p4771_p11) }
 0x4b2   : > { %v5408_v36 = vadd.f32 %v5407_v33, %v5406_v31  ;;  %v5409_v37 = vpop.f32.mrb[46].mxu1  ;;  %v5388_v38 = vpop.f32.mrb[47].mxu0  ;;  %v5655_v31 = vpack.c.bf16 (!%p4771_p11), %v3177_v28, %v3169_v27  ;;  %v3171_v33 = vld [vmem:[#allocation3 + $0x28] sm:$0xff] (!%p4771_p11) }
 0x4b3   : > { %v5410_v39 = vpop.f32.mrb[47].mxu1  ;;  %v2942_v40 = vadd.f32 %v5386_v34, %v2902_v29  ;;  %v3172_v29 = vld [vmem:[#allocation3 + $0x30] sm:$0xff] (!%p4771_p11)  ;;  %v3182_v37 = vld [vmem:[#allocation3 + $0x88] sm:$0xff] (!%p4771_p11) }
 0x4b4   : > { %v5657_v32 = vpack.c.bf16 (!%p4771_p11), %v3180_v30, %v3172_v29  ;;  %v3179_v34 = vld [vmem:[#allocation3 + $0x70] sm:$0xff] (!%p4771_p11)  ;;  %v6017_v28 = vld [vmem:[#allocation15 + $0x148] sm:$0xff] (!%p4771_p11)  }
 0x4b5   : > { %v2982_v41 = vadd.f32 %v5408_v36, %v2942_v40  ;;  %v3174_v36 = vld [vmem:[#allocation3 + $0x40] sm:$0xff] (!%p4771_p11)  ;;  %v5659_v39 = vpack.c.bf16 (!%p4771_p11), %v3179_v34, %v3171_v33 }
 0x4b6   : > { %v5661_v40 = vpack.c.bf16 (!%p4771_p11), %v3182_v37, %v3174_v36  ;;  %v6020_v33 = vld [vmem:[#allocation15 + $0x180] sm:$0xff] (!%p4771_p11)   ;;  %v6021_v36 = vld [vmem:[#allocation15 + $0x150] sm:$0xff] (!%p4771_p11)   ;;  %v6022_v37 = vld [vmem:[#allocation15 + $0x1c8] sm:$0xff] (!%p4771_p11)  }
 0x4ce   : > { %3032 = sbr.rel (%p4771_p11) target bundleno = 2557 (0x9fd), region = 100 }
 0x4cf   : > { %v3021_v43 = vpop.f32.mrb[48].mxu0 }
 0x4d0   : > { %v3022_v44 = vadd.f32 %v3021_v43, %v2982_v41  ;;  %v5577_v45 = vpop.f32.mrb[49].mxu0  ;;  %v3173_v41 = vld [vmem:[#allocation3 + $0x38] sm:$0xff] (!%p4771_p11) }
 0x4d1   : > { %v3024_v46 = vpop.f32.mrb[50].mxu0  ;;  %v5984_v45 = vld [vmem:[#allocation15] sm:$0xff] (!%p4771_p11)  }
 0x4d2   : > { %v3027_v47 = vadd.f32 %v3022_v44, %v1241_v42  ;;  %v5578_v48 = vpop.f32.mrb[51].mxu0  ;;  %v3181_v42 = vld [vmem:[#allocation3 + $0x80] sm:$0xff] (!%p4771_p11)  ;;  %v5985_v46 = vld [vmem:[#allocation15 + $0x48] sm:$0xff] (!%p4771_p11)  }
 0x4d3   : > { %v5663_v43 = vpack.c.bf16 (!%p4771_p11), %v3181_v42, %v3173_v41  ;;  %v5983_v44 = vld [vmem:[#allocation15 + $0x40] sm:$0xff] (!%p4771_p11)   ;;  %v6023_v41 = vld [vmem:[#allocation15 + $0x110] sm:$0xff] (!%p4771_p11)   ;;  %v6024_v42 = vld [vmem:[#allocation15 + $0x188] sm:$0xff] (!%p4771_p11)  }
 0x4d4   : > { %3028 = vst [vmem:[#allocation2] sm:$0xff] %v3027_v47  ;;  %v5986_v47 = vld [vmem:[#allocation15 + $0xc0] sm:$0xff] (!%p4771_p11)  }
 0x4d5   : > { %v5988_v48 = vld [vmem:[#allocation15 + $0x80] sm:$0xff]   ;;  %5455 = vmatprep.subr.bf16.mxu0 %v5986_v47 }
 0x4db   : > { %v3038_v56 = vld [vmem:[#allocation2] sm:$0xff] }
 0x4dc   : > { %v3045_v58 = vmul.f32 %v4772_v55, %v3038_v56  ;;  %v5991_v55 = vld [vmem:[#allocation15 + $0x10] sm:$0xff]   ;;  %v5993_v56 = vld [vmem:[#allocation15 + $0x58] sm:$0xff]  }
 0x4de   : > { %v3052_v63 = vadd.f32 %v4773_v54, %v3045_v58  ;;  %v5994_v54 = vld [vmem:[#allocation15 + $0xd0] sm:$0xff]   ;;  %v5998_v58 = vld [vmem:[#allocation15 + $0xd8] sm:$0xff]  }
 0x4e0   : > { %v3053_v2 = vmax.f32 %v3052_v63, 0.0  ;;  %v6002_v63 = vld [vmem:[#allocation15 + $0xe0] sm:$0xff]  }
 0x4e2   : > { %v7256_v12 = vpack.c.bf16 %v3053_v2, %v3053_v2  ;;  %v6001_v2 = vld [vmem:[#allocation15 + $0x68] sm:$0xff]  }
 0x4e4   : > { %5596 = vmatmul.mubr.bf16.vlgmr.msra.gmra.mrb[0].mxu0 %v7256_v12 }
 0x4e5   : > { %5456 = vmatpush3.bf16.msra.mxu0 %v5988_v48  ;;  %v6027_v48 = vld [vmem:[#allocation15 + $0x118] sm:$0xff]  }
 0x4e6   : > { %5457 = vmatprep.subr.bf16.mxu0 %v5990_v49  ;;  %v6028_v49 = vld [vmem:[#allocation15 + $0x190] sm:$0xff]  }
 0x4e9   : > { %5458 = vmatpush3.bf16.msra.mxu0 %v5992_v53  ;;  %v6031_v53 = vld [vmem:[#allocation15 + $0x120] sm:$0xff]  }
 0x4ea   : > { %5459 = vmatprep.subr.bf16.mxu0 %v5994_v54  ;;  %v6032_v54 = vld [vmem:[#allocation15 + $0x198] sm:$0xff]  }
 0x4ed   : > { %5460 = vmatpush3.bf16.msra.mxu0 %v5996_v57  ;;  %v6035_v57 = vld [vmem:[#allocation15 + $0x128] sm:$0xff]  }
 0x4ee   : > { %5461 = vmatprep.subr.bf16.mxu0 %v5998_v58  ;;  %v6036_v58 = vld [vmem:[#allocation15 + $0x1a0] sm:$0xff]  }
 0x4f1   : > { %5462 = vmatpush3.bf16.msra.mxu0 %v6000_v62  ;;  %v6039_v62 = vld [vmem:[#allocation15 + $0x130] sm:$0xff]  }
 0x4f2   : > { %5463 = vmatprep.subr.bf16.mxu0 %v6002_v63  ;;  %v6040_v63 = vld [vmem:[#allocation15 + $0x1a8] sm:$0xff]  }
 0x4f5   : > { %5464 = vmatpush3.bf16.msra.mxu0 %v6004_v5  ;;  %v6043_v5 = vld [vmem:[#allocation15 + $0x138] sm:$0xff]  }
 0x4f6   : > { %5465 = vmatprep.subr.bf16.mxu0 %v6006_v8  ;;  %v6044_v8 = vld [vmem:[#allocation15 + $0x1b0] sm:$0xff]  }
 0x5b7   : > { %v3159_v0 = vpop.f32.mrb[0].mxu0 }
 0x5b8   : > { %v3160_v16 = vadd.f32 %v4774_v15, %v3159_v0  ;;  %v5597_v17 = vpop.f32.mrb[1].mxu0  ;;  %v6005_v15 = vld [vmem:[#allocation15 + $0x70] sm:$0xff]   ;;  %v6008_v0 = vld [vmem:[#allocation15 + $0xa8] sm:$0xff]  }
 0x5b9   : > { %v3162_v4 = vpop.f32.mrb[2].mxu0  ;;  %5466 = vmatpush3.bf16.msra.mxu0 %v6008_v0  ;;  %v6009_v17 = vld [vmem:[#allocation15 + $0x78] sm:$0xff]  }
 0x5ba   : > { %v5598_v18 = vpop.f32.mrb[3].mxu0  ;;  %5604 = vmatmul.mubr.f32.vlgmr.msra.gmra.mrb[0].mxu1 %v3160_v16  ;;  %v6007_v16 = vld [vmem:[#allocation15 + $0x30] sm:$0xff]   ;;  %v6046_v0 = vld [vmem:[#allocation15 + $0x1b8] sm:$0xff]  }
 0x5bb   : > { %3331 = vmatprep.mubr.f32.mxu1 %v6445_v50  ;;  %5652 = vmatpush1.bf16.msra.mxu1 %v5651_v6  ;;  %v6010_v4 = vld [vmem:[#allocation15 + $0xf0] sm:$0xff]   ;;  %v6011_v18 = vld [vmem:[#allocation15 + $0x38] sm:$0xff]  }
 0x5bc   : > { %5654 = vmatprep.subr.bf16.mxu1 %v5653_v24  ;;  %5467 = vmatprep.subr.bf16.mxu0 %v6010_v4 }
 0x68d   : > { %v3249_v11 = vpop.f32.mrb[0].mxu1 }
 0x68e   : > { %v3253_v19 = vmul.f32 0.088388346, %v3249_v11  ;;  %v5605_v9 = vpop.f32.mrb[1].mxu1  ;;  %v6012_v11 = vld [vmem:[#allocation15 + $0xb0] sm:$0xff]  }
 0x68f   : > { %5468 = vmatpush3.bf16.msra.mxu0 %v6012_v11  ;;  %v6014_v9 = vld [vmem:[#allocation15 + $0x140] sm:$0xff]  }
 0x690   : > { %v3255_v10 = vsel %vm3254_vm3, %v3253_v19, -inf }
 0x691   : > { %3256 = vmax.xlane.f32.xlu0 %v3255_v10  ;;  %v6015_v10 = vld [vmem:[#allocation15 + $0xb8] sm:$0xff]  }
 0x71e   : > { %v3257_v25 = vpop.xlane.xlu0 %3256 }
 0x71f   : > { %v3258_v3 = vsub.f32 %v3253_v19, %v3257_v25  ;;  %v6013_v19 = vld [vmem:[#allocation15 + $0xf8] sm:$0xff]   ;;  %v6016_v25 = vld [vmem:[#allocation15 + $0x100] sm:$0xff]  }
 0x720   : > { %5469 = vmatprep.subr.bf16.mxu0 %v6013_v19  ;;  %v6049_v19 = vld [vmem:[#allocation13 + $0x10] sm:$0xff]  }
 0x721   : > { %v3259_v26 = vmul.f32 1.442695, %v3258_v3  ;;  %5470 = vmatpush3.bf16.msra.mxu0 %v6015_v10  ;;  %v6051_v10 = vld [vmem:[#allocation13 + $0x20] sm:$0xff]  }
 0x722   : > { %5499 = vmatprep.subr.bf16.mxu0 %v6018_v20  ;;  %v6052_v20 = vld [vmem:[#allocation13 + $0x28] sm:$0xff]  }
 0x723   : > { %6063 = vpow2.f32 %v3259_v26 }
 0x72d   : > { %v6064_v35 = vpop.eup %6063 }
 0x72e   : > { %4783 = vmatmul.mubr.msk.f32.vlgmr.msra.gmra.mrb[2].mxu1 %vm3254_vm3, %v6064_v35  ;;  %v3261_v38 = vsel %vm3254_vm3, %v6064_v35, 0.0 }
 0x72f   : > { %5656 = vmatpush1.bf16.msra.mxu1 %v5655_v31  ;;  %3262 = vadd.xlane.f32.xlu0 %v3261_v38 }
 0x730   : > { %3402 = vmatprep.mubr.f32.mxu1 %v6445_v50  ;;  %5658 = vmatprep.subr.bf16.mxu1 %v5657_v32  ;;  %v6019_v32 = vld [vmem:[#allocation15 + $0x108] sm:$0xff]  }
 0x732   : > { %4784 = vmatmul.mubr.msk.f32.vlgmr.msra.gmra.mrb[4].mxu1 %vm3254_vm3, %v6064_v35 }
 0x733   : > { %5660 = vmatpush1.bf16.msra.mxu1 %v5659_v39  ;;  %3473 = vmatprep.mubr.f32.mxu1 %v6445_v50 }
 0x734   : > { %5662 = vmatprep.subr.bf16.mxu1 %v5661_v40 }
 0x736   : > { %4785 = vmatmul.mubr.msk.f32.vlgmr.msra.gmra.mrb[6].mxu1 %vm3254_vm3, %v6064_v35 }
 0x737   : > { %5664 = vmatpush1.bf16.msra.mxu1 %v5663_v43  ;;  %3544 = vmatprep.mubr.f32.mxu1 %v6445_v50 }
 0x738   : > { %5433 = vmatprep.subr.bf16.mxu1 %v5983_v44  ;;  %v6025_v44 = vld [vmem:[#allocation15 + $0x158] sm:$0xff]  }
 0x73a   : > { %4786 = vmatmul.mubr.msk.f32.vlgmr.msra.gmra.mrb[8].mxu1 %vm3254_vm3, %v6064_v35 }
 0x73b   : > { %5434 = vmatpush3.bf16.msra.mxu1 %v5984_v45  ;;  %v6026_v45 = vld [vmem:[#allocation15 + $0x1d0] sm:$0xff]  }
 0x73c   : > { %5435 = vmatprep.subr.bf16.mxu1 %v5985_v46 }
 0x73f   : > { %5436 = vmatpush3.bf16.msra.mxu1 %v5987_v51  ;;  %v6029_v51 = vld [vmem:[#allocation15 + $0x160] sm:$0xff]  }
 0x740   : > { %5437 = vmatprep.subr.bf16.mxu1 %v5989_v52  ;;  %v6030_v52 = vld [vmem:[#allocation15 + $0x1d8] sm:$0xff]  }
 0x743   : > { %5438 = vmatpush3.bf16.msra.mxu1 %v5991_v55  ;;  %v6033_v55 = vld [vmem:[#allocation15 + $0x168] sm:$0xff]  }
 0x744   : > { %5439 = vmatprep.subr.bf16.mxu1 %v5993_v56  ;;  %v6034_v56 = vld [vmem:[#allocation15 + $0x1e0] sm:$0xff]  }
 0x747   : > { %5440 = vmatpush3.bf16.msra.mxu1 %v5995_v60  ;;  %v6037_v60 = vld [vmem:[#allocation15 + $0x170] sm:$0xff]  }
 0x748   : > { %5441 = vmatprep.subr.bf16.mxu1 %v5997_v61  ;;  %v6038_v61 = vld [vmem:[#allocation15 + $0x1e8] sm:$0xff]  }
 0x74b   : > { %5442 = vmatpush3.bf16.msra.mxu1 %v5999_v1  ;;  %v6041_v1 = vld [vmem:[#allocation15 + $0x178] sm:$0xff]  }
 0x74c   : > { %5443 = vmatprep.subr.bf16.mxu1 %v6001_v2  ;;  %v6042_v2 = vld [vmem:[#allocation15 + $0x1f0] sm:$0xff]  }
 0x74f   : > { %5444 = vmatpush3.bf16.msra.mxu1 %v6003_v59 }
 0x750   : > { %5445 = vmatprep.subr.bf16.mxu1 %v6005_v15  ;;  %v6045_v15 = vld [vmem:[#allocation15 + $0x1f8] sm:$0xff]  }
 0x753   : > { %5446 = vmatpush3.bf16.msra.mxu1 %v6007_v16  ;;  %v6047_v16 = vld [vmem:[#allocation13] sm:$0xff]  }
 0x754   : > { %5447 = vmatprep.subr.bf16.mxu1 %v6009_v17 }
 0x757   : > { %5448 = vmatpush3.bf16.msra.mxu1 %v6011_v18  ;;  %v6048_v18 = vld [vmem:[#allocation13 + $0x8] sm:$0xff]  }
 0x758   : > { %5477 = vmatprep.subr.bf16.mxu1 %v6014_v9  ;;  %v6050_v9 = vld [vmem:[#allocation13 + $0x18] sm:$0xff]  }
 0x7bc   : > { %v3263_v13 = vpop.xlane.xlu0 %3262 }
 0x7bd   : > { %6065 = vrcp.f32 %v3263_v13  ;;  %v6053_v13 = vld [vmem:[#allocation13 + $0x30] sm:$0xff]  }
 0x7c7   : > { %v7269_v14 = vpop.eup %6065 }
 0x801   : > { %v3333_v21 = vpop.f32.mrb[2].mxu1 }
 0x802   : > { %v3552_v22 = vmul.f32 %v7269_v14, %v3333_v21  ;;  %v3335_v6 = vpop.f32.mrb[3].mxu1  ;;  %v6055_v21 = vld [vmem:[#allocation16] sm:$0xff]  }
 0x803   : > { %v3553_v7 = vmul.f32 %v7269_v14, %v3335_v6  ;;  %v6057_v6 = vld [vmem:[#allocation16 + $0x10] sm:$0xff]  }
 0x804   : > { %v3576_v3 = vpack.c.bf16 %v3552_v22, %v3552_v22  ;;  %v6056_v22 = vld [vmem:[#allocation16 + $0x8] sm:$0xff]  }
 0x805   : > { %v3577_v23 = vpack.c.bf16 %v3553_v7, %v3553_v7  ;;  %v3404_v24 = vpop.f32.mrb[4].mxu1  ;;  %v6058_v7 = vld [vmem:[#allocation16 + $0x18] sm:$0xff]  }
 0x806   : > { %v3554_v26 = vmul.f32 %v7269_v14, %v3404_v24  ;;  %v3406_v27 = vpop.f32.mrb[5].mxu1  ;;  %v6060_v24 = vld [vmem:[#allocation16 + $0x28] sm:$0xff]  }
 0x807   : > { %v3555_v29 = vmul.f32 %v7269_v14, %v3406_v27  ;;  %4128 = vmatprep.mubr.bf16.mxu1 %v3577_v23  ;;  %v6059_v23 = vld [vmem:[#allocation16 + $0x20] sm:$0xff]  }
 0x808   : > { %4129 = vmatmul.mubr.bf16.vlgmr.msra.gmra.mrb[12].mxu1 %v3576_v3  ;;  %v3578_v34 = vpack.c.bf16 %v3554_v26, %v3554_v26 }
 0x809   : > { %v3579_v30 = vpack.c.bf16 %v3555_v29, %v3555_v29  ;;  %5478 = vmatpush3.bf16.msra.mxu1 %v6016_v25  ;;  %v3475_v31 = vpop.f32.mrb[6].mxu1  ;;  %v6062_v25 = vld [vmem:[#allocation16 + $0x38] sm:$0xff]  }
 0x80a   : > { %v3477_v35 = vpop.f32.mrb[7].mxu1  ;;  %5479 = vmatprep.subr.bf16.mxu1 %v6017_v28  ;;  %v3556_v59 = vmul.f32 %v7269_v14, %v3475_v31 }
 0x80b   : > { %v3557_v38 = vmul.f32 %v7269_v14, %v3477_v35  ;;  %4168 = vmatprep.mubr.bf16.mxu0 %v3579_v30 }
 0x80c   : > { %4169 = vmatmul.mubr.bf16.vlgmr.msra.gmra.mrb[4].mxu0 %v3578_v34  ;;  %v3580_v17 = vpack.c.bf16 %v3556_v59, %v3556_v59 }
 0x80d   : > { %v3581_v39 = vpack.c.bf16 %v3557_v38, %v3557_v38  ;;  %5480 = vmatpush3.bf16.msra.mxu1 %v6019_v32  ;;  %5500 = vmatpush3.bf16.msra.mxu0 %v6020_v33  ;;  %v3546_v40 = vpop.f32.mrb[8].mxu1 }
 0x80e   : > { %v3548_v43 = vpop.f32.mrb[9].mxu1  ;;  %5481 = vmatprep.subr.bf16.mxu1 %v6021_v36  ;;  %5501 = vmatprep.subr.bf16.mxu0 %v6022_v37  ;;  %v3558_v4 = vmul.f32 %v7269_v14, %v3546_v40 }
 0x80f   : > { %v3559_v46 = vmul.f32 %v7269_v14, %v3548_v43  ;;  %4208 = vmatprep.mubr.bf16.mxu1 %v3581_v39  ;;  %v6054_v14 = vld [vmem:[#allocation13 + $0x38] sm:$0xff]  }
 0x810   : > { %v3582_v11 = vpack.c.bf16 %v3558_v4, %v3558_v4 }
 0x811   : > { %v3583_v47 = vpack.c.bf16 %v3559_v46, %v3559_v46  ;;  %5482 = vmatpush3.bf16.msra.mxu1 %v6023_v41  ;;  %5502 = vmatpush3.bf16.msra.mxu0 %v6024_v42 }
 0x812   : > { %5483 = vmatprep.subr.bf16.mxu1 %v6025_v44  ;;  %5503 = vmatprep.subr.bf16.mxu0 %v6026_v45 }
 0x813   : > { %4248 = vmatprep.mubr.bf16.mxu0 %v3583_v47  ;;  %v4859_v47 = vld [vmem:[#allocation18 + $0x2] ss:$0 sm:$0xff] }
 0x815   : > { %5484 = vmatpush3.bf16.msra.mxu1 %v6027_v48  ;;  %5504 = vmatpush3.bf16.msra.mxu0 %v6028_v49 }
 0x816   : > { %5485 = vmatprep.subr.bf16.mxu1 %v6029_v51  ;;  %5505 = vmatprep.subr.bf16.mxu0 %v6030_v52 }
 0x819   : > { %5486 = vmatpush3.bf16.msra.mxu1 %v6031_v53  ;;  %5506 = vmatpush3.bf16.msra.mxu0 %v6032_v54 }
 0x81a   : > { %5487 = vmatprep.subr.bf16.mxu1 %v6033_v55  ;;  %5507 = vmatprep.subr.bf16.mxu0 %v6034_v56 }
 0x81d   : > { %5488 = vmatpush3.bf16.msra.mxu1 %v6035_v57  ;;  %5508 = vmatpush3.bf16.msra.mxu0 %v6036_v58  ;;  %v4860_v57 = vld [vmem:[#allocation18 + $0x3] ss:$0 sm:$0xff] }
 0x81e   : > { %5489 = vmatprep.subr.bf16.mxu1 %v6037_v60  ;;  %5509 = vmatprep.subr.bf16.mxu0 %v6038_v61 }
 0x821   : > { %5490 = vmatpush3.bf16.msra.mxu1 %v6039_v62  ;;  %5510 = vmatpush3.bf16.msra.mxu0 %v6040_v63 }
 0x822   : > { %5491 = vmatprep.subr.bf16.mxu1 %v6041_v1  ;;  %5511 = vmatprep.subr.bf16.mxu0 %v6042_v2 }
 0x825   : > { %5492 = vmatpush3.bf16.msra.mxu1 %v6043_v5  ;;  %5512 = vmatpush3.bf16.msra.mxu0 %v6044_v8 }
 0x826   : > { %5513 = vmatprep.subr.bf16.mxu0 %v6045_v15  ;;  %5606 = vmatprep.subr.bf16.mxu1 %v6445_v50 }
 0x828   : > { %4209 = vmatmul.mubr.bf16.vlgmr.msra.gmra.mrb[16].mxu1 %v3580_v17 }
 0x829   : > { %5514 = vmatpush3.bf16.msra.mxu0 %v6046_v0  ;;  %5607 = vmatpush3.bf16.msra.mxu1 %v6047_v16 }
 0x82a   : > { %5608 = vmatprep.subr.bf16.mxu1 %v6445_v50  ;;  %5622 = vmatprep.mubr.msk.bf16.mxu1 %vm6446_vm2, %v6445_v50 }
 0x82b   : > { %5626 = vmatprep.subr.bf16.mxu0 %v6445_v50 }
 0x82c   : > { %4249 = vmatmul.mubr.bf16.vlgmr.msra.gmra.mrb[8].mxu0 %v3582_v11 }
 0x82d   : > { %5609 = vmatpush3.bf16.msra.mxu1 %v6048_v18  ;;  %5642 = vmatprep.mubr.msk.bf16.mxu0 %vm6446_vm2, %v6445_v50 }
 0x82e   : > { %5610 = vmatprep.subr.bf16.mxu1 %v6445_v50  ;;  %5627 = vmatpush3.bf16.msra.mxu0 %v6055_v21 }
 0x82f   : > { %5628 = vmatprep.subr.bf16.mxu0 %v6445_v50 }
 0x831   : > { %5611 = vmatpush3.bf16.msra.mxu1 %v6049_v19 }
 0x832   : > { %5612 = vmatprep.subr.bf16.mxu1 %v6445_v50  ;;  %5629 = vmatpush3.bf16.msra.mxu0 %v6056_v22 }
 0x833   : > { %5630 = vmatprep.subr.bf16.mxu0 %v6445_v50 }
 0x835   : > { %5613 = vmatpush3.bf16.msra.mxu1 %v6050_v9 }
 0x836   : > { %5614 = vmatprep.subr.bf16.mxu1 %v6445_v50  ;;  %5631 = vmatpush3.bf16.msra.mxu0 %v6057_v6 }
 0x837   : > { %5632 = vmatprep.subr.bf16.mxu0 %v6445_v50 }
 0x839   : > { %5615 = vmatpush3.bf16.msra.mxu1 %v6051_v10 }
 0x83a   : > { %5616 = vmatprep.subr.bf16.mxu1 %v6445_v50  ;;  %5633 = vmatpush3.bf16.msra.mxu0 %v6058_v7 }
 0x83b   : > { %5634 = vmatprep.subr.bf16.mxu0 %v6445_v50 }
 0x83d   : > { %5617 = vmatpush3.bf16.msra.mxu1 %v6052_v20 }
 0x83e   : > { %5618 = vmatprep.subr.bf16.mxu1 %v6445_v50  ;;  %5635 = vmatpush3.bf16.msra.mxu0 %v6059_v23 }
 0x83f   : > { %5636 = vmatprep.subr.bf16.mxu0 %v6445_v50 }
 0x841   : > { %5619 = vmatpush3.bf16.msra.mxu1 %v6053_v13 }
 0x842   : > { %5620 = vmatprep.subr.bf16.mxu1 %v6445_v50  ;;  %5637 = vmatpush3.bf16.msra.mxu0 %v6060_v24 }
 0x843   : > { %5638 = vmatprep.subr.bf16.mxu0 %v6445_v50 }
 0x845   : > { %5621 = vmatpush3.bf16.msra.mxu1 %v6054_v14 }
 0x848   : > { %5623 = vmatmul.mubr.bf16.vlgmr.msra.gmra.mrb[20].mxu1 %v7256_v12  ;;  %v6061_v12 = vld [vmem:[#allocation16 + $0x30] sm:$0xff]  }
 0x849   : > { %5639 = vmatpush3.bf16.msra.mxu0 %v6061_v12 }
 0x84a   : > { %5640 = vmatprep.subr.bf16.mxu0 %v6445_v50 }
 0x84d   : > { %5641 = vmatpush3.bf16.msra.mxu0 %v6062_v25 }
 0x8db   : > { %v5449_v3 = vpop.f32.mrb[12].mxu1 }
 0x8dc   : > { %v5450_v26 = vpop.f32.mrb[13].mxu1 }
 0x8dd   : > { %v5451_v27 = vadd.f32 %v5450_v26, %v5449_v3  ;;  %v5452_v28 = vpop.f32.mrb[14].mxu1 }
 0x8de   : > { %v5453_v29 = vpop.f32.mrb[15].mxu1 }
 0x8df   : > { %v5471_v30 = vpop.f32.mrb[4].mxu0 }
 0x8e0   : > { %v5472_v31 = vpop.f32.mrb[5].mxu0 }
 0x8e1   : > { %v5473_v32 = vadd.f32 %v5472_v31, %v5471_v30  ;;  %v5474_v33 = vpop.f32.mrb[6].mxu0 }
 0x8e2   : > { %v5475_v34 = vpop.f32.mrb[7].mxu0 }
 0x8e3   : > { %v4171_v35 = vadd.f32 %v5473_v32, %v5451_v27 }
 0x8fb   : > { %v5493_v36 = vpop.f32.mrb[16].mxu1 }
 0x8fc   : > { %v5494_v37 = vpop.f32.mrb[17].mxu1 }
 0x8fd   : > { %v5495_v38 = vadd.f32 %v5494_v37, %v5493_v36  ;;  %v5496_v39 = vpop.f32.mrb[18].mxu1 }
 0x8fe   : > { %v5497_v40 = vpop.f32.mrb[19].mxu1 }
 0x8ff   : > { %v4211_v41 = vadd.f32 %v5495_v38, %v4171_v35  ;;  %v5515_v50 = vpop.f32.mrb[8].mxu0 }
 0x900   : > { %v5516_v42 = vpop.f32.mrb[9].mxu0 }
 0x901   : > { %v5517_v43 = vadd.f32 %v5516_v42, %v5515_v50  ;;  %v5518_v44 = vpop.f32.mrb[10].mxu0 }
 0x902   : > { %v5519_v45 = vpop.f32.mrb[11].mxu0 }
 0x903   : > { %v4251_v46 = vadd.f32 %v5517_v43, %v4211_v41 }
 0x91b   : > { %v4338_v48 = vpop.f32.mrb[20].mxu1 }
 0x91c   : > { %v4339_v49 = vadd.f32 %v4338_v48, %v4251_v46  ;;  %v5624_v51 = vpop.f32.mrb[21].mxu1 }
 0x91d   : > { %v4341_v52 = vpop.f32.mrb[22].mxu1 }
 0x91e   : > { %v4350_v53 = vadd.f32 %v4859_v47, %v4339_v49  ;;  %v5625_v54 = vpop.f32.mrb[23].mxu1 }
 0x920   : > { %v4351_v55 = vmax.f32 %v4350_v53, 0.0 }
 0x922   : > { %v4352_v56 = vpack.c.bf16 %v4351_v55, %v4351_v55 }
 0x924   : > { %5643 = vmatmul.mubr.bf16.vlgmr.msra.gmra.mrb[12].mxu0 %v4352_v56 }
 0x9f7   : > { %v4457_v58 = vpop.f32.mrb[12].mxu0 }
 0x9f8   : > { %v4458_v60 = vadd.f32 %v4860_v57, %v4457_v58  ;;  %v5644_v61 = vpop.f32.mrb[13].mxu0 }
 0x9f9   : > { %v4460_v62 = vpop.f32.mrb[14].mxu0 }
 0x9fa   : > { %v4463_v63 = vmax.f32 %v4458_v60, 0.0  ;;  %v5645_v1 = vpop.f32.mrb[15].mxu0 }
 0x9fc   : > { %4464 = vst [vmem:[#allocation19] sm:$0xff] %v4463_v63 }
 0x9fd PF: > { %p5749_p13 = scmp.eq.s32.totalorder %s6530_s15, 1  ;;  %s6448_s28 = smov [#allocation19]  }
 0x9fe   : > { %s4474_s18 = sshll.u32 %s6448_s28, 4  ;;  %s4475_s18 = int_to_ptr.vmem [resolvable:$true] %s4474_s18 }
 0x9ff   : > { %s6323_s26 = scalar_lea.vmem %s4475_s18, 128  ;;  %p6330_p5 = scmp.lt.s32.totalorder %s4475_s18, %s4475_s18 }
 0xa00   : > { %p6324_p0 = scmp.ne.s32.totalorder %s4475_s18, %s6323_s26  ;;  %p6331_p12 = scmp.lt.s32.totalorder %s6323_s26, %s6323_s26 }
 0xa02   : > { %p6325_p2 = pnand %p6324_p0, %p5749_p13  ;;  %p6332_p6 = por %p6331_p12, %p6330_p5 }
 0xa04   : > { %p6326_p8 = pneg %p6325_p2 }
 0xa06   : > { %p6333_p9 = pnand %p6332_p6, %p6326_p8 }
 0xa08   : > { %6336 = shalt.err (!%p6333_p9)
}
 0xa09   : > { %s7384_s17 = sld [smem:[#allocation31_spill]] }
 0xa0f   : > { %s6337_s2 = scalar_lea.hbm %s7384_s17, 128 }
 0xa10   : > { %p6338_p7 = scmp.ne.s32.totalorder %s7384_s17, %s6337_s2  ;;  %p6343_p3 = scmp.lt.u32.totalorder %s6337_s2, %s7384_s17 }
 0xa12   : > { %p6339_p1 = pnand %p6338_p7, %p5749_p13 }
 0xa14   : > { %p6340_p4 = pneg %p6339_p1 }
 0xa16   : > { %p6345_p10 = pnand %p6343_p3, %p6340_p4 }
 0xa18   : > { %6348 = shalt.err (!%p6345_p10)
}
 0xa19   : > { %5702 = dma.vmem_to_hbm [thread:$0]  (%p5749_p13), %s4475_s18, 128, %s7384_s17, [#allocation6]  }
 0xa1a   : > { %6398 = dma.done.wait (%p5749_p13), [#allocation6], 128  }
 0xa1b   : > { %6400 = vsyncadd (%p5749_p13), [#allocation6], 4294967168 }
 0xa1c PF: > { %s29_s14 = sadd.s32 1, %s6423_s14   ;;  %s7385_s30 = smov %s6407_s10 }
 0xa1d   : > { %p26_p11 = scmp.ge.s32.totalorder %s29_s14, 4   ;;  %s7386_s10 = smov %s6411_s11 }
 0xa1e   : > { %s7387_s11 = smov %s6734_s3  ;;  %s7388_s12 = smov %s6419_s13 }
 0xa1f   : > { %s7389_s13 = smov %s7391_s29  ;;  %28 = sbr.rel (!%p26_p11) target bundleno = 14 (0xe), region = 143 }
 0xa26   :  { %4487 = vsyncpa [#allocation5], 1 }
 0xa27   :  { %4489 = vsyncpa [#allocation5 + $0x1], 1 }
 0xa28   :  { %4490 = vsyncpa [#allocation8], 1 }
 0xa29   :  { %4492 = vsyncpa [#allocation8 + $0x1], 1 }
 0xa2a   :  { %4493 = vsyncpa [#allocation11], 1 }
 0xa2b   :  { %4494 = vsyncpa [#allocation14], 1 }
 0xa2c   :  { %4495 = vsyncpa [#allocation17], 1 }
 0xa2d   :  { %4496 = vsyncpa [#allocation6], 1 }
 0xa2e   :  { %4498 = vsyncpa [#allocation6 + $0x1], 1 }

</bundles_post_ra>
